<compile_context>
chip_gen: v5e
topology: v5e:2x2
jax: 0.10.0
libtpu: 0.0.40
codegen_flags: <defaults>
</compile_context>

<pallas_src>
import jax
import jax.numpy as jnp
from jax.experimental import pallas as pl
from jax.experimental.pallas import tpu as pltpu

HIDDEN = 512
OUT_PAD = 128   # lane-dense padded width of the 1-wide final layer (kept at 128)
TK_MAX = 4096   # max K-slab width streamed per reduction step


def _round_up(x, m):
    return -(-x // m) * m


def _choose_batch_tile(B):
    """Rows per grid step.
      * tiny B: tile = round_up(B, 8) -> no MXU work on padded rows,
      * moderate/large B: >= 2 tiles so both v7x TensorCores get work,
      * large B: ~512-row tiles to amortize the ~0.35us fixed per-step overhead,
      * tile derived from the tile count so batch padding stays small.
    """
    b8 = _round_up(B, 8)
    if b8 <= 64:
        return b8
    n_tiles = max(2, -(-b8 // 512))
    return _round_up(-(-b8 // n_tiles), 8)


def _choose_k_tile(D):
    """K-slab width over the flattened feature dim.  Small D (the common GAN
    case) keeps all of w1 VMEM-resident (n_k == 1); large D streams <=4096-wide
    slabs, sized from the slab count so zero-padding of D stays minimal."""
    Dp = _round_up(D, 128)
    if Dp <= TK_MAX:
        return Dp
    n_k = -(-Dp // TK_MAX)
    return _round_up(-(-Dp // n_k), 128)


def _vmem_limit_bytes(tb, tk):
    """Scoped-VMEM budget from the actual buffer sizes (conservatively assumes
    two buffers per input) plus headroom; capped at v7x's 64 MiB physical."""
    bf16, f32 = 2, 4
    est = (
        2 * tb * tk * bf16             # x tile (double-buffered)
        + 2 * tk * HIDDEN * bf16       # w1 K-slab (double-buffered)
        + 2 * HIDDEN * HIDDEN * bf16   # w2 (resident; assume 2 buffers)
        + 2 * HIDDEN * OUT_PAD * bf16  # w3 (padded, resident)
        + 4 * HIDDEN * f32             # b1, b2
        + tb * HIDDEN * f32            # layer-1 f32 accumulator scratch
        + 2 * tb * 128 * f32           # output tile (lane-padded in VMEM)
        + 2 * tb * HIDDEN * (f32 + bf16)  # h1/h2 temporaries headroom
    )
    return min(64 << 20, max(16 << 20, int(est * 1.5)))


def _fccritic_kernel(x_ref, w1_ref, b1_ref, w2_ref, b2_ref, w3_ref, b3_ref,
                     o_ref, acc_ref):
    """Grid = (batch tiles, K slabs); reduction (K) axis last."""
    k = pl.program_id(1)

    @pl.when(k == 0)
    def _():
        acc_ref[...] = jnp.zeros_like(acc_ref)

    # Layer 1 partial: accumulate this K-slab of x @ w1 in f32 on the MXU.
    acc_ref[...] += jnp.dot(x_ref[...], w1_ref[...],
                            preferred_element_type=jnp.float32)

    @pl.when(k == pl.num_programs(1) - 1)
    def _():
        h1 = jnp.maximum(acc_ref[...] + b1_ref[...], 0.0).astype(jnp.bfloat16)
        h2 = jnp.dot(h1, w2_ref[...], preferred_element_type=jnp.float32)
        h2 = jnp.maximum(h2 + b2_ref[...], 0.0).astype(jnp.bfloat16)
        o = jnp.dot(h2, w3_ref[...], preferred_element_type=jnp.float32)  # [tb, OUT_PAD]
        # w3's padded columns are exactly zero, so a lane-sum of the padded
        # result equals column 0 exactly (XLU reduce; that slot is otherwise
        # idle).  Only the real score column is stored / DMA'd back to HBM.
        o_ref[...] = jnp.sum(o, axis=1, keepdims=True) + b3_ref[...]


def fccritic_forward(image_batch, params):
    """image_batch: [B, H, W, C] -> scores [B, 1] float32 (matches FCCritic.forward)."""
    w1, b1, w2, b2, w3, b3 = params
    B = image_batch.shape[0]
    D = w1.shape[0]

    # Glue (plain JAX): flatten H*W*C and cast to bf16.
    x = image_batch.reshape(B, D).astype(jnp.bfloat16)

    # Adaptive tiling.
    tb = _choose_batch_tile(B)
    n_b = pl.cdiv(B, tb)
    Bp = n_b * tb
    tk = _choose_k_tile(D)
    n_k = pl.cdiv(D, tk)
    Dp = n_k * tk

    if (Bp, Dp) != (B, D):
        x = jnp.pad(x, ((0, Bp - B), (0, Dp - D)))

    # bf16 weights (f32 accumulate in-kernel); zero-pad w1 along D to the K-slab
    # multiple (zero rows contribute nothing) and w3 to a lane-dense 128 columns.
    w1b = w1.astype(jnp.bfloat16)
    if Dp != D:
        w1b = jnp.pad(w1b, ((0, Dp - D), (0, 0)))
    w2b = w2.astype(jnp.bfloat16)
    w3p = jnp.zeros((HIDDEN, OUT_PAD), jnp.bfloat16).at[:, :1].set(w3.astype(jnp.bfloat16))
    b1f = b1.astype(jnp.float32)
    b2f = b2.astype(jnp.float32)
    b3f = b3.astype(jnp.float32)          # shape (1, 1)

    def const(i, k):   # weights/biases fetched once, stay VMEM-resident
        return (0, 0)

    # TODO(synk): if VMEM gets tight at very large D/tb, add pipeline_mode=
    # pl.Buffered(...) on the constant-index weight specs (or verify via the
    # MLIR dump that they are single-buffered) instead of shrinking tiles.

    out = pl.pallas_call(
        _fccritic_kernel,
        out_shape=jax.ShapeDtypeStruct((Bp, 1), jnp.float32),
        grid=(n_b, n_k),
        in_specs=[
            pl.BlockSpec((tb, tk), lambda i, k: (i, k)),          # x: batch x K tiles
            pl.BlockSpec((tk, HIDDEN), lambda i, k: (k, 0)),      # w1: K slabs
            pl.BlockSpec((1, HIDDEN), const),                     # b1
            pl.BlockSpec((HIDDEN, HIDDEN), const),                # w2
            pl.BlockSpec((1, HIDDEN), const),                     # b2
            pl.BlockSpec((HIDDEN, OUT_PAD), const),               # w3 (padded)
            pl.BlockSpec((1, 1), const),                          # b3
        ],
        out_specs=pl.BlockSpec((tb, 1), lambda i, k: (i, 0)),     # only real scores hit HBM
        scratch_shapes=[pltpu.VMEM((tb, HIDDEN), jnp.float32)],   # layer-1 f32 accumulator
        compiler_params=pltpu.CompilerParams(
            dimension_semantics=("parallel", "arbitrary"),        # batch || , K reduction
            vmem_limit_bytes=_vmem_limit_bytes(tb, tk),
        ),
    )(x, w1b, b1f, w2b, b2f, w3p, b3f)

    return out[:B]   # strip batch padding


def init_params(key, img_size, channels, hidden=HIDDEN):
    """Deterministic nn.Linear-style init (uniform +-1/sqrt(fan_in)), [in, out] layout."""
    D = img_size * img_size * channels
    ks = jax.random.split(key, 6)

    def lin(kw, kb, fan_in, fan_out):
        bound = 1.0 / jnp.sqrt(fan_in)
        w = jax.random.uniform(kw, (fan_in, fan_out), jnp.float32, -bound, bound)
        b = jax.random.uniform(kb, (1, fan_out), jnp.float32, -bound, bound)
        return w, b

    w1, b1 = lin(ks[0], ks[1], D, hidden)
    w2, b2 = lin(ks[2], ks[3], hidden, hidden)
    w3, b3 = lin(ks[4], ks[5], hidden, 1)
    return (w1, b1, w2, b2, w3, b3)


if __name__ == "__main__":
    key = jax.random.PRNGKey(0)
    k_img, k_param = jax.random.split(key)

    batch, img_size, channels = 2, 16, 4          # x: [2, 16, 16, 4] -> D = 1024
    image_batch = jax.random.normal(
        k_img, (batch, img_size, img_size, channels), jnp.float32)

    params = init_params(k_param, img_size, channels)

    out = fccritic_forward(image_batch, params)
    out = jax.block_until_ready(out)

    # Pure-JAX reference matching the kernel's numerics (bf16 inputs, f32 accumulate).
    w1, b1, w2, b2, w3, b3 = params
    xb = image_batch.reshape(batch, -1).astype(jnp.bfloat16)
    h1 = jnp.maximum(
        jnp.dot(xb, w1.astype(jnp.bfloat16), preferred_element_type=jnp.float32) + b1, 0.0)
    h2 = jnp.maximum(
        jnp.dot(h1.astype(jnp.bfloat16), w2.astype(jnp.bfloat16),
                preferred_element_type=jnp.float32) + b2, 0.0)
    ref = jnp.dot(h2.astype(jnp.bfloat16), w3.astype(jnp.bfloat16),
                  preferred_element_type=jnp.float32) + b3

    assert out.shape == (batch, 1)
    assert jnp.allclose(out, ref, atol=2e-3, rtol=2e-3)

    print("KERNEL_OK")
</pallas_src>

<mosaic_0001>
module attributes {stable_mosaic.version = 11 : i64} {
  func.func @_fccritic_kernel(%arg0: i32, %arg1: i32, %arg2: memref<8x1024xbf16, #tpu.memory_space<vmem>>, %arg3: memref<1024x512xbf16, #tpu.memory_space<vmem>>, %arg4: memref<1x512xf32, #tpu.memory_space<vmem>>, %arg5: memref<512x512xbf16, #tpu.memory_space<vmem>>, %arg6: memref<1x512xf32, #tpu.memory_space<vmem>>, %arg7: memref<512x128xbf16, #tpu.memory_space<vmem>>, %arg8: memref<1x1xf32, #tpu.memory_space<vmem>>, %arg9: memref<8x1xf32, #tpu.memory_space<vmem>>, %arg10: memref<8x512xf32, #tpu.memory_space<vmem>>) attributes {dimension_semantics = [#tpu.dimension_semantics<parallel>, #tpu.dimension_semantics<arbitrary>], iteration_bounds = array<i64: 1, 1>, scalar_prefetch = 0 : i64, scratch_operands = 1 : i64, tpu.core_type = #tpu.core_type<tc>, window_params = [{transform_indices = @transform_0, window_bounds = array<i64: 8, 1024>}, {transform_indices = @transform_1, window_bounds = array<i64: 1024, 512>}, {pipeline_mode = #tpu.pipeline_mode<synchronous>, transform_indices = @transform_2, window_bounds = array<i64: 1, 512>}, {pipeline_mode = #tpu.pipeline_mode<synchronous>, transform_indices = @transform_3, window_bounds = array<i64: 512, 512>}, {pipeline_mode = #tpu.pipeline_mode<synchronous>, transform_indices = @transform_4, window_bounds = array<i64: 1, 512>}, {pipeline_mode = #tpu.pipeline_mode<synchronous>, transform_indices = @transform_5, window_bounds = array<i64: 512, 128>}, {pipeline_mode = #tpu.pipeline_mode<synchronous>, transform_indices = @transform_6, window_bounds = array<i64: 1, 1>}, {transform_indices = @transform_7, window_bounds = array<i64: 8, 1>}]} {
    %c0_i32 = arith.constant 0 : i32
    %0 = arith.cmpi eq, %arg1, %c0_i32 : i32
    %1 = arith.extui %0 : i1 to i32
    %c0_i32_0 = arith.constant 0 : i32
    %2 = arith.cmpi ne, %1, %c0_i32_0 : i32
    scf.if %2 {
      %cst_10 = arith.constant 0.000000e+00 : f32
      %12 = vector.broadcast %cst_10 : f32 to vector<8x512xf32>
      %c0_11 = arith.constant 0 : index
      %c0_12 = arith.constant 0 : index
      %13 = vector.load %arg10[%c0_11, %c0_12] : memref<8x512xf32, #tpu.memory_space<vmem>>, vector<8x512xf32>
      tpu.vector_store %arg10[%c0_11, %c0_12], %12 {strides = array<i32>} : memref<8x512xf32, #tpu.memory_space<vmem>>, vector<8x512xf32>,
    } else {
    }
    %c0 = arith.constant 0 : index
    %c0_1 = arith.constant 0 : index
    %3 = vector.load %arg10[%c0, %c0_1] : memref<8x512xf32, #tpu.memory_space<vmem>>, vector<8x512xf32>
    %c0_2 = arith.constant 0 : index
    %c0_3 = arith.constant 0 : index
    %4 = vector.load %arg2[%c0_2, %c0_3] : memref<8x1024xbf16, #tpu.memory_space<vmem>>, vector<8x1024xbf16>
    %c0_4 = arith.constant 0 : index
    %c0_5 = arith.constant 0 : index
    %5 = vector.load %arg3[%c0_4, %c0_5] : memref<1024x512xbf16, #tpu.memory_space<vmem>>, vector<1024x512xbf16>
    %cst = arith.constant dense<0.000000e+00> : vector<8x512xf32>
    %6 = tpu.matmul %4, %5, %cst {dimension_numbers = #tpu.dot_dimension_numbers<[1], [0], [0], [1], [0, 0, 1, 1], [], []>} : vector<8x1024xbf16>, vector<1024x512xbf16>, vector<8x512xf32> -> vector<8x512xf32>
    %7 = arith.addf %3, %6 : vector<8x512xf32>
    %c0_6 = arith.constant 0 : index
    %c0_7 = arith.constant 0 : index
    %8 = vector.load %arg10[%c0_6, %c0_7] : memref<8x512xf32, #tpu.memory_space<vmem>>, vector<8x512xf32>
    tpu.vector_store %arg10[%c0_6, %c0_7], %7 {strides = array<i32>} : memref<8x512xf32, #tpu.memory_space<vmem>>, vector<8x512xf32>,
    %c0_i32_8 = arith.constant 0 : i32
    %9 = arith.cmpi eq, %arg1, %c0_i32_8 : i32
    %10 = arith.extui %9 : i1 to i32
    %c0_i32_9 = arith.constant 0 : i32
    %11 = arith.cmpi ne, %10, %c0_i32_9 : i32
    scf.if %11 {
      %c0_10 = arith.constant 0 : index
      %c0_11 = arith.constant 0 : index
      %12 = vector.load %arg10[%c0_10, %c0_11] : memref<8x512xf32, #tpu.memory_space<vmem>>, vector<8x512xf32>
      %c0_12 = arith.constant 0 : index
      %c0_13 = arith.constant 0 : index
      %13 = vector.load %arg4[%c0_12, %c0_13] : memref<1x512xf32, #tpu.memory_space<vmem>>, vector<1x512xf32>
      %14 = vector.broadcast %13 : vector<1x512xf32> to vector<8x512xf32>
      %15 = arith.addf %12, %14 : vector<8x512xf32>
      %cst_14 = arith.constant 0.000000e+00 : f32
      %16 = vector.broadcast %cst_14 : f32 to vector<8x512xf32>
      %17 = arith.maximumf %15, %16 : vector<8x512xf32>
      %18 = arith.truncf %17 : vector<8x512xf32> to vector<8x512xbf16>
      %c0_15 = arith.constant 0 : index
      %c0_16 = arith.constant 0 : index
      %19 = vector.load %arg5[%c0_15, %c0_16] : memref<512x512xbf16, #tpu.memory_space<vmem>>, vector<512x512xbf16>
      %cst_17 = arith.constant dense<0.000000e+00> : vector<8x512xf32>
      %20 = tpu.matmul %18, %19, %cst_17 {dimension_numbers = #tpu.dot_dimension_numbers<[1], [0], [0], [1], [0, 0, 1, 1], [], []>} : vector<8x512xbf16>, vector<512x512xbf16>, vector<8x512xf32> -> vector<8x512xf32>
      %c0_18 = arith.constant 0 : index
      %c0_19 = arith.constant 0 : index
      %21 = vector.load %arg6[%c0_18, %c0_19] : memref<1x512xf32, #tpu.memory_space<vmem>>, vector<1x512xf32>
      %22 = vector.broadcast %21 : vector<1x512xf32> to vector<8x512xf32>
      %23 = arith.addf %20, %22 : vector<8x512xf32>
      %cst_20 = arith.constant 0.000000e+00 : f32
      %24 = vector.broadcast %cst_20 : f32 to vector<8x512xf32>
      %25 = arith.maximumf %23, %24 : vector<8x512xf32>
      %26 = arith.truncf %25 : vector<8x512xf32> to vector<8x512xbf16>
      %c0_21 = arith.constant 0 : index
      %c0_22 = arith.constant 0 : index
      %27 = vector.load %arg7[%c0_21, %c0_22] : memref<512x128xbf16, #tpu.memory_space<vmem>>, vector<512x128xbf16>
      %cst_23 = arith.constant dense<0.000000e+00> : vector<8x128xf32>
      %28 = tpu.matmul %26, %27, %cst_23 {dimension_numbers = #tpu.dot_dimension_numbers<[1], [0], [0], [1], [0, 0, 1, 1], [], []>} : vector<8x512xbf16>, vector<512x128xbf16>, vector<8x128xf32> -> vector<8x128xf32>
      %cst_24 = arith.constant dense<0.000000e+00> : vector<8xf32>
      %29 = vector.multi_reduction <add>, %28, %cst_24 [1] : vector<8x128xf32> to vector<8xf32>
      %30 = vector.shape_cast %29 : vector<8xf32> to vector<8x1xf32>
      %c0_25 = arith.constant 0 : index
      %c0_26 = arith.constant 0 : index
      %31 = vector.load %arg8[%c0_25, %c0_26] : memref<1x1xf32, #tpu.memory_space<vmem>>, vector<1x1xf32>
      %32 = vector.broadcast %31 : vector<1x1xf32> to vector<8x1xf32>
      %33 = arith.addf %30, %32 : vector<8x1xf32>
      %c0_27 = arith.constant 0 : index
      %c0_28 = arith.constant 0 : index
      %34 = vector.load %arg9[%c0_27, %c0_28] : memref<8x1xf32, #tpu.memory_space<vmem>>, vector<8x1xf32>
      tpu.vector_store %arg9[%c0_27, %c0_28], %33 {strides = array<i32>} : memref<8x1xf32, #tpu.memory_space<vmem>>, vector<8x1xf32>,
    } else {
    }
    return
  }
  func.func @transform_0(%arg0: i32, %arg1: i32) -> (i32, i32) {
    %c0_i32 = arith.constant 0 : i32
    return %arg0, %arg1 : i32, i32
  }
  func.func @transform_1(%arg0: i32, %arg1: i32) -> (i32, i32) {
    %c0_i32 = arith.constant 0 : i32
    %c0_i32_0 = arith.constant 0 : i32
    return %arg1, %c0_i32 : i32, i32
  }
  func.func @transform_2(%arg0: i32, %arg1: i32) -> (i32, i32) {
    %c0_i32 = arith.constant 0 : i32
    %c0_i32_0 = arith.constant 0 : i32
    %c0_i32_1 = arith.constant 0 : i32
    return %c0_i32, %c0_i32_0 : i32, i32
  }
  func.func @transform_3(%arg0: i32, %arg1: i32) -> (i32, i32) {
    %c0_i32 = arith.constant 0 : i32
    %c0_i32_0 = arith.constant 0 : i32
    %c0_i32_1 = arith.constant 0 : i32
    return %c0_i32, %c0_i32_0 : i32, i32
  }
  func.func @transform_4(%arg0: i32, %arg1: i32) -> (i32, i32) {
    %c0_i32 = arith.constant 0 : i32
    %c0_i32_0 = arith.constant 0 : i32
    %c0_i32_1 = arith.constant 0 : i32
    return %c0_i32, %c0_i32_0 : i32, i32
  }
  func.func @transform_5(%arg0: i32, %arg1: i32) -> (i32, i32) {
    %c0_i32 = arith.constant 0 : i32
    %c0_i32_0 = arith.constant 0 : i32
    %c0_i32_1 = arith.constant 0 : i32
    return %c0_i32, %c0_i32_0 : i32, i32
  }
  func.func @transform_6(%arg0: i32, %arg1: i32) -> (i32, i32) {
    %c0_i32 = arith.constant 0 : i32
    %c0_i32_0 = arith.constant 0 : i32
    %c0_i32_1 = arith.constant 0 : i32
    return %c0_i32, %c0_i32_0 : i32, i32
  }
  func.func @transform_7(%arg0: i32, %arg1: i32) -> (i32, i32) {
    %c0_i32 = arith.constant 0 : i32
    %c0_i32_0 = arith.constant 0 : i32
    return %arg0, %c0_i32 : i32, i32
  }
}

</mosaic_0001>

<bundles_post_ra>
// kernel: tpu_custom_call.1
= control target key start
LH: loop header
LB: loop body
LE: loop exit
PB: predicated region body
PF: predicated region fallthrough
CT: control target
= control target key end

     0   :  { %s5877_s0 = inlined_call_operand.hbm [shape: bf16[8,1024], index: 0, kind: input, shape index: {}]   ;;  %s5878_s1 = inlined_call_operand.hbm [shape: bf16[1024,512], index: 1, kind: input, shape index: {}]   ;;  %s5879_s2 = inlined_call_operand.hbm [shape: f32[1,512], index: 2, kind: input, shape index: {}]   ;;  %s5880_s3 = inlined_call_operand.hbm [shape: bf16[512,512], index: 3, kind: input, shape index: {}]   ;;  %s5881_s4 = inlined_call_operand.vmem [shape: f32[1,512], index: 4, kind: input, shape index: {}]   ;;  %s5882_s5 = inlined_call_operand.hbm [shape: bf16[512,128], index: 5, kind: input, shape index: {}]   ;;  %s5883_s6 = inlined_call_operand.<no memory space> [shape: f32[1,1], index: 6, kind: input, shape index: {}]   ;;  %s5884_s7 = inlined_call_operand.vmem [shape: f32[8,1], index: 7, kind: output, shape index: {}]  }
   0x1   :  { %v12_v0 = vstv %s5883_s6 }
   0x2   :  { %13 = vst [vmem:[#allocation3] sm:$0x1] %v12_v0 }
   0x3   :  { %14 = vsyncpa [#allocation5], 0 }
   0x4   :  { %15 = vsyncpa [#allocation7], 0  ;;  %s32_s28 = sshll.u32 %s5878_s1, 4  ;;  %s33_s28 = int_to_ptr.hbm [resolvable:$true] %s32_s28 }
   0x5   :  { %16 = vsyncpa [#allocation10], 0  ;;  %s5669_s29 = smov [#allocation6]   ;;  %s56_s10 = sshll.u32 %s5880_s3, 4  ;;  %s57_s10 = int_to_ptr.hbm [resolvable:$true] %s56_s10 }
   0x6   :  { %s34_s30 = sshll.u32 %s5669_s29, 4  ;;  %s5670_s11 = smov 256   ;;  %s35_s30 = int_to_ptr.vmem [resolvable:$true] %s34_s30 }
   0x7   :  { %s5671_s12 = smov 16   ;;  %s5672_s6 = smov [#allocation9]  }
   0x8   :  { %40 = dma.hbm_to_vmem [thread:$0]  %s33_s28, 32768, %s35_s30, [#allocation7], %s5670_s11, %s5670_s11, %s5671_s12  }
   0x9   :  { %s58_s13 = sshll.u32 %s5672_s6, 4  ;;  %s22_s16 = sshll.u32 %s5877_s0, 4  ;;  %s59_s13 = int_to_ptr.vmem [resolvable:$true] %s58_s13  ;;  %s23_s16 = int_to_ptr.hbm [resolvable:$true] %s22_s16 }
   0xa   :  { %64 = dma.hbm_to_vmem [thread:$0]  %s57_s10, 16384, %s59_s13, [#allocation10], %s5670_s11, %s5670_s11, %s5671_s12  }
   0xb   :  { %s46_s18 = sshll.u32 %s5879_s2, 4  ;;  %s5673_s19 = smov [#allocation4]   ;;  %s47_s18 = int_to_ptr.hbm [resolvable:$true] %s46_s18 }
   0xc   :  { %s24_s20 = sshll.u32 %s5673_s19, 4  ;;  %s5674_s3 = smov [#allocation8]   ;;  %s25_s20 = int_to_ptr.vmem [resolvable:$true] %s24_s20 }
   0xd   :  { %27 = dma.hbm_to_vmem [thread:$0]  %s23_s16, 512, %s25_s20, [#allocation5]  }
   0xe   :  { %s48_s21 = sshll.u32 %s5674_s3, 4  ;;  %s71_s24 = sshll.u32 %s5882_s5, 4  ;;  %s49_s21 = int_to_ptr.vmem [resolvable:$true] %s48_s21  ;;  %s72_s24 = int_to_ptr.hbm [resolvable:$true] %s71_s24 }
   0xf   :  { %51 = dma.hbm_to_vmem [thread:$0]  %s47_s18, 64, %s49_s21, [#allocation7]  }
  0x10   :  { %s5675_s0 = smov [#allocation11]   ;;  %s5676_s26 = smov 64  }
  0x11   :  { %s73_s25 = sshll.u32 %s5675_s0, 4  ;;  %s5677_s27 = smov 4   ;;  %s74_s25 = int_to_ptr.vmem [resolvable:$true] %s73_s25 }
  0x12   :  { %79 = dma.hbm_to_vmem [thread:$0]  %s72_s24, 4096, %s74_s25, [#allocation10], %s5676_s26, %s5676_s26, %s5677_s27  }
  0x13   :  { %5663 = dma.done.wait [#allocation5], 512  }
  0x14   :  { %5664 = vsyncadd [#allocation5], 4294966784 }
  0x15   :  { %5665 = dma.done.wait [#allocation7], 32832  }
  0x16   :  { %5666 = vsyncadd [#allocation7], 4294934464 }
  0x17   :  { %5667 = dma.done.wait [#allocation10], 20480  }
  0x18   :  { %5668 = vsyncadd [#allocation10], 4294946816  ;;  %v3567_v1 = vld [vmem:[#allocation6 + $0xe0] sm:$0xf]  ;;  %v5147_v2 = vld [vmem:[#allocation6 + $0xec] sm:$0xf0] }
  0x19   :  { %v3695_v3 = vld [vmem:[#allocation6 + $0x1e0] sm:$0xf]  ;;  %v3568_v4 = vor.u32 %v5147_v2, %v3567_v1  ;;  %v5179_v5 = vld [vmem:[#allocation6 + $0x1ec] sm:$0xf0]  ;;  %vm3444_vm0 = vcmask 7168  }
  0x1a   :  { %v3823_v6 = vld [vmem:[#allocation6 + $0x2e0] sm:$0xf]  ;;  %v5211_v7 = vld [vmem:[#allocation6 + $0x2ec] sm:$0xf0]  ;;  %v3696_v8 = vor.u32 %v5179_v5, %v3695_v3 }
  0x1b   :  { %v3824_v9 = vor.u32 %v5211_v7, %v3823_v6  ;;  %v3951_v10 = vld [vmem:[#allocation6 + $0x3e0] sm:$0xf]  ;;  %v5243_v11 = vld [vmem:[#allocation6 + $0x3ec] sm:$0xf0]  ;;  %1682 = vmatpush.bf16.msra.mxu0 %v3568_v4 }
  0x1c   :  { %v3551_v12 = vld [vmem:[#allocation6 + $0xc0] sm:$0xf]  ;;  %v3952_v13 = vor.u32 %v5243_v11, %v3951_v10  ;;  %v5143_v14 = vld [vmem:[#allocation6 + $0xcc] sm:$0xf0]  ;;  %1695 = vmatpush.bf16.msra.mxu1 %v3696_v8 }
  0x1d   :  { %v3679_v15 = vld [vmem:[#allocation6 + $0x1c0] sm:$0xf]  ;;  %v5175_v16 = vld [vmem:[#allocation6 + $0x1cc] sm:$0xf0]  ;;  %1708 = vmatpush.bf16.msra.mxu2 %v3824_v9  ;;  %v3552_v17 = vor.u32 %v5143_v14, %v3551_v12 }
  0x1e   :  { %v3680_v18 = vor.u32 %v5175_v16, %v3679_v15  ;;  %v3807_v19 = vld [vmem:[#allocation6 + $0x2c0] sm:$0xf]  ;;  %v5207_v20 = vld [vmem:[#allocation6 + $0x2cc] sm:$0xf0]  ;;  %1721 = vmatpush.bf16.msra.mxu3 %v3952_v13 }
  0x1f   :  { %v3935_v21 = vld [vmem:[#allocation6 + $0x3c0] sm:$0xf]  ;;  %v3808_v22 = vor.u32 %v5207_v20, %v3807_v19  ;;  %v5239_v23 = vld [vmem:[#allocation6 + $0x3cc] sm:$0xf0]  ;;  %1683 = vmatpush.bf16.msra.mxu0 %v3552_v17 }
  0x20   :  { %v3535_v24 = vld [vmem:[#allocation6 + $0xa0] sm:$0xf]  ;;  %v5139_v25 = vld [vmem:[#allocation6 + $0xac] sm:$0xf0]  ;;  %v3936_v26 = vor.u32 %v5239_v23, %v3935_v21  ;;  %1696 = vmatpush.bf16.msra.mxu1 %v3680_v18 }
  0x21   :  { %v3663_v27 = vld [vmem:[#allocation6 + $0x1a0] sm:$0xf]  ;;  %v5171_v28 = vld [vmem:[#allocation6 + $0x1ac] sm:$0xf0]  ;;  %v3536_v30 = vor.u32 %v5139_v25, %v3535_v24  ;;  %1709 = vmatpush.bf16.msra.mxu2 %v3808_v22 }
  0x22   :  { %v3791_v29 = vld [vmem:[#allocation6 + $0x2a0] sm:$0xf]  ;;  %v5203_v31 = vld [vmem:[#allocation6 + $0x2ac] sm:$0xf0]  ;;  %v3664_v34 = vor.u32 %v5171_v28, %v3663_v27  ;;  %1722 = vmatpush.bf16.msra.mxu3 %v3936_v26 }
  0x23   :  { %v3919_v32 = vld [vmem:[#allocation6 + $0x3a0] sm:$0xf]  ;;  %v5235_v33 = vld [vmem:[#allocation6 + $0x3ac] sm:$0xf0]  ;;  %v3792_v35 = vor.u32 %v5203_v31, %v3791_v29  ;;  %1684 = vmatpush.bf16.msra.mxu0 %v3536_v30 }
  0x24   :  { %v3519_v36 = vld [vmem:[#allocation6 + $0x80] sm:$0xf]  ;;  %v5135_v37 = vld [vmem:[#allocation6 + $0x8c] sm:$0xf0]  ;;  %v3920_v39 = vor.u32 %v5235_v33, %v3919_v32  ;;  %1697 = vmatpush.bf16.msra.mxu1 %v3664_v34 }
  0x25   :  { %v3647_v38 = vld [vmem:[#allocation6 + $0x180] sm:$0xf]  ;;  %v5167_v40 = vld [vmem:[#allocation6 + $0x18c] sm:$0xf0]  ;;  %v3520_v45 = vor.u32 %v5135_v37, %v3519_v36  ;;  %1710 = vmatpush.bf16.msra.mxu2 %v3792_v35 }
  0x26   :  { %v3775_v41 = vld [vmem:[#allocation6 + $0x280] sm:$0xf]  ;;  %v5199_v42 = vld [vmem:[#allocation6 + $0x28c] sm:$0xf0]  ;;  %v3648_v46 = vor.u32 %v5167_v40, %v3647_v38  ;;  %1723 = vmatpush.bf16.msra.mxu3 %v3920_v39 }
  0x27   :  { %v3903_v43 = vld [vmem:[#allocation6 + $0x380] sm:$0xf]  ;;  %v5231_v44 = vld [vmem:[#allocation6 + $0x38c] sm:$0xf0]  ;;  %v3776_v47 = vor.u32 %v5199_v42, %v3775_v41  ;;  %1685 = vmatpush.bf16.msra.mxu0 %v3520_v45 }
  0x28   :  { %v3503_v48 = vld [vmem:[#allocation6 + $0x60] sm:$0xf]  ;;  %v5131_v49 = vld [vmem:[#allocation6 + $0x6c] sm:$0xf0]  ;;  %v3904_v51 = vor.u32 %v5231_v44, %v3903_v43  ;;  %1698 = vmatpush.bf16.msra.mxu1 %v3648_v46 }
  0x29   :  { %v3631_v50 = vld [vmem:[#allocation6 + $0x160] sm:$0xf]  ;;  %v5163_v52 = vld [vmem:[#allocation6 + $0x16c] sm:$0xf0]  ;;  %v3504_v57 = vor.u32 %v5131_v49, %v3503_v48  ;;  %1711 = vmatpush.bf16.msra.mxu2 %v3776_v47 }
  0x2a   :  { %v3759_v53 = vld [vmem:[#allocation6 + $0x260] sm:$0xf]  ;;  %v5195_v54 = vld [vmem:[#allocation6 + $0x26c] sm:$0xf0]  ;;  %v3632_v58 = vor.u32 %v5163_v52, %v3631_v50  ;;  %1724 = vmatpush.bf16.msra.mxu3 %v3904_v51 }
  0x2b   :  { %v3887_v55 = vld [vmem:[#allocation6 + $0x360] sm:$0xf]  ;;  %v5227_v56 = vld [vmem:[#allocation6 + $0x36c] sm:$0xf0]  ;;  %v3760_v59 = vor.u32 %v5195_v54, %v3759_v53  ;;  %1686 = vmatpush.bf16.msra.mxu0 %v3504_v57 }
  0x2c   :  { %v3487_v60 = vld [vmem:[#allocation6 + $0x40] sm:$0xf]  ;;  %v5127_v61 = vld [vmem:[#allocation6 + $0x4c] sm:$0xf0]  ;;  %v3888_v63 = vor.u32 %v5227_v56, %v3887_v55  ;;  %1699 = vmatpush.bf16.msra.mxu1 %v3632_v58 }
  0x2d   :  { %v3615_v62 = vld [vmem:[#allocation6 + $0x140] sm:$0xf]  ;;  %v5159_v0 = vld [vmem:[#allocation6 + $0x14c] sm:$0xf0]  ;;  %v3488_v5 = vor.u32 %v5127_v61, %v3487_v60  ;;  %1712 = vmatpush.bf16.msra.mxu2 %v3760_v59  ;;  %v115_v59 = vld [vmem:[#allocation4 + $0x8] sm:$0xff] }
  0x2e   :  { %v3743_v1 = vld [vmem:[#allocation6 + $0x240] sm:$0xf]  ;;  %v5191_v2 = vld [vmem:[#allocation6 + $0x24c] sm:$0xf0]  ;;  %v3616_v6 = vor.u32 %v5159_v0, %v3615_v62  ;;  %1725 = vmatpush.bf16.msra.mxu3 %v3888_v63  ;;  %v380_v0 = vunpack.c.l.b16 %v115_v59 }
  0x2f   :  { %v3871_v3 = vld [vmem:[#allocation6 + $0x340] sm:$0xf]  ;;  %v5223_v4 = vld [vmem:[#allocation6 + $0x34c] sm:$0xf0]  ;;  %v3744_v7 = vor.u32 %v5191_v2, %v3743_v1  ;;  %1687 = vmatpush.bf16.msra.mxu0 %v3488_v5  ;;  %v381_v1 = vunpack.c.h.b16 %v115_v59 }
  0x30   :  { %v3471_v8 = vld [vmem:[#allocation6 + $0x20] sm:$0xf]  ;;  %v5123_v9 = vld [vmem:[#allocation6 + $0x2c] sm:$0xf0]  ;;  %v3872_v11 = vor.u32 %v5223_v4, %v3871_v3  ;;  %1700 = vmatpush.bf16.msra.mxu1 %v3616_v6  ;;  %v5736_v5 = vpack.c.b16 %v380_v0, %v380_v0 }
  0x31   :  { %v3599_v10 = vld [vmem:[#allocation6 + $0x120] sm:$0xf]  ;;  %v5155_v12 = vld [vmem:[#allocation6 + $0x12c] sm:$0xf0]  ;;  %v3472_v17 = vor.u32 %v5123_v9, %v3471_v8  ;;  %1713 = vmatpush.bf16.msra.mxu2 %v3744_v7  ;;  %v5738_v7 = vpack.c.b16 %v381_v1, %v381_v1 }
  0x32   :  { %v3727_v13 = vld [vmem:[#allocation6 + $0x220] sm:$0xf]  ;;  %v5187_v14 = vld [vmem:[#allocation6 + $0x22c] sm:$0xf0]  ;;  %v3600_v20 = vor.u32 %v5155_v12, %v3599_v10  ;;  %1726 = vmatpush.bf16.msra.mxu3 %v3872_v11 }
  0x33   :  { %v3855_v15 = vld [vmem:[#allocation6 + $0x320] sm:$0xf]  ;;  %v5219_v16 = vld [vmem:[#allocation6 + $0x32c] sm:$0xf0]  ;;  %v3728_v21 = vor.u32 %v5187_v14, %v3727_v13  ;;  %1688 = vmatpush.bf16.msra.mxu0 %v3472_v17 }
  0x34   :  { %v3455_v18 = vld [vmem:[#allocation6] sm:$0xf]  ;;  %v5119_v19 = vld [vmem:[#allocation6 + $0xc] sm:$0xf0]  ;;  %v3856_v25 = vor.u32 %v5219_v16, %v3855_v15  ;;  %1701 = vmatpush.bf16.msra.mxu1 %v3600_v20 }
  0x35   :  { %v3583_v22 = vld [vmem:[#allocation6 + $0x100] sm:$0xf]  ;;  %v5151_v23 = vld [vmem:[#allocation6 + $0x10c] sm:$0xf0]  ;;  %v3456_v32 = vor.u32 %v5119_v19, %v3455_v18  ;;  %1714 = vmatpush.bf16.msra.mxu2 %v3728_v21 }
  0x36   :  { %v3711_v24 = vld [vmem:[#allocation6 + $0x200] sm:$0xf]  ;;  %v5183_v26 = vld [vmem:[#allocation6 + $0x20c] sm:$0xf0]  ;;  %v3584_v36 = vor.u32 %v5151_v23, %v3583_v22  ;;  %1727 = vmatpush.bf16.msra.mxu3 %v3856_v25 }
  0x37   :  { %v3839_v27 = vld [vmem:[#allocation6 + $0x300] sm:$0xf]  ;;  %v5215_v28 = vld [vmem:[#allocation6 + $0x30c] sm:$0xf0]  ;;  %v3712_v37 = vor.u32 %v5183_v26, %v3711_v24  ;;  %1689 = vmatpush.bf16.msra.mxu0 %v3456_v32 }
  0x38   :  { %v4079_v29 = vld [vmem:[#allocation6 + $0x4e0] sm:$0xf]  ;;  %v5275_v30 = vld [vmem:[#allocation6 + $0x4ec] sm:$0xf0]  ;;  %v3840_v40 = vor.u32 %v5215_v28, %v3839_v27  ;;  %1702 = vmatpush.bf16.msra.mxu1 %v3584_v36 }
  0x39   :  { %v4207_v31 = vld [vmem:[#allocation6 + $0x5e0] sm:$0xf]  ;;  %v5307_v33 = vld [vmem:[#allocation6 + $0x5ec] sm:$0xf0]  ;;  %v4080_v41 = vor.u32 %v5275_v30, %v4079_v29  ;;  %1715 = vmatpush.bf16.msra.mxu2 %v3712_v37 }
  0x3a   :  { %v4335_v34 = vld [vmem:[#allocation6 + $0x6e0] sm:$0xf]  ;;  %v5339_v35 = vld [vmem:[#allocation6 + $0x6ec] sm:$0xf0]  ;;  %v4208_v42 = vor.u32 %v5307_v33, %v4207_v31  ;;  %1728 = vmatpush.bf16.msra.mxu3 %v3840_v40 }
  0x3b   :  { %v4463_v38 = vld [vmem:[#allocation6 + $0x7e0] sm:$0xf]  ;;  %v5371_v39 = vld [vmem:[#allocation6 + $0x7ec] sm:$0xf0]  ;;  %v4336_v43 = vor.u32 %v5339_v35, %v4335_v34  ;;  %1734 = vmatpush.bf16.msrb.mxu0 %v4080_v41 }
  0x3c   :  { %v4063_v44 = vld [vmem:[#allocation6 + $0x4c0] sm:$0xf]  ;;  %v5271_v45 = vld [vmem:[#allocation6 + $0x4cc] sm:$0xf0]  ;;  %v4464_v47 = vor.u32 %v5371_v39, %v4463_v38  ;;  %1747 = vmatpush.bf16.msrb.mxu1 %v4208_v42  ;;  %1716 = vmatmul.bf16.vlgmr.msra.gmra.mxu2 %v5736_v5 }
  0x3d   :  { %v4191_v46 = vld [vmem:[#allocation6 + $0x5c0] sm:$0xf]  ;;  %v5303_v48 = vld [vmem:[#allocation6 + $0x5cc] sm:$0xf0]  ;;  %v4064_v53 = vor.u32 %v5271_v45, %v4063_v44  ;;  %1760 = vmatpush.bf16.msrb.mxu2 %v4336_v43  ;;  %1729 = vmatmul.bf16.vlgmr.msra.gmra.mxu3 %v5738_v7 }
  0x3e   :  { %v4319_v49 = vld [vmem:[#allocation6 + $0x6c0] sm:$0xf]  ;;  %v5335_v50 = vld [vmem:[#allocation6 + $0x6cc] sm:$0xf0]  ;;  %v4192_v55 = vor.u32 %v5303_v48, %v4191_v46  ;;  %1773 = vmatpush.bf16.msrb.mxu3 %v4464_v47 }
  0x3f   :  { %v4447_v51 = vld [vmem:[#allocation6 + $0x7c0] sm:$0xf]  ;;  %v5367_v52 = vld [vmem:[#allocation6 + $0x7cc] sm:$0xf0]  ;;  %v4320_v56 = vor.u32 %v5335_v50, %v4319_v49  ;;  %1735 = vmatpush.bf16.msrb.mxu0 %v4064_v53 }
  0x40   :  { %v4047_v54 = vld [vmem:[#allocation6 + $0x4a0] sm:$0xf]  ;;  %v5267_v57 = vld [vmem:[#allocation6 + $0x4ac] sm:$0xf0]  ;;  %v4448_v60 = vor.u32 %v5367_v52, %v4447_v51  ;;  %1748 = vmatpush.bf16.msrb.mxu1 %v4192_v55 }
  0x41   :  { %v4175_v58 = vld [vmem:[#allocation6 + $0x5a0] sm:$0xf]  ;;  %v5299_v61 = vld [vmem:[#allocation6 + $0x5ac] sm:$0xf0]  ;;  %v4048_v4 = vor.u32 %v5267_v57, %v4047_v54  ;;  %1761 = vmatpush.bf16.msrb.mxu2 %v4320_v56 }
  0x42   :  { %v4303_v62 = vld [vmem:[#allocation6 + $0x6a0] sm:$0xf]  ;;  %v5331_v63 = vld [vmem:[#allocation6 + $0x6ac] sm:$0xf0]  ;;  %v4176_v8 = vor.u32 %v5299_v61, %v4175_v58  ;;  %1774 = vmatpush.bf16.msrb.mxu3 %v4448_v60 }
  0x43   :  { %v4431_v2 = vld [vmem:[#allocation6 + $0x7a0] sm:$0xf]  ;;  %v5363_v3 = vld [vmem:[#allocation6 + $0x7ac] sm:$0xf0]  ;;  %v4304_v9 = vor.u32 %v5331_v63, %v4303_v62  ;;  %1736 = vmatpush.bf16.msrb.mxu0 %v4048_v4  ;;  %v117_v4 = vld [vmem:[#allocation4 + $0x18] sm:$0xff] }
  0x44   :  { %v114_v6 = vld [vmem:[#allocation4] sm:$0xff]  ;;  %v5263_v11 = vld [vmem:[#allocation6 + $0x48c] sm:$0xf0]  ;;  %v4432_v15 = vor.u32 %v5363_v3, %v4431_v2  ;;  %1749 = vmatpush.bf16.msrb.mxu1 %v4176_v8 }
  0x45   :  { %v4031_v10 = vld [vmem:[#allocation6 + $0x480] sm:$0xf]  ;;  %v378_v13 = vunpack.c.l.b16 %v114_v6  ;;  %v379_v14 = vunpack.c.h.b16 %v114_v6  ;;  %v5295_v16 = vld [vmem:[#allocation6 + $0x58c] sm:$0xf0]  ;;  %1762 = vmatpush.bf16.msrb.mxu2 %v4304_v9 }
  0x46   :  { %v4159_v12 = vld [vmem:[#allocation6 + $0x580] sm:$0xf]  ;;  %v5327_v18 = vld [vmem:[#allocation6 + $0x68c] sm:$0xf0]  ;;  %v4032_v23 = vor.u32 %v5263_v11, %v4031_v10  ;;  %1775 = vmatpush.bf16.msrb.mxu3 %v4432_v15  ;;  %v5145_v11 = vld [vmem:[#allocation6 + $0xe4] sm:$0xf] }
  0x47   :  { %v4287_v17 = vld [vmem:[#allocation6 + $0x680] sm:$0xf]  ;;  %v5359_v20 = vld [vmem:[#allocation6 + $0x78c] sm:$0xf0]  ;;  %v5741_v21 = vpack.c.b16 %v378_v13, %v378_v13  ;;  %v5744_v22 = vpack.c.b16 %v379_v14, %v379_v14  ;;  %v4160_v24 = vor.u32 %v5295_v16, %v4159_v12  ;;  %v3569_v12 = vld [vmem:[#allocation6 + $0xf0] sm:$0xf0] }
  0x48   :  { %v4415_v19 = vld [vmem:[#allocation6 + $0x780] sm:$0xf]  ;;  %v4288_v25 = vor.u32 %v5327_v18, %v4287_v17  ;;  %v5259_v27 = vld [vmem:[#allocation6 + $0x46c] sm:$0xf0]  ;;  %1737 = vmatpush.bf16.msrb.mxu0 %v4032_v23  ;;  %v5177_v13 = vld [vmem:[#allocation6 + $0x1e4] sm:$0xf]  ;;  %v384_v18 = vunpack.c.l.b16 %v117_v4 }
  0x49   :  { %v4015_v26 = vld [vmem:[#allocation6 + $0x460] sm:$0xf]  ;;  %v4416_v29 = vor.u32 %v5359_v20, %v4415_v19  ;;  %v5291_v30 = vld [vmem:[#allocation6 + $0x56c] sm:$0xf0]  ;;  %1690 = vmatmul.bf16.vlgmr.msra.gmra.mxu0 %v5741_v21  ;;  %1703 = vmatmul.bf16.vlgmr.msra.gmra.mxu1 %v5744_v22  ;;  %v3697_v15 = vld [vmem:[#allocation6 + $0x1f0] sm:$0xf0] }
  0x4a   :  { %v4143_v28 = vld [vmem:[#allocation6 + $0x560] sm:$0xf]  ;;  %v5323_v32 = vld [vmem:[#allocation6 + $0x66c] sm:$0xf0]  ;;  %v4016_v35 = vor.u32 %v5259_v27, %v4015_v26  ;;  %1750 = vmatpush.bf16.msrb.mxu1 %v4160_v24  ;;  %1763 = vmatpush.bf16.msrb.mxu2 %v4288_v25  ;;  %v5209_v16 = vld [vmem:[#allocation6 + $0x2e4] sm:$0xf]  ;;  %v385_v26 = vunpack.c.h.b16 %v117_v4 }
  0x4b   :  { %v4271_v31 = vld [vmem:[#allocation6 + $0x660] sm:$0xf]  ;;  %v5355_v34 = vld [vmem:[#allocation6 + $0x76c] sm:$0xf0]  ;;  %v4144_v36 = vor.u32 %v5291_v30, %v4143_v28  ;;  %1776 = vmatpush.bf16.msrb.mxu3 %v4416_v29  ;;  %v3825_v17 = vld [vmem:[#allocation6 + $0x2f0] sm:$0xf0]  ;;  %v3572_v28 = vor.u32 %v5145_v11, %v3569_v12  ;;  %v3700_v30 = vor.u32 %v5177_v13, %v3697_v15 }
  0x4c   :  { %v4399_v33 = vld [vmem:[#allocation6 + $0x760] sm:$0xf]  ;;  %v4272_v37 = vor.u32 %v5323_v32, %v4271_v31  ;;  %v5255_v39 = vld [vmem:[#allocation6 + $0x44c] sm:$0xf0]  ;;  %1738 = vmatpush.bf16.msrb.mxu0 %v4016_v35  ;;  %v5241_v23 = vld [vmem:[#allocation6 + $0x3e4] sm:$0xf]  ;;  %v3828_v31 = vor.u32 %v5209_v16, %v3825_v17 }
  0x4d   :  { %v3999_v38 = vld [vmem:[#allocation6 + $0x440] sm:$0xf]  ;;  %v4400_v41 = vor.u32 %v5355_v34, %v4399_v33  ;;  %v5287_v42 = vld [vmem:[#allocation6 + $0x54c] sm:$0xf0]  ;;  %v3953_v24 = vld [vmem:[#allocation6 + $0x3f0] sm:$0xf0] }
  0x4e   :  { %v4127_v40 = vld [vmem:[#allocation6 + $0x540] sm:$0xf]  ;;  %v5319_v44 = vld [vmem:[#allocation6 + $0x64c] sm:$0xf0]  ;;  %v4000_v47 = vor.u32 %v5255_v39, %v3999_v38  ;;  %1751 = vmatpush.bf16.msrb.mxu1 %v4144_v36  ;;  %1764 = vmatpush.bf16.msrb.mxu2 %v4272_v37  ;;  %v5141_v32 = vld [vmem:[#allocation6 + $0xc4] sm:$0xf]  ;;  %v3956_v35 = vor.u32 %v5241_v23, %v3953_v24  ;;  %v5748_v39 = vpack.c.b16 %v384_v18, %v384_v18 }
  0x4f   :  { %v4255_v43 = vld [vmem:[#allocation6 + $0x640] sm:$0xf]  ;;  %v5351_v46 = vld [vmem:[#allocation6 + $0x74c] sm:$0xf0]  ;;  %v4128_v48 = vor.u32 %v5287_v42, %v4127_v40  ;;  %1777 = vmatpush.bf16.msrb.mxu3 %v4400_v41  ;;  %v3553_v33 = vld [vmem:[#allocation6 + $0xd0] sm:$0xf0] }
  0x50   :  { %v4383_v45 = vld [vmem:[#allocation6 + $0x740] sm:$0xf]  ;;  %v4256_v49 = vor.u32 %v5319_v44, %v4255_v43  ;;  %v5251_v51 = vld [vmem:[#allocation6 + $0x42c] sm:$0xf0]  ;;  %1739 = vmatpush.bf16.msrb.mxu0 %v4000_v47  ;;  %v5173_v34 = vld [vmem:[#allocation6 + $0x1c4] sm:$0xf]  ;;  %v5752_v43 = vpack.c.b16 %v385_v26, %v385_v26  ;;  %v3556_v44 = vor.u32 %v5141_v32, %v3553_v33 }
  0x51   :  { %v3983_v50 = vld [vmem:[#allocation6 + $0x420] sm:$0xf]  ;;  %v4384_v53 = vor.u32 %v5351_v46, %v4383_v45  ;;  %v5283_v54 = vld [vmem:[#allocation6 + $0x52c] sm:$0xf0]  ;;  %v3681_v36 = vld [vmem:[#allocation6 + $0x1d0] sm:$0xf0] }
  0x52   :  { %v4111_v52 = vld [vmem:[#allocation6 + $0x520] sm:$0xf]  ;;  %v5315_v56 = vld [vmem:[#allocation6 + $0x62c] sm:$0xf0]  ;;  %v3984_v60 = vor.u32 %v5251_v51, %v3983_v50  ;;  %1752 = vmatpush.bf16.msrb.mxu1 %v4128_v48  ;;  %1765 = vmatpush.bf16.msrb.mxu2 %v4256_v49  ;;  %v5205_v37 = vld [vmem:[#allocation6 + $0x2c4] sm:$0xf]  ;;  %v3684_v46 = vor.u32 %v5173_v34, %v3681_v36 }
  0x53   :  { %v4239_v55 = vld [vmem:[#allocation6 + $0x620] sm:$0xf]  ;;  %v5347_v58 = vld [vmem:[#allocation6 + $0x72c] sm:$0xf0]  ;;  %v4112_v0 = vor.u32 %v5283_v54, %v4111_v52  ;;  %1778 = vmatpush.bf16.msrb.mxu3 %v4384_v53  ;;  %v3809_v38 = vld [vmem:[#allocation6 + $0x2d0] sm:$0xf0] }
  0x54   :  { %v4367_v57 = vld [vmem:[#allocation6 + $0x720] sm:$0xf]  ;;  %v5247_v61 = vld [vmem:[#allocation6 + $0x40c] sm:$0xf0]  ;;  %v4240_v1 = vor.u32 %v5315_v56, %v4239_v55  ;;  %1740 = vmatpush.bf16.msrb.mxu0 %v3984_v60  ;;  %v5237_v40 = vld [vmem:[#allocation6 + $0x3c4] sm:$0xf]  ;;  %v3812_v47 = vor.u32 %v5205_v37, %v3809_v38 }
  0x55   :  { %v3967_v59 = vld [vmem:[#allocation6 + $0x400] sm:$0xf]  ;;  %v5279_v63 = vld [vmem:[#allocation6 + $0x50c] sm:$0xf0]  ;;  %v4368_v6 = vor.u32 %v5347_v58, %v4367_v57  ;;  %v3937_v41 = vld [vmem:[#allocation6 + $0x3d0] sm:$0xf0] }
  0x56   :  { %v4095_v62 = vld [vmem:[#allocation6 + $0x500] sm:$0xf]  ;;  %v5311_v3 = vld [vmem:[#allocation6 + $0x60c] sm:$0xf0]  ;;  %v3968_v14 = vor.u32 %v5247_v61, %v3967_v59  ;;  %1753 = vmatpush.bf16.msrb.mxu1 %v4112_v0  ;;  %1766 = vmatpush.bf16.msrb.mxu2 %v4240_v1  ;;  %v5137_v48 = vld [vmem:[#allocation6 + $0xa4] sm:$0xf]  ;;  %v3940_v51 = vor.u32 %v5237_v40, %v3937_v41 }
  0x57   :  { %v4223_v2 = vld [vmem:[#allocation6 + $0x600] sm:$0xf]  ;;  %v5343_v9 = vld [vmem:[#allocation6 + $0x70c] sm:$0xf0]  ;;  %v4096_v19 = vor.u32 %v5279_v63, %v4095_v62  ;;  %1779 = vmatpush.bf16.msrb.mxu3 %v4368_v6  ;;  %v3537_v49 = vld [vmem:[#allocation6 + $0xb0] sm:$0xf0] }
  0x58   :  { %v4351_v8 = vld [vmem:[#allocation6 + $0x700] sm:$0xf]  ;;  %v116_v10 = vld [vmem:[#allocation4 + $0x10] sm:$0xff]  ;;  %v4224_v20 = vor.u32 %v5311_v3, %v4223_v2  ;;  %1741 = vmatpush.bf16.msrb.mxu0 %v3968_v14  ;;  %v5169_v50 = vld [vmem:[#allocation6 + $0x1a4] sm:$0xf]  ;;  %v3540_v57 = vor.u32 %v5137_v48, %v3537_v49 }
  0x59   :  { %v382_v25 = vunpack.c.l.b16 %v116_v10  ;;  %v4352_v27 = vor.u32 %v5343_v9, %v4351_v8  ;;  %v383_v29 = vunpack.c.h.b16 %v116_v10  ;;  %v3665_v52 = vld [vmem:[#allocation6 + $0x1b0] sm:$0xf0]  ;;  %v5201_v53 = vld [vmem:[#allocation6 + $0x2a4] sm:$0xf] }
  0x5a   :  { %1754 = vmatpush.bf16.msrb.mxu1 %v4096_v19  ;;  %1767 = vmatpush.bf16.msrb.mxu2 %v4224_v20  ;;  %v3793_v54 = vld [vmem:[#allocation6 + $0x2b0] sm:$0xf0]  ;;  %v5233_v55 = vld [vmem:[#allocation6 + $0x3a4] sm:$0xf]  ;;  %v3668_v58 = vor.u32 %v5169_v50, %v3665_v52 }
  0x5b   :  { %v5750_v42 = vpack.c.b16 %v382_v25, %v382_v25  ;;  %1780 = vmatpush.bf16.msrb.mxu3 %v4352_v27  ;;  %v5754_v45 = vpack.c.b16 %v383_v29, %v383_v29  ;;  %v3921_v56 = vld [vmem:[#allocation6 + $0x3b0] sm:$0xf0]  ;;  %v3796_v59 = vor.u32 %v5201_v53, %v3793_v54  ;;  %v5133_v60 = vld [vmem:[#allocation6 + $0x84] sm:$0xf] }
  0x5c   :  { %1786 = vmatpush.bf16.msra.mxu0 %v3572_v28  ;;  %v3521_v61 = vld [vmem:[#allocation6 + $0x90] sm:$0xf0]  ;;  %v5165_v62 = vld [vmem:[#allocation6 + $0x184] sm:$0xf]  ;;  %v3924_v63 = vor.u32 %v5233_v55, %v3921_v56 }
  0x5d   :  { %1768 = vmatmul.bf16.vlgmr.msrb.gmra.mxu2 %v5748_v39  ;;  %1742 = vmatmul.bf16.vlgmr.msrb.gmra.mxu0 %v5750_v42  ;;  %v3649_v0 = vld [vmem:[#allocation6 + $0x190] sm:$0xf0]  ;;  %v5197_v1 = vld [vmem:[#allocation6 + $0x284] sm:$0xf]  ;;  %v3524_v6 = vor.u32 %v5133_v60, %v3521_v61 }
  0x5e   :  { %1799 = vmatpush.bf16.msra.mxu1 %v3700_v30  ;;  %1812 = vmatpush.bf16.msra.mxu2 %v3828_v31  ;;  %v3777_v2 = vld [vmem:[#allocation6 + $0x290] sm:$0xf0]  ;;  %v5229_v3 = vld [vmem:[#allocation6 + $0x384] sm:$0xf]  ;;  %v3652_v8 = vor.u32 %v5165_v62, %v3649_v0 }
  0x5f   :  { %1825 = vmatpush.bf16.msra.mxu3 %v3956_v35  ;;  %1755 = vmatmul.bf16.vlgmr.msrb.gmra.mxu1 %v5754_v45  ;;  %v3905_v4 = vld [vmem:[#allocation6 + $0x390] sm:$0xf0]  ;;  %v3780_v9 = vor.u32 %v5197_v1, %v3777_v2  ;;  %v5129_v10 = vld [vmem:[#allocation6 + $0x64] sm:$0xf] }
  0x60   :  { %1781 = vmatmul.bf16.vlgmr.msrb.gmra.mxu3 %v5752_v43  ;;  %1787 = vmatpush.bf16.msra.mxu0 %v3556_v44  ;;  %v3505_v11 = vld [vmem:[#allocation6 + $0x70] sm:$0xf0]  ;;  %v5161_v12 = vld [vmem:[#allocation6 + $0x164] sm:$0xf]  ;;  %v3908_v13 = vor.u32 %v5229_v3, %v3905_v4 }
  0x61   :  { %v3633_v14 = vld [vmem:[#allocation6 + $0x170] sm:$0xf0]  ;;  %v5193_v15 = vld [vmem:[#allocation6 + $0x264] sm:$0xf]  ;;  %v3508_v19 = vor.u32 %v5129_v10, %v3505_v11 }
  0x62   :  { %1800 = vmatpush.bf16.msra.mxu1 %v3684_v46  ;;  %1813 = vmatpush.bf16.msra.mxu2 %v3812_v47  ;;  %v3761_v16 = vld [vmem:[#allocation6 + $0x270] sm:$0xf0]  ;;  %v5225_v17 = vld [vmem:[#allocation6 + $0x364] sm:$0xf]  ;;  %v3636_v20 = vor.u32 %v5161_v12, %v3633_v14 }
  0x63   :  { %1826 = vmatpush.bf16.msra.mxu3 %v3940_v51  ;;  %v3889_v18 = vld [vmem:[#allocation6 + $0x370] sm:$0xf0]  ;;  %v3764_v23 = vor.u32 %v5193_v15, %v3761_v16  ;;  %v5125_v24 = vld [vmem:[#allocation6 + $0x44] sm:$0xf] }
  0x64   :  { %1788 = vmatpush.bf16.msra.mxu0 %v3540_v57  ;;  %v3489_v25 = vld [vmem:[#allocation6 + $0x50] sm:$0xf0]  ;;  %v5157_v26 = vld [vmem:[#allocation6 + $0x144] sm:$0xf]  ;;  %v3892_v27 = vor.u32 %v5225_v17, %v3889_v18 }
  0x65   :  { %v3617_v28 = vld [vmem:[#allocation6 + $0x150] sm:$0xf0]  ;;  %v5189_v29 = vld [vmem:[#allocation6 + $0x244] sm:$0xf]  ;;  %v3492_v33 = vor.u32 %v5125_v24, %v3489_v25 }
  0x66   :  { %1801 = vmatpush.bf16.msra.mxu1 %v3668_v58  ;;  %1814 = vmatpush.bf16.msra.mxu2 %v3796_v59  ;;  %v3745_v30 = vld [vmem:[#allocation6 + $0x250] sm:$0xf0]  ;;  %v5221_v31 = vld [vmem:[#allocation6 + $0x344] sm:$0xf]  ;;  %v3620_v34 = vor.u32 %v5157_v26, %v3617_v28 }
  0x67   :  { %1827 = vmatpush.bf16.msra.mxu3 %v3924_v63  ;;  %v3873_v32 = vld [vmem:[#allocation6 + $0x350] sm:$0xf0]  ;;  %v3748_v35 = vor.u32 %v5189_v29, %v3745_v30  ;;  %v5121_v36 = vld [vmem:[#allocation6 + $0x24] sm:$0xf] }
  0x68   :  { %1789 = vmatpush.bf16.msra.mxu0 %v3524_v6  ;;  %v3473_v37 = vld [vmem:[#allocation6 + $0x30] sm:$0xf0]  ;;  %v5153_v38 = vld [vmem:[#allocation6 + $0x124] sm:$0xf]  ;;  %v3876_v40 = vor.u32 %v5221_v31, %v3873_v32 }
  0x69   :  { %v3601_v41 = vld [vmem:[#allocation6 + $0x130] sm:$0xf0]  ;;  %v5185_v44 = vld [vmem:[#allocation6 + $0x224] sm:$0xf]  ;;  %v3476_v49 = vor.u32 %v5121_v36, %v3473_v37 }
  0x6a   :  { %1802 = vmatpush.bf16.msra.mxu1 %v3652_v8  ;;  %1815 = vmatpush.bf16.msra.mxu2 %v3780_v9  ;;  %v3729_v46 = vld [vmem:[#allocation6 + $0x230] sm:$0xf0]  ;;  %v5217_v47 = vld [vmem:[#allocation6 + $0x324] sm:$0xf]  ;;  %v3604_v52 = vor.u32 %v5153_v38, %v3601_v41 }
  0x6b   :  { %1828 = vmatpush.bf16.msra.mxu3 %v3908_v13  ;;  %v3857_v48 = vld [vmem:[#allocation6 + $0x330] sm:$0xf0]  ;;  %v5117_v50 = vld [vmem:[#allocation6 + $0x4] sm:$0xf]  ;;  %v3732_v53 = vor.u32 %v5185_v44, %v3729_v46 }
  0x6c   :  { %1790 = vmatpush.bf16.msra.mxu0 %v3508_v19  ;;  %v3457_v51 = vld [vmem:[#allocation6 + $0x10] sm:$0xf0]  ;;  %v5149_v54 = vld [vmem:[#allocation6 + $0x104] sm:$0xf]  ;;  %v3860_v57 = vor.u32 %v5217_v47, %v3857_v48 }
  0x6d   :  { %v3585_v55 = vld [vmem:[#allocation6 + $0x110] sm:$0xf0]  ;;  %v5181_v56 = vld [vmem:[#allocation6 + $0x204] sm:$0xf]  ;;  %v3460_v0 = vor.u32 %v5117_v50, %v3457_v51 }
  0x6e   :  { %1803 = vmatpush.bf16.msra.mxu1 %v3636_v20  ;;  %1816 = vmatpush.bf16.msra.mxu2 %v3764_v23  ;;  %v3713_v58 = vld [vmem:[#allocation6 + $0x210] sm:$0xf0]  ;;  %v5213_v59 = vld [vmem:[#allocation6 + $0x304] sm:$0xf]  ;;  %v3588_v4 = vor.u32 %v5149_v54, %v3585_v55 }
  0x6f   :  { %1829 = vmatpush.bf16.msra.mxu3 %v3892_v27  ;;  %v3841_v60 = vld [vmem:[#allocation6 + $0x310] sm:$0xf0]  ;;  %v5273_v61 = vld [vmem:[#allocation6 + $0x4e4] sm:$0xf]  ;;  %v3716_v6 = vor.u32 %v5181_v56, %v3713_v58 }
  0x70   :  { %1791 = vmatpush.bf16.msra.mxu0 %v3492_v33  ;;  %v4081_v62 = vld [vmem:[#allocation6 + $0x4f0] sm:$0xf0]  ;;  %v5305_v63 = vld [vmem:[#allocation6 + $0x5e4] sm:$0xf]  ;;  %v3844_v10 = vor.u32 %v5213_v59, %v3841_v60 }
  0x71   :  { %v4209_v1 = vld [vmem:[#allocation6 + $0x5f0] sm:$0xf0]  ;;  %v5337_v2 = vld [vmem:[#allocation6 + $0x6e4] sm:$0xf]  ;;  %v4084_v11 = vor.u32 %v5273_v61, %v4081_v62 }
  0x72   :  { %1804 = vmatpush.bf16.msra.mxu1 %v3620_v34  ;;  %1817 = vmatpush.bf16.msra.mxu2 %v3748_v35  ;;  %v4337_v3 = vld [vmem:[#allocation6 + $0x6f0] sm:$0xf0]  ;;  %v5369_v8 = vld [vmem:[#allocation6 + $0x7e4] sm:$0xf]  ;;  %v4212_v12 = vor.u32 %v5305_v63, %v4209_v1 }
  0x73   :  { %1830 = vmatpush.bf16.msra.mxu3 %v3876_v40  ;;  %v4465_v9 = vld [vmem:[#allocation6 + $0x7f0] sm:$0xf0]  ;;  %v4340_v13 = vor.u32 %v5337_v2, %v4337_v3  ;;  %v5269_v14 = vld [vmem:[#allocation6 + $0x4c4] sm:$0xf] }
  0x74   :  { %1792 = vmatpush.bf16.msra.mxu0 %v3476_v49  ;;  %v4065_v15 = vld [vmem:[#allocation6 + $0x4d0] sm:$0xf0]  ;;  %v5301_v16 = vld [vmem:[#allocation6 + $0x5c4] sm:$0xf]  ;;  %v4468_v17 = vor.u32 %v5369_v8, %v4465_v9 }
  0x75   :  { %v4193_v18 = vld [vmem:[#allocation6 + $0x5d0] sm:$0xf0]  ;;  %v5333_v19 = vld [vmem:[#allocation6 + $0x6c4] sm:$0xf]  ;;  %v4068_v25 = vor.u32 %v5269_v14, %v4065_v15 }
  0x76   :  { %1805 = vmatpush.bf16.msra.mxu1 %v3604_v52  ;;  %1818 = vmatpush.bf16.msra.mxu2 %v3732_v53  ;;  %v4321_v20 = vld [vmem:[#allocation6 + $0x6d0] sm:$0xf0]  ;;  %v5365_v23 = vld [vmem:[#allocation6 + $0x7c4] sm:$0xf]  ;;  %v4196_v26 = vor.u32 %v5301_v16, %v4193_v18 }
  0x77   :  { %1831 = vmatpush.bf16.msra.mxu3 %v3860_v57  ;;  %v4449_v24 = vld [vmem:[#allocation6 + $0x7d0] sm:$0xf0]  ;;  %v4324_v27 = vor.u32 %v5333_v19, %v4321_v20  ;;  %v5265_v28 = vld [vmem:[#allocation6 + $0x4a4] sm:$0xf] }
  0x78   :  { %1793 = vmatpush.bf16.msra.mxu0 %v3460_v0  ;;  %v4049_v29 = vld [vmem:[#allocation6 + $0x4b0] sm:$0xf0]  ;;  %v5297_v30 = vld [vmem:[#allocation6 + $0x5a4] sm:$0xf]  ;;  %v4452_v31 = vor.u32 %v5365_v23, %v4449_v24 }
  0x79   :  { %v4177_v32 = vld [vmem:[#allocation6 + $0x5b0] sm:$0xf0]  ;;  %v5329_v33 = vld [vmem:[#allocation6 + $0x6a4] sm:$0xf]  ;;  %v4052_v37 = vor.u32 %v5265_v28, %v4049_v29 }
  0x7a   :  { %1806 = vmatpush.bf16.msra.mxu1 %v3588_v4  ;;  %1819 = vmatpush.bf16.msra.mxu2 %v3716_v6  ;;  %v4305_v34 = vld [vmem:[#allocation6 + $0x6b0] sm:$0xf0]  ;;  %v5361_v35 = vld [vmem:[#allocation6 + $0x7a4] sm:$0xf]  ;;  %v4180_v38 = vor.u32 %v5297_v30, %v4177_v32 }
  0x7b   :  { %1832 = vmatpush.bf16.msra.mxu3 %v3844_v10  ;;  %v4433_v36 = vld [vmem:[#allocation6 + $0x7b0] sm:$0xf0]  ;;  %1794 = vmatmul.bf16.vlgmr.msra.gmra.mxu0 %v5741_v21  ;;  %v4308_v40 = vor.u32 %v5329_v33, %v4305_v34  ;;  %v5261_v41 = vld [vmem:[#allocation6 + $0x484] sm:$0xf] }
  0x7c   :  { %1838 = vmatpush.bf16.msrb.mxu0 %v4084_v11  ;;  %v4033_v44 = vld [vmem:[#allocation6 + $0x490] sm:$0xf0]  ;;  %v5293_v46 = vld [vmem:[#allocation6 + $0x584] sm:$0xf]  ;;  %v4436_v47 = vor.u32 %v5361_v35, %v4433_v36 }
  0x7d   :  { %1820 = vmatmul.bf16.vlgmr.msra.gmra.mxu2 %v5736_v5  ;;  %1807 = vmatmul.bf16.vlgmr.msra.gmra.mxu1 %v5744_v22  ;;  %v4161_v48 = vld [vmem:[#allocation6 + $0x590] sm:$0xf0]  ;;  %v5325_v49 = vld [vmem:[#allocation6 + $0x684] sm:$0xf]  ;;  %v4036_v53 = vor.u32 %v5261_v41, %v4033_v44  ;;  %v3575_v44 = vld [vmem:[#allocation6 + $0xe8] sm:$0xf] }
  0x7e   :  { %1851 = vmatpush.bf16.msrb.mxu1 %v4212_v12  ;;  %1864 = vmatpush.bf16.msrb.mxu2 %v4340_v13  ;;  %v4289_v50 = vld [vmem:[#allocation6 + $0x690] sm:$0xf0]  ;;  %v5357_v51 = vld [vmem:[#allocation6 + $0x784] sm:$0xf]  ;;  %v4164_v54 = vor.u32 %v5293_v46, %v4161_v48  ;;  %v5148_v46 = vld [vmem:[#allocation6 + $0xf4] sm:$0xf0] }
  0x7f   :  { %1877 = vmatpush.bf16.msrb.mxu3 %v4468_v17  ;;  %v4417_v52 = vld [vmem:[#allocation6 + $0x790] sm:$0xf0]  ;;  %v4292_v55 = vor.u32 %v5325_v49, %v4289_v50  ;;  %v5257_v56 = vld [vmem:[#allocation6 + $0x464] sm:$0xf]  ;;  %v5180_v49 = vld [vmem:[#allocation6 + $0x1f4] sm:$0xf0] }
  0x80   :  { %1833 = vmatmul.bf16.vlgmr.msra.gmra.mxu3 %v5738_v7  ;;  %1839 = vmatpush.bf16.msrb.mxu0 %v4068_v25  ;;  %v4017_v57 = vld [vmem:[#allocation6 + $0x470] sm:$0xf0]  ;;  %v5289_v58 = vld [vmem:[#allocation6 + $0x564] sm:$0xf]  ;;  %v4420_v59 = vor.u32 %v5357_v51, %v4417_v52  ;;  %v3831_v50 = vld [vmem:[#allocation6 + $0x2e8] sm:$0xf] }
  0x81   :  { %v4145_v60 = vld [vmem:[#allocation6 + $0x570] sm:$0xf0]  ;;  %v5321_v61 = vld [vmem:[#allocation6 + $0x664] sm:$0xf]  ;;  %v4020_v1 = vor.u32 %v5257_v56, %v4017_v57  ;;  %v5212_v51 = vld [vmem:[#allocation6 + $0x2f4] sm:$0xf0]  ;;  %v3576_v57 = vor.u32 %v5148_v46, %v3575_v44 }
  0x82   :  { %1852 = vmatpush.bf16.msrb.mxu1 %v4196_v26  ;;  %1865 = vmatpush.bf16.msrb.mxu2 %v4324_v27  ;;  %v4273_v62 = vld [vmem:[#allocation6 + $0x670] sm:$0xf0]  ;;  %v5353_v63 = vld [vmem:[#allocation6 + $0x764] sm:$0xf]  ;;  %v4148_v2 = vor.u32 %v5289_v58, %v4145_v60  ;;  %v3559_v60 = vld [vmem:[#allocation6 + $0xc8] sm:$0xf] }
  0x83   :  { %1878 = vmatpush.bf16.msrb.mxu3 %v4452_v31  ;;  %v4401_v0 = vld [vmem:[#allocation6 + $0x770] sm:$0xf0]  ;;  %v4276_v3 = vor.u32 %v5321_v61, %v4273_v62  ;;  %v5253_v4 = vld [vmem:[#allocation6 + $0x444] sm:$0xf]  ;;  %v5144_v61 = vld [vmem:[#allocation6 + $0xd4] sm:$0xf0] }
  0x84   :  { %1840 = vmatpush.bf16.msrb.mxu0 %v4052_v37  ;;  %v4001_v6 = vld [vmem:[#allocation6 + $0x450] sm:$0xf0]  ;;  %v5285_v8 = vld [vmem:[#allocation6 + $0x544] sm:$0xf]  ;;  %v4404_v9 = vor.u32 %v5353_v63, %v4401_v0  ;;  %v3687_v62 = vld [vmem:[#allocation6 + $0x1c8] sm:$0xf] }
  0x85   :  { %v4129_v10 = vld [vmem:[#allocation6 + $0x550] sm:$0xf0]  ;;  %v5317_v11 = vld [vmem:[#allocation6 + $0x644] sm:$0xf]  ;;  %v4004_v15 = vor.u32 %v5253_v4, %v4001_v6  ;;  %v5176_v0 = vld [vmem:[#allocation6 + $0x1d4] sm:$0xf0]  ;;  %v3560_v6 = vor.u32 %v5144_v61, %v3559_v60 }
  0x86   :  { %1853 = vmatpush.bf16.msrb.mxu1 %v4180_v38  ;;  %1866 = vmatpush.bf16.msrb.mxu2 %v4308_v40  ;;  %v4257_v12 = vld [vmem:[#allocation6 + $0x650] sm:$0xf0]  ;;  %v5349_v13 = vld [vmem:[#allocation6 + $0x744] sm:$0xf]  ;;  %v4132_v16 = vor.u32 %v5285_v8, %v4129_v10  ;;  %v5240_v4 = vld [vmem:[#allocation6 + $0x3d4] sm:$0xf0]  ;;  %v3688_v8 = vor.u32 %v5176_v0, %v3687_v62 }
  0x87   :  { %1879 = vmatpush.bf16.msrb.mxu3 %v4436_v47  ;;  %v4385_v14 = vld [vmem:[#allocation6 + $0x750] sm:$0xf0]  ;;  %v4260_v17 = vor.u32 %v5317_v11, %v4257_v12  ;;  %v5249_v18 = vld [vmem:[#allocation6 + $0x424] sm:$0xf]  ;;  %v3703_v47 = vld [vmem:[#allocation6 + $0x1e8] sm:$0xf] }
  0x88   :  { %1841 = vmatpush.bf16.msrb.mxu0 %v4036_v53  ;;  %v3985_v19 = vld [vmem:[#allocation6 + $0x430] sm:$0xf0]  ;;  %v5281_v20 = vld [vmem:[#allocation6 + $0x524] sm:$0xf]  ;;  %v4388_v23 = vor.u32 %v5349_v13, %v4385_v14  ;;  %v3704_v58 = vor.u32 %v5180_v49, %v3703_v47  ;;  %v3543_v10 = vld [vmem:[#allocation6 + $0xa8] sm:$0xf] }
  0x89   :  { %v4113_v24 = vld [vmem:[#allocation6 + $0x530] sm:$0xf0]  ;;  %v5313_v25 = vld [vmem:[#allocation6 + $0x624] sm:$0xf]  ;;  %v3988_v29 = vor.u32 %v5249_v18, %v3985_v19  ;;  %v5140_v11 = vld [vmem:[#allocation6 + $0xb4] sm:$0xf0] }
  0x8a   :  { %1854 = vmatpush.bf16.msrb.mxu1 %v4164_v54  ;;  %1867 = vmatpush.bf16.msrb.mxu2 %v4292_v55  ;;  %v4241_v26 = vld [vmem:[#allocation6 + $0x630] sm:$0xf0]  ;;  %v5345_v27 = vld [vmem:[#allocation6 + $0x724] sm:$0xf]  ;;  %v4116_v32 = vor.u32 %v5281_v20, %v4113_v24  ;;  %v3959_v54 = vld [vmem:[#allocation6 + $0x3e8] sm:$0xf]  ;;  %v3544_v19 = vor.u32 %v5140_v11, %v3543_v10 }
  0x8b   :  { %1880 = vmatpush.bf16.msrb.mxu3 %v4420_v59  ;;  %v4369_v28 = vld [vmem:[#allocation6 + $0x730] sm:$0xf0]  ;;  %v5245_v30 = vld [vmem:[#allocation6 + $0x404] sm:$0xf]  ;;  %v4244_v33 = vor.u32 %v5313_v25, %v4241_v26  ;;  %v5244_v55 = vld [vmem:[#allocation6 + $0x3f4] sm:$0xf0]  ;;  %v3832_v59 = vor.u32 %v5212_v51, %v3831_v50 }
  0x8c   :  { %1842 = vmatpush.bf16.msrb.mxu0 %v4020_v1  ;;  %v3969_v31 = vld [vmem:[#allocation6 + $0x410] sm:$0xf0]  ;;  %v5277_v34 = vld [vmem:[#allocation6 + $0x504] sm:$0xf]  ;;  %v4372_v37 = vor.u32 %v5345_v27, %v4369_v28  ;;  %v3960_v63 = vor.u32 %v5244_v55, %v3959_v54  ;;  %v3815_v1 = vld [vmem:[#allocation6 + $0x2c8] sm:$0xf] }
  0x8d   :  { %v4097_v35 = vld [vmem:[#allocation6 + $0x510] sm:$0xf0]  ;;  %v5309_v36 = vld [vmem:[#allocation6 + $0x604] sm:$0xf]  ;;  %v3972_v48 = vor.u32 %v5245_v30, %v3969_v31  ;;  %v3671_v12 = vld [vmem:[#allocation6 + $0x1a8] sm:$0xf] }
  0x8e   :  { %1855 = vmatpush.bf16.msrb.mxu1 %v4148_v2  ;;  %1868 = vmatpush.bf16.msrb.mxu2 %v4276_v3  ;;  %v4225_v38 = vld [vmem:[#allocation6 + $0x610] sm:$0xf0]  ;;  %v5341_v40 = vld [vmem:[#allocation6 + $0x704] sm:$0xf]  ;;  %v4100_v52 = vor.u32 %v5277_v34, %v4097_v35  ;;  %v5208_v2 = vld [vmem:[#allocation6 + $0x2d4] sm:$0xf0] }
  0x8f   :  { %1881 = vmatpush.bf16.msrb.mxu3 %v4404_v9  ;;  %v4353_v41 = vld [vmem:[#allocation6 + $0x710] sm:$0xf0]  ;;  %v4228_v53 = vor.u32 %v5309_v36, %v4225_v38  ;;  %v3943_v3 = vld [vmem:[#allocation6 + $0x3c8] sm:$0xf]  ;;  %v3816_v9 = vor.u32 %v5208_v2, %v3815_v1  ;;  %v5172_v14 = vld [vmem:[#allocation6 + $0x1b4] sm:$0xf0] }
  0x90   :  { %1843 = vmatpush.bf16.msrb.mxu0 %v4004_v15  ;;  %v4356_v56 = vor.u32 %v5341_v40, %v4353_v41  ;;  %v3944_v13 = vor.u32 %v5240_v4, %v3943_v3  ;;  %v3799_v15 = vld [vmem:[#allocation6 + $0x2a8] sm:$0xf]  ;;  %v5236_v18 = vld [vmem:[#allocation6 + $0x3b4] sm:$0xf0]  ;;  %v3672_v20 = vor.u32 %v5172_v14, %v3671_v12 }
  0x91   :  { %v3527_v24 = vld [vmem:[#allocation6 + $0x88] sm:$0xf]  ;;  %v5136_v25 = vld [vmem:[#allocation6 + $0x94] sm:$0xf0] }
  0x92   :  { %1856 = vmatpush.bf16.msrb.mxu1 %v4132_v16  ;;  %1869 = vmatpush.bf16.msrb.mxu2 %v4260_v17  ;;  %v5204_v16 = vld [vmem:[#allocation6 + $0x2b4] sm:$0xf0]  ;;  %v3927_v17 = vld [vmem:[#allocation6 + $0x3a8] sm:$0xf] }
  0x93   :  { %1882 = vmatpush.bf16.msrb.mxu3 %v4388_v23  ;;  %v3800_v23 = vor.u32 %v5204_v16, %v3799_v15  ;;  %v3655_v26 = vld [vmem:[#allocation6 + $0x188] sm:$0xf]  ;;  %v3928_v27 = vor.u32 %v5236_v18, %v3927_v17  ;;  %v5168_v28 = vld [vmem:[#allocation6 + $0x194] sm:$0xf0] }
  0x94   :  { %1844 = vmatpush.bf16.msrb.mxu0 %v3988_v29  ;;  %v3783_v29 = vld [vmem:[#allocation6 + $0x288] sm:$0xf]  ;;  %v5200_v30 = vld [vmem:[#allocation6 + $0x294] sm:$0xf0]  ;;  %v3656_v34 = vor.u32 %v5168_v28, %v3655_v26 }
  0x95   :  { %v3911_v31 = vld [vmem:[#allocation6 + $0x388] sm:$0xf]  ;;  %v3784_v35 = vor.u32 %v5200_v30, %v3783_v29  ;;  %v5164_v41 = vld [vmem:[#allocation6 + $0x174] sm:$0xf0] }
  0x96   :  { %1857 = vmatpush.bf16.msrb.mxu1 %v4116_v32  ;;  %1870 = vmatpush.bf16.msrb.mxu2 %v4244_v33  ;;  %v5232_v32 = vld [vmem:[#allocation6 + $0x394] sm:$0xf0]  ;;  %v3528_v33 = vor.u32 %v5136_v25, %v3527_v24  ;;  %v3511_v36 = vld [vmem:[#allocation6 + $0x68] sm:$0xf] }
  0x97   :  { %1883 = vmatpush.bf16.msrb.mxu3 %v4372_v37  ;;  %v5132_v37 = vld [vmem:[#allocation6 + $0x74] sm:$0xf0]  ;;  %v3639_v38 = vld [vmem:[#allocation6 + $0x168] sm:$0xf]  ;;  %v3912_v40 = vor.u32 %v5232_v32, %v3911_v31 }
  0x98   :  { %1845 = vmatpush.bf16.msrb.mxu0 %v3972_v48  ;;  %v3767_v44 = vld [vmem:[#allocation6 + $0x268] sm:$0xf]  ;;  %v5196_v46 = vld [vmem:[#allocation6 + $0x274] sm:$0xf0]  ;;  %v3512_v49 = vor.u32 %v5132_v37, %v3511_v36  ;;  %v3640_v50 = vor.u32 %v5164_v41, %v3639_v38 }
  0x99   :  { %v3895_v47 = vld [vmem:[#allocation6 + $0x368] sm:$0xf]  ;;  %v5228_v48 = vld [vmem:[#allocation6 + $0x374] sm:$0xf0]  ;;  %v3768_v51 = vor.u32 %v5196_v46, %v3767_v44 }
  0x9a   :  { %1858 = vmatpush.bf16.msrb.mxu1 %v4100_v52  ;;  %1871 = vmatpush.bf16.msrb.mxu2 %v4228_v53  ;;  %v3495_v52 = vld [vmem:[#allocation6 + $0x48] sm:$0xf]  ;;  %v5128_v53 = vld [vmem:[#allocation6 + $0x54] sm:$0xf0]  ;;  %v3896_v55 = vor.u32 %v5228_v48, %v3895_v47 }
  0x9b   :  { %1884 = vmatpush.bf16.msrb.mxu3 %v4356_v56  ;;  %1846 = vmatmul.bf16.vlgmr.msrb.gmra.mxu0 %v5750_v42  ;;  %v3623_v54 = vld [vmem:[#allocation6 + $0x148] sm:$0xf]  ;;  %v5160_v56 = vld [vmem:[#allocation6 + $0x154] sm:$0xf0]  ;;  %v3496_v61 = vor.u32 %v5128_v53, %v3495_v52 }
  0x9c   :  { %1890 = vmatpush.bf16.msra.mxu0 %v3576_v57  ;;  %v3751_v57 = vld [vmem:[#allocation6 + $0x248] sm:$0xf]  ;;  %v5224_v60 = vld [vmem:[#allocation6 + $0x354] sm:$0xf0]  ;;  %v3624_v62 = vor.u32 %v5160_v56, %v3623_v54 }
  0x9d   :  { %1872 = vmatmul.bf16.vlgmr.msrb.gmra.mxu2 %v5748_v39  ;;  %1859 = vmatmul.bf16.vlgmr.msrb.gmra.mxu1 %v5754_v45  ;;  %v3479_v0 = vld [vmem:[#allocation6 + $0x28] sm:$0xf]  ;;  %v5124_v1 = vld [vmem:[#allocation6 + $0x34] sm:$0xf0] }
  0x9e   :  { %1903 = vmatpush.bf16.msra.mxu1 %v3704_v58  ;;  %1916 = vmatpush.bf16.msra.mxu2 %v3832_v59  ;;  %v5192_v58 = vld [vmem:[#allocation6 + $0x254] sm:$0xf0]  ;;  %v3879_v59 = vld [vmem:[#allocation6 + $0x348] sm:$0xf]  ;;  %v3480_v11 = vor.u32 %v5124_v1, %v3479_v0 }
  0x9f   :  { %1929 = vmatpush.bf16.msra.mxu3 %v3960_v63  ;;  %v3752_v63 = vor.u32 %v5192_v58, %v3751_v57  ;;  %v3607_v2 = vld [vmem:[#allocation6 + $0x128] sm:$0xf]  ;;  %v3880_v3 = vor.u32 %v5224_v60, %v3879_v59  ;;  %v5156_v4 = vld [vmem:[#allocation6 + $0x134] sm:$0xf0] }
  0xa0   :  { %1885 = vmatmul.bf16.vlgmr.msrb.gmra.mxu3 %v5752_v43  ;;  %1891 = vmatpush.bf16.msra.mxu0 %v3560_v6  ;;  %v3735_v6 = vld [vmem:[#allocation6 + $0x228] sm:$0xf]  ;;  %v5220_v10 = vld [vmem:[#allocation6 + $0x334] sm:$0xf0]  ;;  %v3608_v14 = vor.u32 %v5156_v4, %v3607_v2 }
  0xa1   :  { %v3463_v12 = vld [vmem:[#allocation6 + $0x8] sm:$0xf]  ;;  %v5152_v17 = vld [vmem:[#allocation6 + $0x114] sm:$0xf0] }
  0xa2   :  { %1904 = vmatpush.bf16.msra.mxu1 %v3688_v8  ;;  %1917 = vmatpush.bf16.msra.mxu2 %v3816_v9  ;;  %v5188_v8 = vld [vmem:[#allocation6 + $0x234] sm:$0xf0]  ;;  %v3863_v9 = vld [vmem:[#allocation6 + $0x328] sm:$0xf] }
  0xa3   :  { %1930 = vmatpush.bf16.msra.mxu3 %v3944_v13  ;;  %v5120_v13 = vld [vmem:[#allocation6 + $0x14] sm:$0xf0]  ;;  %v3736_v15 = vor.u32 %v5188_v8, %v3735_v6  ;;  %v3591_v16 = vld [vmem:[#allocation6 + $0x108] sm:$0xf] }
  0xa4   :  { %1892 = vmatpush.bf16.msra.mxu0 %v3544_v19  ;;  %v3719_v18 = vld [vmem:[#allocation6 + $0x208] sm:$0xf]  ;;  %v3864_v19 = vor.u32 %v5220_v10, %v3863_v9  ;;  %v5216_v24 = vld [vmem:[#allocation6 + $0x314] sm:$0xf0]  ;;  %v3464_v28 = vor.u32 %v5120_v13, %v3463_v12  ;;  %v3592_v32 = vor.u32 %v5152_v17, %v3591_v16 }
  0xa5   :  { %v4087_v25 = vld [vmem:[#allocation6 + $0x4e8] sm:$0xf]  ;;  %v5276_v26 = vld [vmem:[#allocation6 + $0x4f4] sm:$0xf0] }
  0xa6   :  { %1905 = vmatpush.bf16.msra.mxu1 %v3672_v20  ;;  %1918 = vmatpush.bf16.msra.mxu2 %v3800_v23  ;;  %v5184_v20 = vld [vmem:[#allocation6 + $0x214] sm:$0xf0]  ;;  %v3847_v23 = vld [vmem:[#allocation6 + $0x308] sm:$0xf]  ;;  %v4088_v37 = vor.u32 %v5276_v26, %v4087_v25 }
  0xa7   :  { %1931 = vmatpush.bf16.msra.mxu3 %v3928_v27  ;;  %v4215_v27 = vld [vmem:[#allocation6 + $0x5e8] sm:$0xf]  ;;  %v5308_v29 = vld [vmem:[#allocation6 + $0x5f4] sm:$0xf0]  ;;  %v3848_v36 = vor.u32 %v5216_v24, %v3847_v23 }
  0xa8   :  { %1893 = vmatpush.bf16.msra.mxu0 %v3528_v33  ;;  %v4343_v30 = vld [vmem:[#allocation6 + $0x6e8] sm:$0xf]  ;;  %v5340_v31 = vld [vmem:[#allocation6 + $0x6f4] sm:$0xf0]  ;;  %v3720_v33 = vor.u32 %v5184_v20, %v3719_v18  ;;  %v4216_v38 = vor.u32 %v5308_v29, %v4215_v27 }
  0xa9   :  { %v4071_v41 = vld [vmem:[#allocation6 + $0x4c8] sm:$0xf]  ;;  %v5272_v44 = vld [vmem:[#allocation6 + $0x4d4] sm:$0xf0] }
  0xaa   :  { %1906 = vmatpush.bf16.msra.mxu1 %v3656_v34  ;;  %1919 = vmatpush.bf16.msra.mxu2 %v3784_v35  ;;  %v4471_v34 = vld [vmem:[#allocation6 + $0x7e8] sm:$0xf]  ;;  %v5372_v35 = vld [vmem:[#allocation6 + $0x7f4] sm:$0xf0]  ;;  %v4072_v53 = vor.u32 %v5272_v44, %v4071_v41 }
  0xab   :  { %1932 = vmatpush.bf16.msra.mxu3 %v3912_v40  ;;  %v4344_v40 = vor.u32 %v5340_v31, %v4343_v30  ;;  %v4199_v46 = vld [vmem:[#allocation6 + $0x5c8] sm:$0xf]  ;;  %v4472_v47 = vor.u32 %v5372_v35, %v4471_v34  ;;  %v5304_v48 = vld [vmem:[#allocation6 + $0x5d4] sm:$0xf0] }
  0xac   :  { %1894 = vmatpush.bf16.msra.mxu0 %v3512_v49  ;;  %v4327_v49 = vld [vmem:[#allocation6 + $0x6c8] sm:$0xf]  ;;  %v5368_v52 = vld [vmem:[#allocation6 + $0x7d4] sm:$0xf0]  ;;  %v4200_v54 = vor.u32 %v5304_v48, %v4199_v46 }
  0xad   :  { %v4055_v56 = vld [vmem:[#allocation6 + $0x4a8] sm:$0xf]  ;;  %v5268_v57 = vld [vmem:[#allocation6 + $0x4b4] sm:$0xf0] }
  0xae   :  { %1907 = vmatpush.bf16.msra.mxu1 %v3640_v50  ;;  %1920 = vmatpush.bf16.msra.mxu2 %v3768_v51  ;;  %v5336_v50 = vld [vmem:[#allocation6 + $0x6d4] sm:$0xf0]  ;;  %v4455_v51 = vld [vmem:[#allocation6 + $0x7c8] sm:$0xf]  ;;  %v4056_v1 = vor.u32 %v5268_v57, %v4055_v56 }
  0xaf   :  { %1933 = vmatpush.bf16.msra.mxu3 %v3896_v55  ;;  %v4328_v55 = vor.u32 %v5336_v50, %v4327_v49  ;;  %v4183_v58 = vld [vmem:[#allocation6 + $0x5a8] sm:$0xf]  ;;  %v4456_v59 = vor.u32 %v5368_v52, %v4455_v51  ;;  %v5300_v60 = vld [vmem:[#allocation6 + $0x5b4] sm:$0xf0] }
  0xb0   :  { %1895 = vmatpush.bf16.msra.mxu0 %v3496_v61  ;;  %v4311_v61 = vld [vmem:[#allocation6 + $0x6a8] sm:$0xf]  ;;  %v5364_v0 = vld [vmem:[#allocation6 + $0x7b4] sm:$0xf0]  ;;  %v4184_v2 = vor.u32 %v5300_v60, %v4183_v58 }
  0xb1   :  { %v4039_v4 = vld [vmem:[#allocation6 + $0x488] sm:$0xf]  ;;  %v5264_v6 = vld [vmem:[#allocation6 + $0x494] sm:$0xf0] }
  0xb2   :  { %1908 = vmatpush.bf16.msra.mxu1 %v3624_v62  ;;  %1921 = vmatpush.bf16.msra.mxu2 %v3752_v63  ;;  %v5332_v62 = vld [vmem:[#allocation6 + $0x6b4] sm:$0xf0]  ;;  %v4439_v63 = vld [vmem:[#allocation6 + $0x7a8] sm:$0xf] }
  0xb3   :  { %1934 = vmatpush.bf16.msra.mxu3 %v3880_v3  ;;  %v4312_v3 = vor.u32 %v5332_v62, %v4311_v61  ;;  %v4167_v8 = vld [vmem:[#allocation6 + $0x588] sm:$0xf]  ;;  %v4440_v9 = vor.u32 %v5364_v0, %v4439_v63  ;;  %v5296_v10 = vld [vmem:[#allocation6 + $0x594] sm:$0xf0] }
  0xb4   :  { %1896 = vmatpush.bf16.msra.mxu0 %v3480_v11  ;;  %v4295_v11 = vld [vmem:[#allocation6 + $0x688] sm:$0xf]  ;;  %v5328_v12 = vld [vmem:[#allocation6 + $0x694] sm:$0xf0]  ;;  %v4168_v16 = vor.u32 %v5296_v10, %v4167_v8 }
  0xb5   :  { %v4423_v13 = vld [vmem:[#allocation6 + $0x788] sm:$0xf]  ;;  %v4296_v17 = vor.u32 %v5328_v12, %v4295_v11  ;;  %v5292_v24 = vld [vmem:[#allocation6 + $0x574] sm:$0xf0] }
  0xb6   :  { %1909 = vmatpush.bf16.msra.mxu1 %v3608_v14  ;;  %1922 = vmatpush.bf16.msra.mxu2 %v3736_v15  ;;  %v5360_v14 = vld [vmem:[#allocation6 + $0x794] sm:$0xf0]  ;;  %v4040_v15 = vor.u32 %v5264_v6, %v4039_v4  ;;  %v4023_v18 = vld [vmem:[#allocation6 + $0x468] sm:$0xf] }
  0xb7   :  { %1935 = vmatpush.bf16.msra.mxu3 %v3864_v19  ;;  %v5260_v19 = vld [vmem:[#allocation6 + $0x474] sm:$0xf0]  ;;  %v4151_v20 = vld [vmem:[#allocation6 + $0x568] sm:$0xf]  ;;  %v4424_v23 = vor.u32 %v5360_v14, %v4423_v13  ;;  %v5146_v14 = vld [vmem:[#allocation6 + $0xec] sm:$0xf] }
  0xb8   :  { %1897 = vmatpush.bf16.msra.mxu0 %v3464_v28  ;;  %v4279_v25 = vld [vmem:[#allocation6 + $0x668] sm:$0xf]  ;;  %v5324_v26 = vld [vmem:[#allocation6 + $0x674] sm:$0xf0]  ;;  %v4024_v29 = vor.u32 %v5260_v19, %v4023_v18  ;;  %v4152_v30 = vor.u32 %v5292_v24, %v4151_v20  ;;  %v3705_v19 = vld [vmem:[#allocation6 + $0x1f8] sm:$0xf0] }
  0xb9   :  { %v4407_v27 = vld [vmem:[#allocation6 + $0x768] sm:$0xf]  ;;  %v5356_v28 = vld [vmem:[#allocation6 + $0x774] sm:$0xf0]  ;;  %v4280_v31 = vor.u32 %v5324_v26, %v4279_v25  ;;  %v5210_v20 = vld [vmem:[#allocation6 + $0x2ec] sm:$0xf] }
  0xba   :  { %1910 = vmatpush.bf16.msra.mxu1 %v3592_v32  ;;  %1923 = vmatpush.bf16.msra.mxu2 %v3720_v33  ;;  %v4007_v32 = vld [vmem:[#allocation6 + $0x448] sm:$0xf]  ;;  %v5256_v33 = vld [vmem:[#allocation6 + $0x454] sm:$0xf0]  ;;  %v4408_v35 = vor.u32 %v5356_v28, %v4407_v27  ;;  %v5242_v27 = vld [vmem:[#allocation6 + $0x3ec] sm:$0xf] }
  0xbb   :  { %1936 = vmatpush.bf16.msra.mxu3 %v3848_v36  ;;  %1898 = vmatmul.bf16.vlgmr.msra.gmra.mxu0 %v5741_v21  ;;  %v4135_v34 = vld [vmem:[#allocation6 + $0x548] sm:$0xf]  ;;  %v5288_v36 = vld [vmem:[#allocation6 + $0x554] sm:$0xf0]  ;;  %v4008_v46 = vor.u32 %v5256_v33, %v4007_v32  ;;  %v3961_v28 = vld [vmem:[#allocation6 + $0x3f8] sm:$0xf0] }
  0xbc   :  { %1942 = vmatpush.bf16.msrb.mxu0 %v4088_v37  ;;  %v4263_v37 = vld [vmem:[#allocation6 + $0x648] sm:$0xf]  ;;  %v5352_v41 = vld [vmem:[#allocation6 + $0x754] sm:$0xf0]  ;;  %v4136_v48 = vor.u32 %v5288_v36, %v4135_v34  ;;  %v3561_v36 = vld [vmem:[#allocation6 + $0xd8] sm:$0xf0] }
  0xbd   :  { %1924 = vmatmul.bf16.vlgmr.msra.gmra.mxu2 %v5736_v5  ;;  %1911 = vmatmul.bf16.vlgmr.msra.gmra.mxu1 %v5744_v22  ;;  %v3991_v50 = vld [vmem:[#allocation6 + $0x428] sm:$0xf]  ;;  %v5252_v51 = vld [vmem:[#allocation6 + $0x434] sm:$0xf0] }
  0xbe   :  { %1955 = vmatpush.bf16.msrb.mxu1 %v4216_v38  ;;  %1968 = vmatpush.bf16.msrb.mxu2 %v4344_v40  ;;  %v5320_v38 = vld [vmem:[#allocation6 + $0x654] sm:$0xf0]  ;;  %v4391_v40 = vld [vmem:[#allocation6 + $0x748] sm:$0xf]  ;;  %v3992_v63 = vor.u32 %v5252_v51, %v3991_v50  ;;  %v5138_v51 = vld [vmem:[#allocation6 + $0xac] sm:$0xf] }
  0xbf   :  { %1981 = vmatpush.bf16.msrb.mxu3 %v4472_v47  ;;  %v4264_v49 = vor.u32 %v5320_v38, %v4263_v37  ;;  %v4119_v52 = vld [vmem:[#allocation6 + $0x528] sm:$0xf]  ;;  %v5284_v56 = vld [vmem:[#allocation6 + $0x534] sm:$0xf0]  ;;  %v5174_v37 = vld [vmem:[#allocation6 + $0x1cc] sm:$0xf]  ;;  %v3964_v38 = vor.u32 %v5242_v27, %v3961_v28 }
  0xc0   :  { %1937 = vmatmul.bf16.vlgmr.msra.gmra.mxu3 %v5738_v7  ;;  %1943 = vmatpush.bf16.msrb.mxu0 %v4072_v53  ;;  %v4247_v57 = vld [vmem:[#allocation6 + $0x628] sm:$0xf]  ;;  %v5316_v58 = vld [vmem:[#allocation6 + $0x634] sm:$0xf0]  ;;  %v3897_v27 = vld [vmem:[#allocation6 + $0x378] sm:$0xf0] }
  0xc1   :  { %v4375_v60 = vld [vmem:[#allocation6 + $0x728] sm:$0xf]  ;;  %v5348_v61 = vld [vmem:[#allocation6 + $0x734] sm:$0xf0] }
  0xc2   :  { %1956 = vmatpush.bf16.msrb.mxu1 %v4200_v54  ;;  %1969 = vmatpush.bf16.msrb.mxu2 %v4328_v55  ;;  %v1717_v54 = vpop.f32.mrf.mxu2  ;;  %v4392_v55 = vor.u32 %v5352_v41, %v4391_v40  ;;  %v3975_v0 = vld [vmem:[#allocation6 + $0x408] sm:$0xf]  ;;  %v5280_v6 = vld [vmem:[#allocation6 + $0x514] sm:$0xf0]  ;;  %v4376_v10 = vor.u32 %v5348_v61, %v4375_v60  ;;  %v3689_v40 = vld [vmem:[#allocation6 + $0x1d8] sm:$0xf0] }
  0xc3   :  { %1982 = vmatpush.bf16.msrb.mxu3 %v4456_v59  ;;  %v1730_v59 = vpop.f32.mrf.mxu3  ;;  %v4103_v4 = vld [vmem:[#allocation6 + $0x508] sm:$0xf]  ;;  %v5312_v11 = vld [vmem:[#allocation6 + $0x614] sm:$0xf0]  ;;  %v5206_v41 = vld [vmem:[#allocation6 + $0x2cc] sm:$0xf] }
  0xc4   :  { %1944 = vmatpush.bf16.msrb.mxu0 %v4056_v1  ;;  %v5248_v1 = vld [vmem:[#allocation6 + $0x414] sm:$0xf0]  ;;  %v4231_v8 = vld [vmem:[#allocation6 + $0x608] sm:$0xf]  ;;  %v4104_v25 = vor.u32 %v5280_v6, %v4103_v4  ;;  %v5198_v4 = vld [vmem:[#allocation6 + $0x28c] sm:$0xf] }
  0xc5   :  { %v4359_v12 = vld [vmem:[#allocation6 + $0x708] sm:$0xf]  ;;  %v5344_v13 = vld [vmem:[#allocation6 + $0x714] sm:$0xf0]  ;;  %v3976_v18 = vor.u32 %v5248_v1, %v3975_v0  ;;  %v4232_v26 = vor.u32 %v5312_v11, %v4231_v8  ;;  %v3529_v0 = vld [vmem:[#allocation6 + $0x98] sm:$0xf0] }
  0xc6   :  { %1957 = vmatpush.bf16.msrb.mxu1 %v4184_v2  ;;  %1970 = vmatpush.bf16.msrb.mxu2 %v4312_v3  ;;  %v1691_v44 = vpop.f32.mrf.mxu0  ;;  %v1704_v47 = vpop.f32.mrf.mxu1  ;;  %v4120_v2 = vor.u32 %v5284_v56, %v4119_v52  ;;  %v4248_v3 = vor.u32 %v5316_v58, %v4247_v57  ;;  %v3545_v52 = vld [vmem:[#allocation6 + $0xb8] sm:$0xf0]  ;;  %v5202_v56 = vld [vmem:[#allocation6 + $0x2ac] sm:$0xf] }
  0xc7   :  { %1983 = vmatpush.bf16.msrb.mxu3 %v4440_v9  ;;  %v1705_v53 = vadd.f32 %v1704_v47, %v1691_v44  ;;  %v3817_v44 = vld [vmem:[#allocation6 + $0x2d8] sm:$0xf0]  ;;  %v5234_v58 = vld [vmem:[#allocation6 + $0x3ac] sm:$0xf]  ;;  %v3548_v60 = vor.u32 %v5138_v51, %v3545_v52 }
  0xc8   :  { %1945 = vmatpush.bf16.msrb.mxu0 %v4040_v15  ;;  %v3577_v15 = vld [vmem:[#allocation6 + $0xf8] sm:$0xf0]  ;;  %v3820_v50 = vor.u32 %v5206_v41, %v3817_v44  ;;  %v5166_v1 = vld [vmem:[#allocation6 + $0x18c] sm:$0xf] }
  0xc9   :  { %v1718_v62 = vadd.f32 %v1717_v54, %v1705_v53  ;;  %v3945_v47 = vld [vmem:[#allocation6 + $0x3d8] sm:$0xf0]  ;;  %v5170_v53 = vld [vmem:[#allocation6 + $0x1ac] sm:$0xf] }
  0xca   :  { %1958 = vmatpush.bf16.msrb.mxu1 %v4168_v16  ;;  %1971 = vmatpush.bf16.msrb.mxu2 %v4296_v17  ;;  %v5178_v16 = vld [vmem:[#allocation6 + $0x1ec] sm:$0xf]  ;;  %v3801_v57 = vld [vmem:[#allocation6 + $0x2b8] sm:$0xf0] }
  0xcb   :  { %1984 = vmatpush.bf16.msrb.mxu3 %v4424_v23  ;;  %v5772_v9 = vadd.f32 %v1730_v59, %v1718_v62  ;;  %v3833_v23 = vld [vmem:[#allocation6 + $0x2f8] sm:$0xf0]  ;;  %v1732_v32 = vpop.f32.mrf.mxu3  ;;  %v3708_v33 = vor.u32 %v5178_v16, %v3705_v19  ;;  %v3804_v62 = vor.u32 %v5202_v56, %v3801_v57  ;;  %v5230_v8 = vld [vmem:[#allocation6 + $0x38c] sm:$0xf] }
  0xcc   :  { %1946 = vmatpush.bf16.msrb.mxu0 %v4024_v29  ;;  %v1719_v29 = vpop.f32.mrf.mxu2  ;;  %v3836_v34 = vor.u32 %v5210_v20, %v3833_v23  ;;  %v3929_v59 = vld [vmem:[#allocation6 + $0x3b8] sm:$0xf0]  ;;  %v5126_v32 = vld [vmem:[#allocation6 + $0x4c] sm:$0xf] }
  0xcd   :  { %v3785_v6 = vld [vmem:[#allocation6 + $0x298] sm:$0xf0]  ;;  %v5222_v44 = vld [vmem:[#allocation6 + $0x34c] sm:$0xf] }
  0xce   :  { %1959 = vmatpush.bf16.msrb.mxu1 %v4152_v30  ;;  %1972 = vmatpush.bf16.msrb.mxu2 %v4280_v31  ;;  %v1693_v17 = vpop.f32.mrf.mxu0  ;;  %v1706_v24 = vpop.f32.mrf.mxu1  ;;  %v4360_v30 = vor.u32 %v5344_v13, %v4359_v12  ;;  %v3580_v31 = vor.u32 %v5146_v14, %v3577_v15  ;;  %v3788_v14 = vor.u32 %v5198_v4, %v3785_v6  ;;  %v5130_v15 = vld [vmem:[#allocation6 + $0x6c] sm:$0xf]  ;;  %v3513_v16 = vld [vmem:[#allocation6 + $0x78] sm:$0xf0] }
  0xcf   :  { %1985 = vmatpush.bf16.msrb.mxu3 %v4408_v35  ;;  %v5142_v35 = vld [vmem:[#allocation6 + $0xcc] sm:$0xf]  ;;  %v3641_v23 = vld [vmem:[#allocation6 + $0x178] sm:$0xf0]  ;;  %v3516_v29 = vor.u32 %v5130_v15, %v3513_v16 }
  0xd0   :  { %1947 = vmatpush.bf16.msrb.mxu0 %v4008_v46  ;;  %v5238_v46 = vld [vmem:[#allocation6 + $0x3cc] sm:$0xf]  ;;  %v3609_v57 = vld [vmem:[#allocation6 + $0x138] sm:$0xf0] }
  0xd1   :  { %v3948_v54 = vor.u32 %v5238_v46, %v3945_v47  ;;  %v5162_v17 = vld [vmem:[#allocation6 + $0x16c] sm:$0xf]  ;;  %v3881_v46 = vld [vmem:[#allocation6 + $0x358] sm:$0xf0] }
  0xd2   :  { %1960 = vmatpush.bf16.msrb.mxu1 %v4136_v48  ;;  %1973 = vmatpush.bf16.msrb.mxu2 %v4264_v49  ;;  %v3564_v48 = vor.u32 %v5142_v35, %v3561_v36  ;;  %v3692_v49 = vor.u32 %v5174_v37, %v3689_v40  ;;  %v5194_v24 = vld [vmem:[#allocation6 + $0x26c] sm:$0xf]  ;;  %v3625_v36 = vld [vmem:[#allocation6 + $0x158] sm:$0xf0]  ;;  %v3884_v56 = vor.u32 %v5222_v44, %v3881_v46 }
  0xd3   :  { %1986 = vmatpush.bf16.msrb.mxu3 %v4392_v55  ;;  %v3673_v55 = vld [vmem:[#allocation6 + $0x1b8] sm:$0xf0]  ;;  %v5190_v37 = vld [vmem:[#allocation6 + $0x24c] sm:$0xf] }
  0xd4   :  { %1948 = vmatpush.bf16.msrb.mxu0 %v3992_v63  ;;  %v3676_v61 = vor.u32 %v5170_v53, %v3673_v55  ;;  %v5134_v63 = vld [vmem:[#allocation6 + $0x8c] sm:$0xf]  ;;  %v3481_v53 = vld [vmem:[#allocation6 + $0x38] sm:$0xf0] }
  0xd5   :  { %v3532_v11 = vor.u32 %v5134_v63, %v3529_v0  ;;  %v5122_v52 = vld [vmem:[#allocation6 + $0x2c] sm:$0xf]  ;;  %v3465_v0 = vld [vmem:[#allocation6 + $0x18] sm:$0xf0] }
  0xd6   :  { %1961 = vmatpush.bf16.msrb.mxu1 %v4120_v2  ;;  %1974 = vmatpush.bf16.msrb.mxu2 %v4248_v3  ;;  %v3932_v2 = vor.u32 %v5234_v58, %v3929_v59  ;;  %v3657_v3 = vld [vmem:[#allocation6 + $0x198] sm:$0xf0]  ;;  %v5186_v58 = vld [vmem:[#allocation6 + $0x22c] sm:$0xf] }
  0xd7   :  { %1987 = vmatpush.bf16.msrb.mxu3 %v4376_v10  ;;  %v3913_v10 = vld [vmem:[#allocation6 + $0x398] sm:$0xf0]  ;;  %v3660_v13 = vor.u32 %v5166_v1, %v3657_v3  ;;  %v5118_v63 = vld [vmem:[#allocation6 + $0xc] sm:$0xf] }
  0xd8   :  { %1949 = vmatpush.bf16.msrb.mxu0 %v3976_v18  ;;  %v3916_v20 = vor.u32 %v5230_v8, %v3913_v10  ;;  %v3737_v59 = vld [vmem:[#allocation6 + $0x238] sm:$0xf0]  ;;  %v5150_v3 = vld [vmem:[#allocation6 + $0x10c] sm:$0xf] }
  0xd9   :  { %v3593_v4 = vld [vmem:[#allocation6 + $0x118] sm:$0xf0]  ;;  %v5182_v6 = vld [vmem:[#allocation6 + $0x20c] sm:$0xf] }
  0xda   :  { %1962 = vmatpush.bf16.msrb.mxu1 %v4104_v25  ;;  %1975 = vmatpush.bf16.msrb.mxu2 %v4232_v26  ;;  %v1743_v12 = vpop.f32.mrf.mxu0  ;;  %v3769_v25 = vld [vmem:[#allocation6 + $0x278] sm:$0xf0]  ;;  %v5226_v26 = vld [vmem:[#allocation6 + $0x36c] sm:$0xf] }
  0xdb   :  { %1988 = vmatpush.bf16.msrb.mxu3 %v4360_v30  ;;  %1950 = vmatmul.bf16.vlgmr.msrb.gmra.mxu0 %v5750_v42  ;;  %v1744_v18 = vadd.f32 %v1743_v12, %v5772_v9  ;;  %v3644_v30 = vor.u32 %v5162_v17, %v3641_v23  ;;  %v3900_v9 = vor.u32 %v5226_v26, %v3897_v27  ;;  %v5214_v12 = vld [vmem:[#allocation6 + $0x30c] sm:$0xf]  ;;  %v4089_v16 = vld [vmem:[#allocation6 + $0x4f8] sm:$0xf0] }
  0xdc   :  { %1994 = vmatpush.bf16.msra.mxu0 %v3580_v31  ;;  %v1756_v19 = vpop.f32.mrf.mxu1  ;;  %v3772_v31 = vor.u32 %v5194_v24, %v3769_v25  ;;  %v5274_v15 = vld [vmem:[#allocation6 + $0x4ec] sm:$0xf]  ;;  %v4345_v23 = vld [vmem:[#allocation6 + $0x6f8] sm:$0xf0]  ;;  %v3596_v24 = vor.u32 %v5150_v3, %v3593_v4 }
  0xdd   :  { %1976 = vmatmul.bf16.vlgmr.msrb.gmra.mxu2 %v5748_v39  ;;  %1963 = vmatmul.bf16.vlgmr.msrb.gmra.mxu1 %v5754_v45  ;;  %v1757_v28 = vadd.f32 %v1756_v19, %v1744_v18  ;;  %v5306_v17 = vld [vmem:[#allocation6 + $0x5ec] sm:$0xf]  ;;  %v3468_v18 = vor.u32 %v5118_v63, %v3465_v0  ;;  %v4217_v19 = vld [vmem:[#allocation6 + $0x5f8] sm:$0xf0] }
  0xde   :  { %2007 = vmatpush.bf16.msra.mxu1 %v3708_v33  ;;  %2020 = vmatpush.bf16.msra.mxu2 %v3836_v34  ;;  %v3497_v33 = vld [vmem:[#allocation6 + $0x58] sm:$0xf0]  ;;  %v5158_v34 = vld [vmem:[#allocation6 + $0x14c] sm:$0xf] }
  0xdf   :  { %2033 = vmatpush.bf16.msra.mxu3 %v3964_v38  ;;  %v3753_v38 = vld [vmem:[#allocation6 + $0x258] sm:$0xf0]  ;;  %v3500_v47 = vor.u32 %v5126_v32, %v3497_v33  ;;  %v5370_v26 = vld [vmem:[#allocation6 + $0x7ec] sm:$0xf] }
  0xe0   :  { %1989 = vmatmul.bf16.vlgmr.msrb.gmra.mxu3 %v5752_v43  ;;  %1995 = vmatpush.bf16.msra.mxu0 %v3564_v48  ;;  %v1769_v35 = vpop.f32.mrf.mxu2  ;;  %v3756_v51 = vor.u32 %v5190_v37, %v3753_v38  ;;  %v4473_v27 = vld [vmem:[#allocation6 + $0x7f8] sm:$0xf0]  ;;  %v5270_v32 = vld [vmem:[#allocation6 + $0x4cc] sm:$0xf] }
  0xe1   :  { %v1770_v40 = vadd.f32 %v1769_v35, %v1757_v28  ;;  %v4073_v33 = vld [vmem:[#allocation6 + $0x4d8] sm:$0xf0]  ;;  %v4476_v35 = vor.u32 %v5370_v26, %v4473_v27  ;;  %v5366_v38 = vld [vmem:[#allocation6 + $0x7cc] sm:$0xf] }
  0xe2   :  { %2008 = vmatpush.bf16.msra.mxu1 %v3692_v49  ;;  %2021 = vmatpush.bf16.msra.mxu2 %v3820_v50  ;;  %v1745_v49 = vpop.f32.mrf.mxu0  ;;  %v3628_v50 = vor.u32 %v5158_v34, %v3625_v36  ;;  %v5302_v34 = vld [vmem:[#allocation6 + $0x5cc] sm:$0xf]  ;;  %v4329_v37 = vld [vmem:[#allocation6 + $0x6d8] sm:$0xf0] }
  0xe3   :  { %2034 = vmatpush.bf16.msra.mxu3 %v3948_v54  ;;  %v1782_v41 = vpop.f32.mrf.mxu3  ;;  %v5154_v54 = vld [vmem:[#allocation6 + $0x12c] sm:$0xf]  ;;  %v4057_v49 = vld [vmem:[#allocation6 + $0x4b8] sm:$0xf0] }
  0xe4   :  { %1996 = vmatpush.bf16.msra.mxu0 %v3548_v60  ;;  %v5779_v48 = vadd.f32 %v1782_v41, %v1770_v40  ;;  %v1758_v55 = vpop.f32.mrf.mxu1  ;;  %v5218_v60 = vld [vmem:[#allocation6 + $0x32c] sm:$0xf]  ;;  %v3612_v1 = vor.u32 %v5154_v54, %v3609_v57  ;;  %v4457_v40 = vld [vmem:[#allocation6 + $0x7d8] sm:$0xf0]  ;;  %v4076_v41 = vor.u32 %v5270_v32, %v4073_v33 }
  0xe5   :  { %v5334_v36 = vld [vmem:[#allocation6 + $0x6cc] sm:$0xf]  ;;  %v4313_v54 = vld [vmem:[#allocation6 + $0x6b8] sm:$0xf0] }
  0xe6   :  { %2009 = vmatpush.bf16.msra.mxu1 %v3676_v61  ;;  %2022 = vmatpush.bf16.msra.mxu2 %v3804_v62  ;;  %v3865_v61 = vld [vmem:[#allocation6 + $0x338] sm:$0xf0]  ;;  %v3484_v62 = vor.u32 %v5122_v52, %v3481_v53  ;;  %v4332_v46 = vor.u32 %v5334_v36, %v4329_v37  ;;  %v5330_v53 = vld [vmem:[#allocation6 + $0x6ac] sm:$0xf] }
  0xe7   :  { %2035 = vmatpush.bf16.msra.mxu3 %v3932_v2  ;;  %v3740_v2 = vor.u32 %v5186_v58, %v3737_v59  ;;  %v3868_v10 = vor.u32 %v5218_v60, %v3865_v61  ;;  %v4185_v52 = vld [vmem:[#allocation6 + $0x5b8] sm:$0xf0]  ;;  %v5362_v55 = vld [vmem:[#allocation6 + $0x7ac] sm:$0xf]  ;;  %v4316_v59 = vor.u32 %v5330_v53, %v4313_v54 }
  0xe8   :  { %1997 = vmatpush.bf16.msra.mxu0 %v3532_v11  ;;  %v1771_v8 = vpop.f32.mrf.mxu2  ;;  %v3721_v11 = vld [vmem:[#allocation6 + $0x218] sm:$0xf0]  ;;  %v5262_v60 = vld [vmem:[#allocation6 + $0x48c] sm:$0xf] }
  0xe9   :  { %v3724_v25 = vor.u32 %v5182_v6, %v3721_v11  ;;  %v4041_v61 = vld [vmem:[#allocation6 + $0x498] sm:$0xf0]  ;;  %v5326_v0 = vld [vmem:[#allocation6 + $0x68c] sm:$0xf] }
  0xea   :  { %2010 = vmatpush.bf16.msra.mxu1 %v3660_v13  ;;  %2023 = vmatpush.bf16.msra.mxu2 %v3788_v14  ;;  %v3849_v13 = vld [vmem:[#allocation6 + $0x318] sm:$0xf0]  ;;  %v5258_v6 = vld [vmem:[#allocation6 + $0x46c] sm:$0xf] }
  0xeb   :  { %2036 = vmatpush.bf16.msra.mxu3 %v3916_v20  ;;  %v1784_v14 = vpop.f32.mrf.mxu3  ;;  %v5338_v20 = vld [vmem:[#allocation6 + $0x6ec] sm:$0xf]  ;;  %v3852_v28 = vor.u32 %v5214_v12, %v3849_v13  ;;  %v4169_v63 = vld [vmem:[#allocation6 + $0x598] sm:$0xf0] }
  0xec   :  { %1998 = vmatpush.bf16.msra.mxu0 %v3516_v29  ;;  %v4092_v29 = vor.u32 %v5274_v15, %v4089_v16  ;;  %v4025_v8 = vld [vmem:[#allocation6 + $0x478] sm:$0xf0]  ;;  %v5322_v14 = vld [vmem:[#allocation6 + $0x66c] sm:$0xf] }
  0xed   :  { %v4153_v13 = vld [vmem:[#allocation6 + $0x578] sm:$0xf0]  ;;  %v5354_v16 = vld [vmem:[#allocation6 + $0x76c] sm:$0xf] }
  0xee   :  { %2011 = vmatpush.bf16.msra.mxu1 %v3644_v30  ;;  %2024 = vmatpush.bf16.msra.mxu2 %v3772_v31  ;;  %v4220_v30 = vor.u32 %v5306_v17, %v4217_v19  ;;  %v4348_v31 = vor.u32 %v5338_v20, %v4345_v23  ;;  %v4281_v15 = vld [vmem:[#allocation6 + $0x678] sm:$0xf0]  ;;  %v5254_v23 = vld [vmem:[#allocation6 + $0x44c] sm:$0xf] }
  0xef   :  { %2037 = vmatpush.bf16.msra.mxu3 %v3900_v9  ;;  %v4201_v9 = vld [vmem:[#allocation6 + $0x5d8] sm:$0xf0]  ;;  %v4284_v20 = vor.u32 %v5322_v14, %v4281_v15  ;;  %v5350_v32 = vld [vmem:[#allocation6 + $0x74c] sm:$0xf] }
  0xf0   :  { %1999 = vmatpush.bf16.msra.mxu0 %v3500_v47  ;;  %v4204_v44 = vor.u32 %v5302_v34, %v4201_v9  ;;  %v5266_v47 = vld [vmem:[#allocation6 + $0x4ac] sm:$0xf]  ;;  %v4409_v17 = vld [vmem:[#allocation6 + $0x778] sm:$0xf0] }
  0xf1   :  { %v4060_v57 = vor.u32 %v5266_v47, %v4057_v49  ;;  %v4412_v27 = vor.u32 %v5354_v16, %v4409_v17  ;;  %v4393_v33 = vld [vmem:[#allocation6 + $0x758] sm:$0xf0]  ;;  %v5250_v37 = vld [vmem:[#allocation6 + $0x42c] sm:$0xf]  ;;  %v4575_v16 = vld [vmem:[#allocation9 + $0xc0] sm:$0xf] }
  0xf2   :  { %2012 = vmatpush.bf16.msra.mxu1 %v3628_v50  ;;  %2025 = vmatpush.bf16.msra.mxu2 %v3756_v51  ;;  %v5298_v50 = vld [vmem:[#allocation6 + $0x5ac] sm:$0xf]  ;;  %v4460_v51 = vor.u32 %v5366_v38, %v4457_v40  ;;  %v3993_v38 = vld [vmem:[#allocation6 + $0x438] sm:$0xf0]  ;;  %v5399_v17 = vld [vmem:[#allocation9 + $0xcc] sm:$0xf0] }
  0xf3   :  { %2038 = vmatpush.bf16.msra.mxu3 %v3884_v56  ;;  %v4441_v56 = vld [vmem:[#allocation6 + $0x7b8] sm:$0xf0]  ;;  %v4188_v58 = vor.u32 %v5298_v50, %v4185_v52  ;;  %v5282_v40 = vld [vmem:[#allocation6 + $0x52c] sm:$0xf]  ;;  %v3996_v52 = vor.u32 %v5250_v37, %v3993_v38  ;;  %v4671_v37 = vld [vmem:[#allocation9 + $0x180] sm:$0xf] }
  0xf4   :  { %2000 = vmatpush.bf16.msra.mxu0 %v3484_v62  ;;  %v4444_v62 = vor.u32 %v5362_v55, %v4441_v56  ;;  %v5314_v47 = vld [vmem:[#allocation6 + $0x62c] sm:$0xf]  ;;  %v4249_v49 = vld [vmem:[#allocation6 + $0x638] sm:$0xf0] }
  0xf5   :  { %v5346_v50 = vld [vmem:[#allocation6 + $0x72c] sm:$0xf]  ;;  %v4252_v55 = vor.u32 %v5314_v47, %v4249_v49  ;;  %v3977_v56 = vld [vmem:[#allocation6 + $0x418] sm:$0xf0]  ;;  %v4527_v47 = vld [vmem:[#allocation9 + $0x60] sm:$0xf] }
  0xf6   :  { %2013 = vmatpush.bf16.msra.mxu1 %v3612_v1  ;;  %2026 = vmatpush.bf16.msra.mxu2 %v3740_v2  ;;  %v4297_v1 = vld [vmem:[#allocation6 + $0x698] sm:$0xf0]  ;;  %v5358_v2 = vld [vmem:[#allocation6 + $0x78c] sm:$0xf]  ;;  %v5387_v49 = vld [vmem:[#allocation9 + $0x6c] sm:$0xf0] }
  0xf7   :  { %2039 = vmatpush.bf16.msra.mxu3 %v3868_v10  ;;  %v4300_v4 = vor.u32 %v5326_v0, %v4297_v1  ;;  %v5290_v10 = vld [vmem:[#allocation6 + $0x56c] sm:$0xf]  ;;  %v4361_v0 = vld [vmem:[#allocation6 + $0x718] sm:$0xf0]  ;;  %v4591_v1 = vld [vmem:[#allocation9 + $0xe0] sm:$0xf] }
  0xf8   :  { %2001 = vmatpush.bf16.msra.mxu0 %v3468_v18  ;;  %v5785_v3 = vpop.f32.mrf.mxu0  ;;  %v4028_v18 = vor.u32 %v5258_v6, %v4025_v8  ;;  %v4156_v19 = vor.u32 %v5290_v10, %v4153_v13  ;;  %v5246_v53 = vld [vmem:[#allocation6 + $0x40c] sm:$0xf]  ;;  %v5467_v13 = vld [vmem:[#allocation9 + $0x2ec] sm:$0xf0] }
  0xfa   :  { %2014 = vmatpush.bf16.msra.mxu1 %v3596_v24  ;;  %2027 = vmatpush.bf16.msra.mxu2 %v3724_v25  ;;  %v5787_v11 = vpop.f32.mrf.mxu1  ;;  %v4009_v24 = vld [vmem:[#allocation6 + $0x458] sm:$0xf0]  ;;  %v5286_v25 = vld [vmem:[#allocation6 + $0x54c] sm:$0xf] }
  0xfb   :  { %2040 = vmatpush.bf16.msra.mxu3 %v3852_v28  ;;  %2002 = vmatmul.bf16.vlgmr.msra.gmra.mxu0 %v5741_v21  ;;  %v4425_v21 = vld [vmem:[#allocation6 + $0x798] sm:$0xf0]  ;;  %v4012_v34 = vor.u32 %v5254_v23, %v4009_v24  ;;  %v1809_v15 = vadd.f32 %v5787_v11, %v5785_v3  ;;  %v4576_v23 = vor.u32 %v5399_v17, %v4575_v16  ;;  %v4831_v24 = vld [vmem:[#allocation9 + $0x2c0] sm:$0xf]  ;;  %v5395_v11 = vld [vmem:[#allocation9 + $0xac] sm:$0xf0] }
  0xfc   :  { %2046 = vmatpush.bf16.msrb.mxu0 %v4092_v29  ;;  %v4428_v12 = vor.u32 %v5358_v2, %v4425_v21  ;;  %v4137_v28 = vld [vmem:[#allocation6 + $0x558] sm:$0xf0]  ;;  %v5318_v29 = vld [vmem:[#allocation6 + $0x64c] sm:$0xf]  ;;  %v5403_v2 = vld [vmem:[#allocation9 + $0xec] sm:$0xf0]  ;;  %v3980_v21 = vor.u32 %v5246_v53, %v3977_v56 }
  0xfd   :  { %2028 = vmatmul.bf16.vlgmr.msra.gmra.mxu2 %v5736_v5  ;;  %2015 = vmatmul.bf16.vlgmr.msra.gmra.mxu1 %v5744_v22  ;;  %v5294_v5 = vld [vmem:[#allocation6 + $0x58c] sm:$0xf]  ;;  %v4140_v9 = vor.u32 %v5286_v25, %v4137_v28  ;;  %v4592_v10 = vor.u32 %v5403_v2, %v4591_v1  ;;  %v5463_v25 = vld [vmem:[#allocation9 + $0x2cc] sm:$0xf0]  ;;  %v4559_v3 = vld [vmem:[#allocation9 + $0xa0] sm:$0xf] }
  0xfe   :  { %2059 = vmatpush.bf16.msrb.mxu1 %v4220_v30  ;;  %2072 = vmatpush.bf16.msrb.mxu2 %v4348_v31  ;;  %v4172_v22 = vor.u32 %v5294_v5, %v4169_v63  ;;  %v4265_v30 = vld [vmem:[#allocation6 + $0x658] sm:$0xf0]  ;;  %v5451_v56 = vld [vmem:[#allocation9 + $0x26c] sm:$0xf0] }
  0xff   :  { %2085 = vmatpush.bf16.msrb.mxu3 %v4476_v35  ;;  %v4268_v36 = vor.u32 %v5318_v29, %v4265_v30  ;;  %v4233_v5 = vld [vmem:[#allocation6 + $0x618] sm:$0xf0]  ;;  %v4687_v29 = vld [vmem:[#allocation9 + $0x1a0] sm:$0xf]  ;;  %v5427_v30 = vld [vmem:[#allocation9 + $0x1ac] sm:$0xf0] }
 0x100   :  { %2041 = vmatmul.bf16.vlgmr.msra.gmra.mxu3 %v5738_v7  ;;  %2047 = vmatpush.bf16.msrb.mxu0 %v4076_v41  ;;  %v4044_v7 = vor.u32 %v5262_v60, %v4041_v61  ;;  %v5789_v26 = vpop.f32.mrf.mxu2  ;;  %v1797_v35 = vpop.f32.mrf.mxu0  ;;  %v5310_v61 = vld [vmem:[#allocation6 + $0x60c] sm:$0xf]  ;;  %v5411_v16 = vld [vmem:[#allocation9 + $0x12c] sm:$0xf0] }
 0x101   :  { %v4236_v6 = vor.u32 %v5310_v61, %v4233_v5  ;;  %v5459_v35 = vld [vmem:[#allocation9 + $0x2ac] sm:$0xf0]  ;;  %v5801_v61 = vld [vmem:[#allocation8] sm:$0xf] }
 0x102   :  { %2060 = vmatpush.bf16.msrb.mxu1 %v4204_v44  ;;  %2073 = vmatpush.bf16.msrb.mxu2 %v4332_v46  ;;  %v1810_v41 = vpop.f32.mrf.mxu1  ;;  %v4396_v44 = vor.u32 %v5350_v32, %v4393_v33  ;;  %v4121_v46 = vld [vmem:[#allocation6 + $0x538] sm:$0xf0]  ;;  %v4832_v32 = vor.u32 %v5463_v25, %v4831_v24  ;;  %v4560_v33 = vor.u32 %v5395_v11, %v4559_v3  ;;  %v4607_v3 = vld [vmem:[#allocation9 + $0x100] sm:$0xf] }
 0x103   :  { %2086 = vmatpush.bf16.msrb.mxu3 %v4460_v51  ;;  %v5791_v31 = vpop.f32.mrf.mxu3  ;;  %v4377_v51 = vld [vmem:[#allocation6 + $0x738] sm:$0xf0]  ;;  %v4124_v54 = vor.u32 %v5282_v40, %v4121_v46  ;;  %v5455_v41 = vld [vmem:[#allocation9 + $0x28c] sm:$0xf0] }
 0x104   :  { %2048 = vmatpush.bf16.msrb.mxu0 %v4060_v57  ;;  %v5278_v57 = vld [vmem:[#allocation6 + $0x50c] sm:$0xf]  ;;  %v4380_v60 = vor.u32 %v5346_v50, %v4377_v51  ;;  %v4655_v51 = vld [vmem:[#allocation9 + $0x160] sm:$0xf] }
 0x106   :  { %2061 = vmatpush.bf16.msrb.mxu1 %v4188_v58  ;;  %2074 = vmatpush.bf16.msrb.mxu2 %v4316_v59  ;;  %v4105_v58 = vld [vmem:[#allocation6 + $0x518] sm:$0xf0] }
 0x107   :  { %2087 = vmatpush.bf16.msrb.mxu3 %v4444_v62  ;;  %v5342_v62 = vld [vmem:[#allocation6 + $0x70c] sm:$0xf] }
 0x108   :  { %2049 = vmatpush.bf16.msrb.mxu0 %v4044_v7  ;;  %v1823_v59 = vpop.f32.mrf.mxu2  ;;  %v4719_v7 = vld [vmem:[#allocation9 + $0x1e0] sm:$0xf]  ;;  %v4364_v8 = vor.u32 %v5342_v62, %v4361_v0 }
 0x109   :  { %v4511_v59 = vld [vmem:[#allocation9 + $0x40] sm:$0xf] }
 0x10a   :  { %2062 = vmatpush.bf16.msrb.mxu1 %v4172_v22  ;;  %2075 = vmatpush.bf16.msrb.mxu2 %v4300_v4  ;;  %v5435_v22 = vld [vmem:[#allocation9 + $0x1ec] sm:$0xf0]  ;;  %v4108_v4 = vor.u32 %v5278_v57, %v4105_v58  ;;  %v4639_v62 = vld [vmem:[#allocation9 + $0x140] sm:$0xf] }
 0x10b   :  { %2088 = vmatpush.bf16.msrb.mxu3 %v4428_v12  ;;  %v1836_v63 = vpop.f32.mrf.mxu3  ;;  %v4847_v12 = vld [vmem:[#allocation9 + $0x2e0] sm:$0xf]  ;;  %v4720_v14 = vor.u32 %v5435_v22, %v4719_v7  ;;  %v2116_v7 = vperm.slane %v5801_v61, 1 }
 0x10c   :  { %2050 = vmatpush.bf16.msrb.mxu0 %v4028_v18  ;;  %v4703_v18 = vld [vmem:[#allocation9 + $0x1c0] sm:$0xf]  ;;  %v5415_v63 = vld [vmem:[#allocation9 + $0x14c] sm:$0xf0] }
 0x10e   :  { %2063 = vmatpush.bf16.msrb.mxu1 %v4156_v19  ;;  %2076 = vmatpush.bf16.msrb.mxu2 %v4284_v20  ;;  %v5431_v19 = vld [vmem:[#allocation9 + $0x1cc] sm:$0xf0]  ;;  %v4848_v20 = vor.u32 %v5467_v13, %v4847_v12  ;;  %v4495_v12 = vld [vmem:[#allocation9 + $0x20] sm:$0xf] }
 0x10f   :  { %2089 = vmatpush.bf16.msrb.mxu3 %v4412_v27  ;;  %v1822_v27 = vadd.f32 %v5789_v26, %v1809_v15  ;;  %v4704_v28 = vor.u32 %v5431_v19, %v4703_v18  ;;  %v4688_v26 = vor.u32 %v5427_v30, %v4687_v29  ;;  %v5379_v13 = vld [vmem:[#allocation9 + $0x2c] sm:$0xf0]  ;;  %v4623_v15 = vld [vmem:[#allocation9 + $0x120] sm:$0xf]  ;;  %v5401_v30 = vld [vmem:[#allocation9 + $0xe4] sm:$0xf] }
 0x110   :  { %2051 = vmatpush.bf16.msrb.mxu0 %v4012_v34  ;;  %v4815_v34 = vld [vmem:[#allocation9 + $0x2a0] sm:$0xf]  ;;  %v4496_v19 = vor.u32 %v5379_v13, %v4495_v12  ;;  %v4624_v25 = vor.u32 %v5411_v16, %v4623_v15  ;;  %v5407_v29 = vld [vmem:[#allocation9 + $0x10c] sm:$0xf0]  ;;  %v5385_v12 = vld [vmem:[#allocation9 + $0x64] sm:$0xf] }
 0x111   :  { %v4529_v13 = vld [vmem:[#allocation9 + $0x70] sm:$0xf0]  ;;  %v5417_v15 = vld [vmem:[#allocation9 + $0x164] sm:$0xf] }
 0x112   :  { %2064 = vmatpush.bf16.msrb.mxu1 %v4140_v9  ;;  %2077 = vmatpush.bf16.msrb.mxu2 %v4268_v36  ;;  %v4543_v9 = vld [vmem:[#allocation9 + $0x80] sm:$0xf]  ;;  %v5391_v36 = vld [vmem:[#allocation9 + $0x8c] sm:$0xf0]  ;;  %v4657_v16 = vld [vmem:[#allocation9 + $0x170] sm:$0xf0] }
 0x113   :  { %2090 = vmatpush.bf16.msrb.mxu3 %v4396_v44  ;;  %v4544_v38 = vor.u32 %v5391_v36, %v4543_v9  ;;  %v4735_v36 = vld [vmem:[#allocation9 + $0x200] sm:$0xf] }
 0x114   :  { %2052 = vmatpush.bf16.msrb.mxu0 %v3996_v52 }
 0x116   :  { %2065 = vmatpush.bf16.msrb.mxu1 %v4124_v54  ;;  %2078 = vmatpush.bf16.msrb.mxu2 %v4252_v55  ;;  %v4528_v54 = vor.u32 %v5387_v49, %v4527_v47  ;;  %v4783_v55 = vld [vmem:[#allocation9 + $0x260] sm:$0xf]  ;;  %v4705_v47 = vld [vmem:[#allocation9 + $0x1d0] sm:$0xf0] }
 0x117   :  { %2091 = vmatpush.bf16.msrb.mxu3 %v4380_v60  ;;  %v5383_v60 = vld [vmem:[#allocation9 + $0x4c] sm:$0xf0]  ;;  %v4784_v1 = vor.u32 %v5451_v56, %v4783_v55  ;;  %v5393_v56 = vld [vmem:[#allocation9 + $0xa4] sm:$0xf] }
 0x118   :  { %2053 = vmatpush.bf16.msrb.mxu0 %v3980_v21  ;;  %v1847_v40 = vpop.f32.mrf.mxu0  ;;  %v4512_v2 = vor.u32 %v5383_v60, %v4511_v59  ;;  %v4689_v59 = vld [vmem:[#allocation9 + $0x1b0] sm:$0xf0] }
 0x11a   :  { %2066 = vmatpush.bf16.msrb.mxu1 %v4108_v4  ;;  %2079 = vmatpush.bf16.msrb.mxu2 %v4236_v6  ;;  %v1860_v50 = vpop.f32.mrf.mxu1  ;;  %v4767_v4 = vld [vmem:[#allocation9 + $0x240] sm:$0xf]  ;;  %v5447_v6 = vld [vmem:[#allocation9 + $0x24c] sm:$0xf0] }
 0x11b   :  { %2092 = vmatpush.bf16.msrb.mxu3 %v4364_v8  ;;  %2054 = vmatmul.bf16.vlgmr.msrb.gmra.mxu0 %v5750_v42  ;;  %v1835_v42 = vadd.f32 %v5791_v31, %v1822_v27  ;;  %v5419_v31 = vld [vmem:[#allocation9 + $0x16c] sm:$0xf0]  ;;  %v2115_v8 = vperm.slane %v5801_v61, 0  ;;  %v4768_v17 = vor.u32 %v5447_v6, %v4767_v4  ;;  %v4479_v27 = vld [vmem:[#allocation9] sm:$0xf] }
 0x11c   :  { %2913 = vmatpush.bf16.msra.mxu0 %v4592_v10  ;;  %v4656_v57 = vor.u32 %v5419_v31, %v4655_v51  ;;  %v4640_v10 = vor.u32 %v5415_v63, %v4639_v62  ;;  %v5457_v62 = vld [vmem:[#allocation9 + $0x2a4] sm:$0xf]  ;;  %v4817_v63 = vld [vmem:[#allocation9 + $0x2b0] sm:$0xf0] }
 0x11d   :  { %2067 = vmatmul.bf16.vlgmr.msrb.gmra.mxu1 %v5754_v45  ;;  %2080 = vmatmul.bf16.vlgmr.msrb.gmra.mxu2 %v5748_v39  ;;  %v5423_v45 = vld [vmem:[#allocation9 + $0x18c] sm:$0xf0]  ;;  %v4816_v39 = vor.u32 %v5459_v35, %v4815_v34  ;;  %v1848_v46 = vadd.f32 %v1847_v40, %v1835_v42  ;;  %v2123_v24 = vadd.f32 %v2115_v8, %v5779_v48  ;;  %v5433_v34 = vld [vmem:[#allocation9 + $0x1e4] sm:$0xf]  ;;  %v4721_v35 = vld [vmem:[#allocation9 + $0x1f0] sm:$0xf0] }
 0x11e   :  { %2926 = vmatpush.bf16.msra.mxu1 %v4720_v14  ;;  %2093 = vmatmul.bf16.vlgmr.msrb.gmra.mxu3 %v5752_v43  ;;  %v4799_v43 = vld [vmem:[#allocation9 + $0x280] sm:$0xf]  ;;  %v4672_v44 = vor.u32 %v5423_v45, %v4671_v37  ;;  %v5439_v37 = vld [vmem:[#allocation9 + $0x20c] sm:$0xf0]  ;;  %v4608_v45 = vor.u32 %v5407_v29, %v4607_v3  ;;  %v4849_v40 = vld [vmem:[#allocation9 + $0x2f0] sm:$0xf0] }
 0x11f   :  { %2939 = vmatpush.bf16.msra.mxu2 %v4848_v20  ;;  %v1861_v52 = vadd.f32 %v1860_v50, %v1848_v46  ;;  %v4800_v53 = vor.u32 %v5455_v41, %v4799_v43  ;;  %v4751_v20 = vld [vmem:[#allocation9 + $0x220] sm:$0xf]  ;;  %v2127_v48 = vmax.f32 %v2123_v24, 0.0  ;;  %v4724_v43 = vor.u32 %v5433_v34, %v4721_v35  ;;  %v5397_v41 = vld [vmem:[#allocation9 + $0xc4] sm:$0xf] }
 0x120   :  { %2914 = vmatpush.bf16.msra.mxu0 %v4576_v23  ;;  %v1873_v58 = vpop.f32.mrf.mxu2  ;;  %v1849_v22 = vpop.f32.mrf.mxu0  ;;  %v5443_v23 = vld [vmem:[#allocation9 + $0x22c] sm:$0xf0]  ;;  %v5429_v46 = vld [vmem:[#allocation9 + $0x1c4] sm:$0xf]  ;;  %v4736_v49 = vor.u32 %v5439_v37, %v4735_v36  ;;  %v4801_v8 = vld [vmem:[#allocation9 + $0x290] sm:$0xf0]  ;;  %v4660_v24 = vor.u32 %v5417_v15, %v4657_v16 }
 0x121   :  { %v1874_v5 = vadd.f32 %v1873_v58, %v1861_v52  ;;  %v4752_v42 = vor.u32 %v5443_v23, %v4751_v20  ;;  %v5808_v31 = vpack.c.bf16 %v2127_v48, %v2127_v48  ;;  %v4708_v55 = vor.u32 %v5429_v46, %v4705_v47  ;;  %v5425_v58 = vld [vmem:[#allocation9 + $0x1a4] sm:$0xf]  ;;  %v4785_v23 = vld [vmem:[#allocation9 + $0x270] sm:$0xf0]  ;;  %v4567_v16 = vld [vmem:[#allocation9 + $0xa8] sm:$0xf] }
 0x122   :  { %2927 = vmatpush.bf16.msra.mxu1 %v4704_v28  ;;  %v1862_v14 = vpop.f32.mrf.mxu1  ;;  %v5375_v28 = vld [vmem:[#allocation9 + $0xc] sm:$0xf0]  ;;  %v4820_v22 = vor.u32 %v5457_v62, %v4817_v63  ;;  %v5453_v6 = vld [vmem:[#allocation9 + $0x284] sm:$0xf]  ;;  %v4641_v3 = vld [vmem:[#allocation9 + $0x150] sm:$0xf0] }
 0x123   :  { %2940 = vmatpush.bf16.msra.mxu2 %v4832_v32  ;;  %v1886_v0 = vpop.f32.mrf.mxu3  ;;  %v4593_v32 = vld [vmem:[#allocation9 + $0xf0] sm:$0xf0]  ;;  %v4480_v9 = vor.u32 %v5375_v28, %v4479_v27  ;;  %v5449_v20 = vld [vmem:[#allocation9 + $0x264] sm:$0xf] }
 0x124   :  { %2915 = vmatpush.bf16.msra.mxu0 %v4560_v33  ;;  %v1887_v21 = vadd.f32 %v1886_v0, %v1874_v5  ;;  %v4692_v0 = vor.u32 %v5425_v58, %v4689_v59  ;;  %v4513_v27 = vld [vmem:[#allocation9 + $0x50] sm:$0xf0]  ;;  %v5413_v28 = vld [vmem:[#allocation9 + $0x144] sm:$0xf]  ;;  %v5499_v58 = vld [vmem:[#allocation9 + $0x3ec] sm:$0xf0] }
 0x125   :  { %v4769_v34 = vld [vmem:[#allocation9 + $0x250] sm:$0xf0]  ;;  %v4644_v35 = vor.u32 %v5413_v28, %v4641_v3  ;;  %v5409_v36 = vld [vmem:[#allocation9 + $0x124] sm:$0xf]  ;;  %v4551_v28 = vld [vmem:[#allocation9 + $0x88] sm:$0xf] }
 0x126   :  { %2928 = vmatpush.bf16.msra.mxu1 %v4688_v26  ;;  %v2124_v18 = vadd.f32 %v2116_v7, %v1887_v21  ;;  %v5421_v21 = vld [vmem:[#allocation9 + $0x184] sm:$0xf]  ;;  %v4673_v7 = vld [vmem:[#allocation9 + $0x190] sm:$0xf0]  ;;  %v5392_v3 = vld [vmem:[#allocation9 + $0x94] sm:$0xf0] }
 0x127   :  { %2941 = vmatpush.bf16.msra.mxu2 %v4816_v39  ;;  %v4596_v39 = vor.u32 %v5401_v30, %v4593_v32  ;;  %v4788_v30 = vor.u32 %v5449_v20, %v4785_v23  ;;  %v4625_v37 = vld [vmem:[#allocation9 + $0x130] sm:$0xf0]  ;;  %v5405_v46 = vld [vmem:[#allocation9 + $0x104] sm:$0xf]  ;;  %v5428_v20 = vld [vmem:[#allocation9 + $0x1b4] sm:$0xf0] }
 0x128   :  { %2916 = vmatpush.bf16.msra.mxu0 %v4544_v38  ;;  %v1875_v11 = vpop.f32.mrf.mxu2  ;;  %v2128_v26 = vmax.f32 %v2124_v18, 0.0  ;;  %v5465_v38 = vld [vmem:[#allocation9 + $0x2e4] sm:$0xf]  ;;  %v4804_v18 = vor.u32 %v5453_v6, %v4801_v8  ;;  %v4609_v47 = vld [vmem:[#allocation9 + $0x110] sm:$0xf0] }
 0x129   :  { %v4852_v51 = vor.u32 %v5465_v38, %v4849_v40  ;;  %v5373_v38 = vld [vmem:[#allocation9 + $0x4] sm:$0xf]  ;;  %v4612_v63 = vor.u32 %v5405_v46, %v4609_v47  ;;  %v4959_v6 = vld [vmem:[#allocation9 + $0x3c0] sm:$0xf]  ;;  %v5495_v8 = vld [vmem:[#allocation9 + $0x3cc] sm:$0xf0] }
 0x12a   :  { %2929 = vmatpush.bf16.msra.mxu1 %v4672_v44  ;;  %v4577_v44 = vld [vmem:[#allocation9 + $0xd0] sm:$0xf0]  ;;  %v5806_v50 = vpack.c.bf16 %v2128_v26, %v2128_v26  ;;  %v5441_v40 = vld [vmem:[#allocation9 + $0x224] sm:$0xf]  ;;  %v4943_v23 = vld [vmem:[#allocation9 + $0x3a0] sm:$0xf] }
 0x12b   :  { %2942 = vmatpush.bf16.msra.mxu2 %v4800_v53  ;;  %v1888_v33 = vpop.f32.mrf.mxu3  ;;  %v4580_v52 = vor.u32 %v5397_v41, %v4577_v44  ;;  %v5461_v53 = vld [vmem:[#allocation9 + $0x2c4] sm:$0xf]  ;;  %v4497_v26 = vld [vmem:[#allocation9 + $0x30] sm:$0xf0]  ;;  %v4628_v41 = vor.u32 %v5409_v36, %v4625_v37  ;;  %v5388_v36 = vld [vmem:[#allocation9 + $0x74] sm:$0xf0] }
 0x12c   :  { %2917 = vmatpush.bf16.msra.mxu0 %v4528_v54  ;;  %v4833_v54 = vld [vmem:[#allocation9 + $0x2d0] sm:$0xf0]  ;;  %v5445_v33 = vld [vmem:[#allocation9 + $0x244] sm:$0xf]  ;;  %v4663_v37 = vld [vmem:[#allocation9 + $0x168] sm:$0xf] }
 0x12d   :  { %v4836_v60 = vor.u32 %v5461_v53, %v4833_v54  ;;  %v4481_v44 = vld [vmem:[#allocation9 + $0x10] sm:$0xf0]  ;;  %v5436_v54 = vld [vmem:[#allocation9 + $0x1f4] sm:$0xf0]  ;;  %v4519_v47 = vld [vmem:[#allocation9 + $0x48] sm:$0xf] }
 0x12e   :  { %2930 = vmatpush.bf16.msra.mxu1 %v4656_v57  ;;  %v4561_v57 = vld [vmem:[#allocation9 + $0xb0] sm:$0xf0]  ;;  %v4484_v59 = vor.u32 %v5373_v38, %v4481_v44  ;;  %v5483_v38 = vld [vmem:[#allocation9 + $0x36c] sm:$0xf0] }
 0x12f   :  { %2943 = vmatpush.bf16.msra.mxu2 %v4784_v1  ;;  %v4564_v5 = vor.u32 %v5393_v56, %v4561_v57  ;;  %v5389_v1 = vld [vmem:[#allocation9 + $0x84] sm:$0xf]  ;;  %v4975_v57 = vld [vmem:[#allocation9 + $0x3e0] sm:$0xf] }
 0x130   :  { %2918 = vmatpush.bf16.msra.mxu0 %v4512_v2  ;;  %v4545_v2 = vld [vmem:[#allocation9 + $0x90] sm:$0xf0]  ;;  %v4976_v62 = vor.u32 %v5499_v58, %v4975_v57 }
 0x131   :  { %v4548_v4 = vor.u32 %v5389_v1, %v4545_v2  ;;  %v4583_v2 = vld [vmem:[#allocation9 + $0xc8] sm:$0xf] }
 0x132   :  { %2931 = vmatpush.bf16.msra.mxu1 %v4640_v10  ;;  %v4676_v10 = vor.u32 %v5421_v21, %v4673_v7  ;;  %v5400_v21 = vld [vmem:[#allocation9 + $0xd4] sm:$0xf0]  ;;  %v4711_v7 = vld [vmem:[#allocation9 + $0x1c8] sm:$0xf]  ;;  %2952 = vmatpush.bf16.msra.mxu3 %v4976_v62 }
 0x133   :  { %2944 = vmatpush.bf16.msra.mxu2 %v4768_v17  ;;  %v4503_v62 = vld [vmem:[#allocation9 + $0x28] sm:$0xf] }
 0x134   :  { %2919 = vmatpush.bf16.msra.mxu0 %v4496_v19  ;;  %v4532_v19 = vor.u32 %v5385_v12, %v4529_v13  ;;  %v4960_v12 = vor.u32 %v5495_v8, %v4959_v6  ;;  %v4584_v13 = vor.u32 %v5400_v21, %v4583_v2  ;;  %v5412_v2 = vld [vmem:[#allocation9 + $0x134] sm:$0xf0] }
 0x135   :  { %v5376_v6 = vld [vmem:[#allocation9 + $0x14] sm:$0xf0] }
 0x136   :  { %2932 = vmatpush.bf16.msra.mxu1 %v4624_v25  ;;  %v5381_v25 = vld [vmem:[#allocation9 + $0x44] sm:$0xf]  ;;  %2953 = vmatpush.bf16.msra.mxu3 %v4960_v12 }
 0x137   :  { %2945 = vmatpush.bf16.msra.mxu2 %v4752_v42  ;;  %v4516_v32 = vor.u32 %v5381_v25, %v4513_v27  ;;  %v5377_v42 = vld [vmem:[#allocation9 + $0x24] sm:$0xf] }
 0x138   :  { %2920 = vmatpush.bf16.msra.mxu0 %v4480_v9  ;;  %v5812_v14 = vpop.f32.mrf.mxu0 }
 0x13a   :  { %2933 = vmatpush.bf16.msra.mxu1 %v4608_v45  ;;  %v5814_v17 = vpop.f32.mrf.mxu1  ;;  %v4772_v45 = vor.u32 %v5445_v33, %v4769_v34  ;;  %v4927_v33 = vld [vmem:[#allocation9 + $0x380] sm:$0xf]  ;;  %v5487_v34 = vld [vmem:[#allocation9 + $0x38c] sm:$0xf0] }
 0x13b   :  { %2921 = vmatmul.bf16.vlgmr.msra.gmra.mxu0 %v5808_v31  ;;  %2946 = vmatpush.bf16.msra.mxu2 %v4736_v49  ;;  %v4599_v49 = vld [vmem:[#allocation9 + $0xe8] sm:$0xf] }
 0x13c   :  { %2965 = vmatpush.bf16.msrb.mxu0 %v4596_v39  ;;  %v4500_v39 = vor.u32 %v5377_v42, %v4497_v26  ;;  %v4928_v42 = vor.u32 %v5487_v34, %v4927_v33  ;;  %v4552_v26 = vor.u32 %v5392_v3, %v4551_v28  ;;  %v5434_v28 = vld [vmem:[#allocation9 + $0x1ec] sm:$0xf]  ;;  %v4729_v3 = vld [vmem:[#allocation9 + $0x1f8] sm:$0xf0]  ;;  %v5497_v33 = vld [vmem:[#allocation9 + $0x3e4] sm:$0xf] }
 0x13d   :  { %2934 = vmatmul.bf16.vlgmr.msra.gmra.mxu1 %v5806_v50 }
 0x13e   :  { %2978 = vmatpush.bf16.msrb.mxu1 %v4724_v43  ;;  %v4753_v43 = vld [vmem:[#allocation9 + $0x230] sm:$0xf0] }
 0x13f   :  { %2991 = vmatpush.bf16.msrb.mxu2 %v4852_v51  ;;  %v5404_v51 = vld [vmem:[#allocation9 + $0xf4] sm:$0xf0]  ;;  %v4756_v56 = vor.u32 %v5441_v40, %v4753_v43 }
 0x140   :  { %2966 = vmatpush.bf16.msrb.mxu0 %v4580_v52  ;;  %v5816_v11 = vpop.f32.mrf.mxu2  ;;  %v1901_v9 = vpop.f32.mrf.mxu0  ;;  %v4727_v52 = vld [vmem:[#allocation9 + $0x1e8] sm:$0xf] }
 0x141   :  { %v4728_v1 = vor.u32 %v5436_v54, %v4727_v52  ;;  %v4535_v9 = vld [vmem:[#allocation9 + $0x68] sm:$0xf]  ;;  %v5416_v52 = vld [vmem:[#allocation9 + $0x154] sm:$0xf0]  ;;  %v5479_v54 = vld [vmem:[#allocation9 + $0x34c] sm:$0xf0] }
 0x142   :  { %2979 = vmatpush.bf16.msrb.mxu1 %v4708_v55  ;;  %v1914_v48 = vpop.f32.mrf.mxu1  ;;  %v4536_v44 = vor.u32 %v5388_v36, %v4535_v9  ;;  %v4977_v9 = vld [vmem:[#allocation9 + $0x3f0] sm:$0xf0] }
 0x143   :  { %2992 = vmatpush.bf16.msrb.mxu2 %v4836_v60  ;;  %v5818_v29 = vpop.f32.mrf.mxu3  ;;  %v5437_v60 = vld [vmem:[#allocation9 + $0x204] sm:$0xf] }
 0x144   :  { %2967 = vmatpush.bf16.msrb.mxu0 %v4564_v5  ;;  %v4737_v5 = vld [vmem:[#allocation9 + $0x210] sm:$0xf0] }
 0x146   :  { %2980 = vmatpush.bf16.msrb.mxu1 %v4692_v0  ;;  %v4600_v0 = vor.u32 %v5404_v51, %v4599_v49  ;;  %v5384_v49 = vld [vmem:[#allocation9 + $0x54] sm:$0xf0]  ;;  %v4647_v51 = vld [vmem:[#allocation9 + $0x148] sm:$0xf] }
 0x147   :  { %2993 = vmatpush.bf16.msrb.mxu2 %v4820_v22  ;;  %v5432_v22 = vld [vmem:[#allocation9 + $0x1d4] sm:$0xf0] }
 0x148   :  { %2968 = vmatpush.bf16.msrb.mxu0 %v4548_v4  ;;  %v1927_v53 = vpop.f32.mrf.mxu2  ;;  %v4740_v4 = vor.u32 %v5437_v60, %v4737_v5  ;;  %v4712_v15 = vor.u32 %v5432_v22, %v4711_v7  ;;  %v4520_v60 = vor.u32 %v5384_v49, %v4519_v47  ;;  %v4648_v5 = vor.u32 %v5416_v52, %v4647_v51  ;;  %v4879_v7 = vld [vmem:[#allocation9 + $0x320] sm:$0xf]  ;;  %v5475_v22 = vld [vmem:[#allocation9 + $0x32c] sm:$0xf0]  ;;  %v5460_v47 = vld [vmem:[#allocation9 + $0x2b4] sm:$0xf0] }
 0x149   :  { %v4895_v53 = vld [vmem:[#allocation9 + $0x340] sm:$0xf]  ;;  %v5489_v52 = vld [vmem:[#allocation9 + $0x3a4] sm:$0xf] }
 0x14a   :  { %2981 = vmatpush.bf16.msrb.mxu1 %v4676_v10  ;;  %v1913_v10 = vadd.f32 %v5814_v17, %v5812_v14 }
 0x14b   :  { %2994 = vmatpush.bf16.msrb.mxu2 %v4804_v18  ;;  %v1940_v55 = vpop.f32.mrf.mxu3  ;;  %v5396_v18 = vld [vmem:[#allocation9 + $0xb4] sm:$0xf0] }
 0x14c   :  { %2969 = vmatpush.bf16.msrb.mxu0 %v4532_v19  ;;  %v4695_v19 = vld [vmem:[#allocation9 + $0x1a8] sm:$0xf]  ;;  %v1926_v25 = vadd.f32 %v5816_v11, %v1913_v10  ;;  %v4568_v17 = vor.u32 %v5396_v18, %v4567_v16  ;;  %v4880_v10 = vor.u32 %v5475_v22, %v4879_v7  ;;  %v5468_v18 = vld [vmem:[#allocation9 + $0x2f4] sm:$0xf0]  ;;  %v4681_v22 = vld [vmem:[#allocation9 + $0x198] sm:$0xf0] }
 0x14d   :  { %v4696_v27 = vor.u32 %v5428_v20, %v4695_v19  ;;  %v4855_v16 = vld [vmem:[#allocation9 + $0x2e8] sm:$0xf]  ;;  %v5408_v20 = vld [vmem:[#allocation9 + $0x114] sm:$0xf0] }
 0x14e   :  { %2982 = vmatpush.bf16.msrb.mxu1 %v4660_v24  ;;  %v5491_v24 = vld [vmem:[#allocation9 + $0x3ac] sm:$0xf0] }
 0x14f   :  { %2995 = vmatpush.bf16.msrb.mxu2 %v4788_v30  ;;  %v4944_v14 = vor.u32 %v5491_v24, %v4943_v23  ;;  %v4679_v30 = vld [vmem:[#allocation9 + $0x188] sm:$0xf]  ;;  %v5402_v23 = vld [vmem:[#allocation9 + $0xec] sm:$0xf]  ;;  %v4601_v24 = vld [vmem:[#allocation9 + $0xf8] sm:$0xf0] }
 0x150   :  { %2970 = vmatpush.bf16.msrb.mxu0 %v4516_v32  ;;  %v5424_v32 = vld [vmem:[#allocation9 + $0x194] sm:$0xf0] }
 0x151   :  { %2954 = vmatpush.bf16.msra.mxu3 %v4944_v14  ;;  %v4680_v11 = vor.u32 %v5424_v32, %v4679_v30  ;;  %v4863_v14 = vld [vmem:[#allocation9 + $0x300] sm:$0xf] }
 0x152   :  { %2983 = vmatpush.bf16.msrb.mxu1 %v4644_v35  ;;  %v1939_v35 = vadd.f32 %v5818_v29, %v1926_v25 }
 0x153   :  { %2996 = vmatpush.bf16.msrb.mxu2 %v4772_v45  ;;  %v5420_v45 = vld [vmem:[#allocation9 + $0x174] sm:$0xf0] }
 0x154   :  { %2971 = vmatpush.bf16.msrb.mxu0 %v4500_v39  ;;  %v4911_v39 = vld [vmem:[#allocation9 + $0x360] sm:$0xf]  ;;  %v4664_v46 = vor.u32 %v5420_v45, %v4663_v37  ;;  %v4604_v37 = vor.u32 %v5402_v23, %v4601_v24  ;;  %v4732_v45 = vor.u32 %v5434_v28, %v4729_v3  ;;  %v4665_v23 = vld [vmem:[#allocation9 + $0x178] sm:$0xf0]  ;;  %v5481_v24 = vld [vmem:[#allocation9 + $0x364] sm:$0xf] }
 0x155   :  { %2955 = vmatpush.bf16.msra.mxu3 %v4928_v42  ;;  %v4839_v42 = vld [vmem:[#allocation9 + $0x2c8] sm:$0xf] }
 0x156   :  { %2984 = vmatpush.bf16.msrb.mxu1 %v4628_v41  ;;  %v4912_v41 = vor.u32 %v5483_v38, %v4911_v39  ;;  %v5398_v39 = vld [vmem:[#allocation9 + $0xcc] sm:$0xf]  ;;  %v4585_v38 = vld [vmem:[#allocation9 + $0xd8] sm:$0xf0] }
 0x157   :  { %2997 = vmatpush.bf16.msrb.mxu2 %v4756_v56  ;;  %v4896_v56 = vor.u32 %v5479_v54, %v4895_v53  ;;  %v4588_v51 = vor.u32 %v5398_v39, %v4585_v38  ;;  %v4945_v53 = vld [vmem:[#allocation9 + $0x3b0] sm:$0xf0] }
 0x158   :  { %2972 = vmatpush.bf16.msrb.mxu0 %v4484_v59  ;;  %v1951_v48 = vpop.f32.mrf.mxu0  ;;  %v2117_v59 = vperm.slane %v5801_v61, 2 }
 0x159   :  { %v1952_v40 = vadd.f32 %v1951_v48, %v1939_v35  ;;  %2956 = vmatpush.bf16.msra.mxu3 %v4912_v41  ;;  %v4980_v48 = vor.u32 %v5497_v33, %v4977_v9  ;;  %v4713_v41 = vld [vmem:[#allocation9 + $0x1d8] sm:$0xf0]  ;;  %v5382_v33 = vld [vmem:[#allocation9 + $0x4c] sm:$0xf]  ;;  %v5477_v9 = vld [vmem:[#allocation9 + $0x344] sm:$0xf] }
 0x15a   :  { %2985 = vmatpush.bf16.msrb.mxu1 %v4612_v63  ;;  %v1964_v43 = vpop.f32.mrf.mxu1  ;;  %v5380_v63 = vld [vmem:[#allocation9 + $0x34] sm:$0xf0] }
 0x15b   :  { %2973 = vmatmul.bf16.vlgmr.msrb.gmra.mxu0 %v5808_v31  ;;  %2998 = vmatpush.bf16.msrb.mxu2 %v4740_v4  ;;  %v1965_v29 = vadd.f32 %v1964_v43, %v1952_v40  ;;  %v4487_v4 = vld [vmem:[#allocation9 + $0x8] sm:$0xf]  ;;  %v5430_v40 = vld [vmem:[#allocation9 + $0x1cc] sm:$0xf] }
 0x15c   :  { %3017 = vmatpush.bf16.msra.mxu0 %v4600_v0  ;;  %v4631_v0 = vld [vmem:[#allocation9 + $0x128] sm:$0xf]  ;;  %v4488_v35 = vor.u32 %v5376_v6, %v4487_v4  ;;  %v4716_v54 = vor.u32 %v5430_v40, %v4713_v41  ;;  %v5485_v4 = vld [vmem:[#allocation9 + $0x384] sm:$0xf]  ;;  %v4929_v6 = vld [vmem:[#allocation9 + $0x390] sm:$0xf0] }
 0x15d   :  { %2986 = vmatmul.bf16.vlgmr.msrb.gmra.mxu1 %v5806_v50  ;;  %2957 = vmatpush.bf16.msra.mxu3 %v4896_v56  ;;  %v4632_v19 = vor.u32 %v5412_v2, %v4631_v0  ;;  %v4569_v56 = vld [vmem:[#allocation9 + $0xb8] sm:$0xf0]  ;;  %v5378_v41 = vld [vmem:[#allocation9 + $0x2c] sm:$0xf] }
 0x15e   :  { %3030 = vmatpush.bf16.msra.mxu1 %v4728_v1  ;;  %v4553_v2 = vld [vmem:[#allocation9 + $0x98] sm:$0xf0] }
 0x160   :  { %3018 = vmatpush.bf16.msra.mxu0 %v4584_v13  ;;  %v1977_v55 = vpop.f32.mrf.mxu2  ;;  %v1953_v21 = vpop.f32.mrf.mxu0  ;;  %v4504_v13 = vor.u32 %v5380_v63, %v4503_v62  ;;  %v4948_v62 = vor.u32 %v5489_v52, %v4945_v53  ;;  %v4743_v53 = vld [vmem:[#allocation9 + $0x208] sm:$0xf] }
 0x161   :  { %v1978_v57 = vadd.f32 %v1977_v55, %v1965_v29  ;;  %2958 = vmatpush.bf16.msra.mxu3 %v4880_v10  ;;  %v4961_v29 = vld [vmem:[#allocation9 + $0x3d0] sm:$0xf0]  ;;  %v5394_v55 = vld [vmem:[#allocation9 + $0xac] sm:$0xf]  ;;  %v5452_v10 = vld [vmem:[#allocation9 + $0x274] sm:$0xf0] }
 0x162   :  { %3031 = vmatpush.bf16.msra.mxu1 %v4712_v15  ;;  %v1966_v8 = vpop.f32.mrf.mxu1  ;;  %v4615_v15 = vld [vmem:[#allocation9 + $0x108] sm:$0xf]  ;;  %v4572_v63 = vor.u32 %v5394_v55, %v4569_v56  ;;  %v5422_v21 = vld [vmem:[#allocation9 + $0x18c] sm:$0xf] }
 0x163   :  { %v1990_v58 = vpop.f32.mrf.mxu3  ;;  %v4616_v36 = vor.u32 %v5408_v20, %v4615_v15  ;;  %v4791_v8 = vld [vmem:[#allocation9 + $0x268] sm:$0xf]  ;;  %v4684_v15 = vor.u32 %v5422_v21, %v4681_v22  ;;  %v4865_v21 = vld [vmem:[#allocation9 + $0x310] sm:$0xf0] }
 0x164   :  { %3019 = vmatpush.bf16.msra.mxu0 %v4568_v17  ;;  %v1991_v1 = vadd.f32 %v1990_v58, %v1978_v57  ;;  %v5471_v17 = vld [vmem:[#allocation9 + $0x30c] sm:$0xf0]  ;;  %v5426_v58 = vld [vmem:[#allocation9 + $0x1ac] sm:$0xf]  ;;  %v4792_v20 = vor.u32 %v5452_v10, %v4791_v8  ;;  %v4841_v10 = vld [vmem:[#allocation9 + $0x2d8] sm:$0xf0] }
 0x165   :  { %v4864_v32 = vor.u32 %v5471_v17, %v4863_v14  ;;  %v4775_v17 = vld [vmem:[#allocation9 + $0x248] sm:$0xf]  ;;  %v5462_v8 = vld [vmem:[#allocation9 + $0x2cc] sm:$0xf] }
 0x166   :  { %3032 = vmatpush.bf16.msra.mxu1 %v4696_v27  ;;  %v2125_v12 = vadd.f32 %v2117_v59, %v1991_v1  ;;  %v4856_v27 = vor.u32 %v5468_v18, %v4855_v16  ;;  %v4697_v59 = vld [vmem:[#allocation9 + $0x1b8] sm:$0xf0]  ;;  %v5390_v1 = vld [vmem:[#allocation9 + $0x8c] sm:$0xf] }
 0x167   :  { %2959 = vmatpush.bf16.msra.mxu3 %v4864_v32  ;;  %v4700_v0 = vor.u32 %v5426_v58, %v4697_v59  ;;  %v5386_v16 = vld [vmem:[#allocation9 + $0x6c] sm:$0xf]  ;;  %v4537_v18 = vld [vmem:[#allocation9 + $0x78] sm:$0xf0] }
 0x168   :  { %3020 = vmatpush.bf16.msra.mxu0 %v4552_v26  ;;  %v2129_v25 = vmax.f32 %v2125_v12, 0.0  ;;  %v1979_v30 = vpop.f32.mrf.mxu2  ;;  %v5464_v26 = vld [vmem:[#allocation9 + $0x2d4] sm:$0xf0]  ;;  %v4932_v12 = vor.u32 %v5485_v4, %v4929_v6  ;;  %v4540_v3 = vor.u32 %v5386_v16, %v4537_v18  ;;  %v5466_v58 = vld [vmem:[#allocation9 + $0x2ec] sm:$0xf] }
 0x169   :  { %v4840_v43 = vor.u32 %v5464_v26, %v4839_v42  ;;  %v5414_v42 = vld [vmem:[#allocation9 + $0x14c] sm:$0xf]  ;;  %v4857_v59 = vld [vmem:[#allocation9 + $0x2f8] sm:$0xf0] }
 0x16a   :  { %3033 = vmatpush.bf16.msra.mxu1 %v4680_v11  ;;  %v5827_v34 = vpack.c.bf16 %v2129_v25, %v2129_v25  ;;  %v4913_v25 = vld [vmem:[#allocation9 + $0x370] sm:$0xf0]  ;;  %v5458_v16 = vld [vmem:[#allocation9 + $0x2ac] sm:$0xf]  ;;  %v4825_v18 = vld [vmem:[#allocation9 + $0x2b8] sm:$0xf0] }
 0x16b   :  { %v1992_v11 = vpop.f32.mrf.mxu3  ;;  %3004 = vmatpush.bf16.msrb.mxu3 %v4980_v48  ;;  %v4916_v28 = vor.u32 %v5481_v24, %v4913_v25  ;;  %v5444_v48 = vld [vmem:[#allocation9 + $0x234] sm:$0xf0]  ;;  %v4809_v24 = vld [vmem:[#allocation9 + $0x298] sm:$0xf0] }
 0x16c   :  { %3021 = vmatpush.bf16.msra.mxu0 %v4536_v44  ;;  %2947 = vmatmul.bf16.vlgmr.msra.gmra.mxu2 %v5827_v34  ;;  %v5493_v44 = vld [vmem:[#allocation9 + $0x3c4] sm:$0xf]  ;;  %v4649_v11 = vld [vmem:[#allocation9 + $0x158] sm:$0xf0] }
 0x16d   :  { %3043 = vmatpush.bf16.msra.mxu2 %v4856_v27  ;;  %v4964_v49 = vor.u32 %v5493_v44, %v4961_v29  ;;  %v5448_v27 = vld [vmem:[#allocation9 + $0x254] sm:$0xf0]  ;;  %v4652_v40 = vor.u32 %v5414_v42, %v4649_v11  ;;  %v4505_v44 = vld [vmem:[#allocation9 + $0x38] sm:$0xf0]  ;;  %v5410_v29 = vld [vmem:[#allocation9 + $0x12c] sm:$0xf] }
 0x16e   :  { %3034 = vmatpush.bf16.msra.mxu1 %v4664_v46  ;;  %v4823_v46 = vld [vmem:[#allocation9 + $0x2a8] sm:$0xf]  ;;  %v4776_v26 = vor.u32 %v5448_v27, %v4775_v17  ;;  %v4508_v56 = vor.u32 %v5378_v41, %v4505_v44  ;;  %v5450_v27 = vld [vmem:[#allocation9 + $0x26c] sm:$0xf]  ;;  %v4761_v11 = vld [vmem:[#allocation9 + $0x238] sm:$0xf0] }
 0x16f   :  { %v4824_v57 = vor.u32 %v5460_v47, %v4823_v46  ;;  %3005 = vmatpush.bf16.msrb.mxu3 %v4964_v49  ;;  %v4633_v47 = vld [vmem:[#allocation9 + $0x138] sm:$0xf0]  ;;  %v5473_v49 = vld [vmem:[#allocation9 + $0x324] sm:$0xf]  ;;  %v5446_v42 = vld [vmem:[#allocation9 + $0x24c] sm:$0xf] }
 0x170   :  { %3022 = vmatpush.bf16.msra.mxu0 %v4520_v60  ;;  %v4807_v60 = vld [vmem:[#allocation9 + $0x288] sm:$0xf] }
 0x171   :  { %3044 = vmatpush.bf16.msra.mxu2 %v4840_v43 }
 0x172   :  { %3035 = vmatpush.bf16.msra.mxu1 %v4648_v5  ;;  %v5456_v5 = vld [vmem:[#allocation9 + $0x294] sm:$0xf0] }
 0x173   :  { %v4808_v7 = vor.u32 %v5456_v5, %v4807_v60  ;;  %3006 = vmatpush.bf16.msrb.mxu3 %v4948_v62  ;;  %v4636_v60 = vor.u32 %v5410_v29, %v4633_v47  ;;  %v5374_v5 = vld [vmem:[#allocation9 + $0xc] sm:$0xf]  ;;  %v4489_v62 = vld [vmem:[#allocation9 + $0x18] sm:$0xf0]  ;;  %v5500_v47 = vld [vmem:[#allocation9 + $0x3f4] sm:$0xf0] }
 0x174   :  { %3023 = vmatpush.bf16.msra.mxu0 %v4504_v13  ;;  %v4556_v13 = vor.u32 %v5390_v1, %v4553_v2  ;;  %v4617_v1 = vld [vmem:[#allocation9 + $0x118] sm:$0xf0]  ;;  %v5469_v2 = vld [vmem:[#allocation9 + $0x304] sm:$0xf]  ;;  %v4492_v4 = vor.u32 %v5374_v5, %v4489_v62  ;;  %v4935_v5 = vld [vmem:[#allocation9 + $0x388] sm:$0xf] }
 0x175   :  { %3045 = vmatpush.bf16.msra.mxu2 %v4824_v57  ;;  %v4868_v22 = vor.u32 %v5469_v2, %v4865_v21  ;;  %v5488_v62 = vld [vmem:[#allocation9 + $0x394] sm:$0xf0] }
 0x176   :  { %3036 = vmatpush.bf16.msra.mxu1 %v4632_v19  ;;  %v5418_v19 = vld [vmem:[#allocation9 + $0x16c] sm:$0xf]  ;;  %v5484_v2 = vld [vmem:[#allocation9 + $0x374] sm:$0xf0] }
 0x177   :  { %3007 = vmatpush.bf16.msrb.mxu3 %v4932_v12  ;;  %v4668_v32 = vor.u32 %v5418_v19, %v4665_v23  ;;  %v5454_v23 = vld [vmem:[#allocation9 + $0x28c] sm:$0xf] }
 0x178   :  { %3024 = vmatpush.bf16.msra.mxu0 %v4488_v35  ;;  %v5832_v14 = vpop.f32.mrf.mxu0  ;;  %v4521_v35 = vld [vmem:[#allocation9 + $0x58] sm:$0xf0]  ;;  %v4812_v17 = vor.u32 %v5454_v23, %v4809_v24  ;;  %v5498_v23 = vld [vmem:[#allocation9 + $0x3ec] sm:$0xf] }
 0x179   :  { %3046 = vmatpush.bf16.msra.mxu2 %v4808_v7  ;;  %v4524_v39 = vor.u32 %v5382_v33, %v4521_v35  ;;  %v4860_v7 = vor.u32 %v5466_v58, %v4857_v59  ;;  %v5492_v58 = vld [vmem:[#allocation9 + $0x3b4] sm:$0xf0]  ;;  %v4985_v24 = vld [vmem:[#allocation9 + $0x3f8] sm:$0xf0] }
 0x17a   :  { %3037 = vmatpush.bf16.msra.mxu1 %v4616_v36  ;;  %v5834_v30 = vpop.f32.mrf.mxu1  ;;  %v4897_v36 = vld [vmem:[#allocation9 + $0x350] sm:$0xf0] }
 0x17b   :  { %3025 = vmatmul.bf16.vlgmr.msra.gmra.mxu0 %v5808_v31  ;;  %3008 = vmatpush.bf16.msrb.mxu3 %v4916_v28  ;;  %v2017_v19 = vadd.f32 %v5834_v30, %v5832_v14  ;;  %v4793_v28 = vld [vmem:[#allocation9 + $0x278] sm:$0xf0] }
 0x17c   :  { %3069 = vmatpush.bf16.msrb.mxu0 %v4604_v37  ;;  %2999 = vmatmul.bf16.vlgmr.msrb.gmra.mxu2 %v5827_v34  ;;  %v4759_v37 = vld [vmem:[#allocation9 + $0x228] sm:$0xf]  ;;  %v4796_v33 = vor.u32 %v5450_v27, %v4793_v28  ;;  %v4777_v14 = vld [vmem:[#allocation9 + $0x258] sm:$0xf0]  ;;  %v5494_v27 = vld [vmem:[#allocation9 + $0x3cc] sm:$0xf] }
 0x17d   :  { %3038 = vmatmul.bf16.vlgmr.msra.gmra.mxu1 %v5806_v50  ;;  %3047 = vmatpush.bf16.msra.mxu2 %v4792_v20  ;;  %v4760_v46 = vor.u32 %v5444_v48, %v4759_v37  ;;  %v4828_v20 = vor.u32 %v5458_v16, %v4825_v18  ;;  %v2118_v48 = vperm.slane %v5801_v61, 3  ;;  %v4967_v61 = vld [vmem:[#allocation9 + $0x3c8] sm:$0xf]  ;;  %v4969_v28 = vld [vmem:[#allocation9 + $0x3d8] sm:$0xf0] }
 0x17e   :  { %3082 = vmatpush.bf16.msrb.mxu1 %v4732_v45  ;;  %v4900_v45 = vor.u32 %v5477_v9, %v4897_v36 }
 0x180   :  { %3070 = vmatpush.bf16.msrb.mxu0 %v4588_v51  ;;  %v2029_v38 = vpop.f32.mrf.mxu2  ;;  %v4881_v51 = vld [vmem:[#allocation9 + $0x330] sm:$0xf0]  ;;  %v2005_v52 = vpop.f32.mrf.mxu0  ;;  %3009 = vmatpush.bf16.msrb.mxu3 %v4900_v45 }
 0x181   :  { %3048 = vmatpush.bf16.msra.mxu2 %v4776_v26  ;;  %v4884_v55 = vor.u32 %v5473_v49, %v4881_v51  ;;  %v2030_v25 = vadd.f32 %v2029_v38, %v2017_v19  ;;  %v5442_v26 = vld [vmem:[#allocation9 + $0x22c] sm:$0xf]  ;;  %v4871_v19 = vld [vmem:[#allocation9 + $0x308] sm:$0xf] }
 0x182   :  { %3083 = vmatpush.bf16.msrb.mxu1 %v4716_v54  ;;  %v5440_v54 = vld [vmem:[#allocation9 + $0x214] sm:$0xf0]  ;;  %v2018_v57 = vpop.f32.mrf.mxu1 }
 0x183   :  { %v2042_v43 = vpop.f32.mrf.mxu3  ;;  %v4951_v57 = vld [vmem:[#allocation9 + $0x3a8] sm:$0xf] }
 0x184   :  { %3071 = vmatpush.bf16.msrb.mxu0 %v4572_v63  ;;  %v5406_v63 = vld [vmem:[#allocation9 + $0x10c] sm:$0xf]  ;;  %3010 = vmatpush.bf16.msrb.mxu3 %v4884_v55  ;;  %v5496_v55 = vld [vmem:[#allocation9 + $0x3d4] sm:$0xf0]  ;;  %v4952_v59 = vor.u32 %v5492_v58, %v4951_v57  ;;  %v5507_v58 = vld [vmem:[#allocation11 + $0x30] sm:$0xff] }
 0x185   :  { %3049 = vmatpush.bf16.msra.mxu2 %v4760_v46  ;;  %v4620_v12 = vor.u32 %v5406_v63, %v4617_v1  ;;  %v4983_v46 = vld [vmem:[#allocation9 + $0x3e8] sm:$0xf]  ;;  %v5508_v57 = vld [vmem:[#allocation11 + $0x38] sm:$0xff] }
 0x186   :  { %3084 = vmatpush.bf16.msrb.mxu1 %v4700_v0  ;;  %v4744_v0 = vor.u32 %v5440_v54, %v4743_v53  ;;  %v4984_v52 = vor.u32 %v5500_v47, %v4983_v46  ;;  %v4919_v1 = vld [vmem:[#allocation9 + $0x368] sm:$0xf]  ;;  %v5470_v46 = vld [vmem:[#allocation9 + $0x30c] sm:$0xf]  ;;  %v4873_v47 = vld [vmem:[#allocation9 + $0x318] sm:$0xf0] }
 0x188   :  { %3072 = vmatpush.bf16.msrb.mxu0 %v4556_v13  ;;  %v2031_v6 = vpop.f32.mrf.mxu2  ;;  %3011 = vmatpush.bf16.msrb.mxu3 %v4868_v22  ;;  %v4920_v22 = vor.u32 %v5484_v2, %v4919_v1  ;;  %v5515_v1 = vld [vmem:[#allocation11 + $0x70] sm:$0xff] }
 0x189   :  { %3050 = vmatpush.bf16.msra.mxu2 %v4744_v0  ;;  %v4936_v0 = vor.u32 %v5488_v62, %v4935_v5  ;;  %v5480_v6 = vld [vmem:[#allocation9 + $0x354] sm:$0xf0] }
 0x18a   :  { %3085 = vmatpush.bf16.msrb.mxu1 %v4684_v15  ;;  %v4844_v15 = vor.u32 %v5462_v8, %v4841_v10 }
 0x18b   :  { %v2044_v13 = vpop.f32.mrf.mxu3 }
 0x18c   :  { %3073 = vmatpush.bf16.msrb.mxu0 %v4540_v3  ;;  %3051 = vmatmul.bf16.vlgmr.msra.gmra.mxu2 %v5827_v34  ;;  %v2043_v3 = vadd.f32 %v2042_v43, %v2030_v25  ;;  %v4745_v43 = vld [vmem:[#allocation9 + $0x218] sm:$0xf0]  ;;  %v5476_v13 = vld [vmem:[#allocation9 + $0x334] sm:$0xf0] }
 0x18d   :  { %3095 = vmatpush.bf16.msrb.mxu2 %v4860_v7 }
 0x18e   :  { %3086 = vmatpush.bf16.msrb.mxu1 %v4668_v32 }
 0x190   :  { %3074 = vmatpush.bf16.msrb.mxu0 %v4524_v39  ;;  %v4764_v39 = vor.u32 %v5442_v26, %v4761_v11  ;;  %v5482_v26 = vld [vmem:[#allocation9 + $0x36c] sm:$0xf]  ;;  %v4921_v11 = vld [vmem:[#allocation9 + $0x378] sm:$0xf0] }
 0x191   :  { %3096 = vmatpush.bf16.msrb.mxu2 %v4844_v15 }
 0x192   :  { %3087 = vmatpush.bf16.msrb.mxu1 %v4652_v40  ;;  %v5438_v40 = vld [vmem:[#allocation9 + $0x20c] sm:$0xf] }
 0x193   :  { %v4748_v29 = vor.u32 %v5438_v40, %v4745_v43  ;;  %v5474_v40 = vld [vmem:[#allocation9 + $0x32c] sm:$0xf]  ;;  %v4889_v43 = vld [vmem:[#allocation9 + $0x338] sm:$0xf0] }
 0x194   :  { %3075 = vmatpush.bf16.msrb.mxu0 %v4508_v56  ;;  %v4968_v56 = vor.u32 %v5496_v55, %v4967_v61 }
 0x195   :  { %3097 = vmatpush.bf16.msrb.mxu2 %v4828_v20  ;;  %v5472_v20 = vld [vmem:[#allocation9 + $0x314] sm:$0xf0] }
 0x196   :  { %3088 = vmatpush.bf16.msrb.mxu1 %v4636_v60  ;;  %v5850_v60 = vld [vmem:[%s5881_s4] sm:$0xf]  ;;  %v4872_v25 = vor.u32 %v5472_v20, %v4871_v19 }
 0x197   :  { %v2265_v63 = vperm.slane %v5850_v60, 0  ;;  %v5512_v20 = vld [vmem:[#allocation11 + $0x58] sm:$0xff] }
 0x198   :  { %3076 = vmatpush.bf16.msrb.mxu0 %v4492_v4  ;;  %v2055_v32 = vpop.f32.mrf.mxu0  ;;  %v4903_v4 = vld [vmem:[#allocation9 + $0x348] sm:$0xf] }
 0x199   :  { %3098 = vmatpush.bf16.msrb.mxu2 %v4812_v17  ;;  %v2056_v30 = vadd.f32 %v2055_v32, %v2043_v3  ;;  %v4904_v10 = vor.u32 %v5480_v6, %v4903_v4  ;;  %v4988_v17 = vor.u32 %v5498_v23, %v4985_v24  ;;  %v4972_v3 = vor.u32 %v5494_v27, %v4969_v28  ;;  %v5490_v32 = vld [vmem:[#allocation9 + $0x3ac] sm:$0xf]  ;;  %v5524_v23 = vld [vmem:[#allocation11 + $0xb8] sm:$0xff] }
 0x19a   :  { %3089 = vmatpush.bf16.msrb.mxu1 %v4620_v12  ;;  %v2068_v35 = vpop.f32.mrf.mxu1  ;;  %v4887_v12 = vld [vmem:[#allocation9 + $0x328] sm:$0xf] }
 0x19b   :  { %3077 = vmatmul.bf16.vlgmr.msrb.gmra.mxu0 %v5808_v31  ;;  %v4780_v31 = vor.u32 %v5446_v42, %v4777_v14  ;;  %v4888_v18 = vor.u32 %v5476_v13, %v4887_v12  ;;  %v5486_v42 = vld [vmem:[#allocation9 + $0x38c] sm:$0xf]  ;;  %v4937_v14 = vld [vmem:[#allocation9 + $0x398] sm:$0xf0] }
 0x19c   :  { %3385 = vmatpush.bf16.msra.mxu0 %v5508_v57  ;;  %v5502_v4 = vld [vmem:[#allocation11 + $0x8] sm:$0xff] }
 0x19d   :  { %3090 = vmatmul.bf16.vlgmr.msrb.gmra.mxu1 %v5806_v50  ;;  %3099 = vmatpush.bf16.msrb.mxu2 %v4796_v33  ;;  %v2069_v50 = vadd.f32 %v2068_v35, %v2056_v30  ;;  %v4953_v33 = vld [vmem:[#allocation9 + $0x3b8] sm:$0xf0]  ;;  %v2266_v30 = vperm.slane %v5850_v60, 1  ;;  %v5514_v6 = vld [vmem:[#allocation11 + $0x68] sm:$0xff] }
 0x19e   :  { %v4956_v35 = vor.u32 %v5490_v32, %v4953_v33  ;;  %v5510_v28 = vld [vmem:[#allocation11 + $0x48] sm:$0xff]  ;;  %v5509_v32 = vld [vmem:[#allocation11 + $0x40] sm:$0xff] }
 0x19f   :  { %v5521_v33 = vld [vmem:[#allocation11 + $0xa0] sm:$0xff] }
 0x1a0   :  { %v2081_v9 = vpop.f32.mrf.mxu2  ;;  %v2057_v45 = vpop.f32.mrf.mxu0  ;;  %3386 = vmatpush.bf16.msra.mxu0 %v5507_v58 }
 0x1a1   :  { %v2082_v36 = vadd.f32 %v2081_v9, %v2069_v50  ;;  %v2094_v37 = vpop.f32.mrf.mxu3  ;;  %3100 = vmatpush.bf16.msrb.mxu2 %v4780_v31  ;;  %v4940_v31 = vor.u32 %v5486_v42, %v4937_v14  ;;  %v4905_v45 = vld [vmem:[#allocation9 + $0x358] sm:$0xf0]  ;;  %v5519_v42 = vld [vmem:[#allocation11 + $0x90] sm:$0xff] }
 0x1a2   :  { %v2070_v38 = vpop.f32.mrf.mxu1 }
 0x1a3   :  { %v2095_v41 = vadd.f32 %v2094_v37, %v2082_v36  ;;  %v4924_v37 = vor.u32 %v5482_v26, %v4921_v11 }
 0x1a5   :  { %v2126_v44 = vadd.f32 %v2118_v48, %v2095_v41  ;;  %3101 = vmatpush.bf16.msrb.mxu2 %v4764_v39  ;;  %v5478_v48 = vld [vmem:[#allocation9 + $0x34c] sm:$0xf] }
 0x1a6   :  { %v4908_v38 = vor.u32 %v5478_v48, %v4905_v45  ;;  %v5531_v48 = vld [vmem:[#allocation11 + $0xf0] sm:$0xff] }
 0x1a7   :  { %v2130_v49 = vmax.f32 %v2126_v44, 0.0 }
 0x1a8   :  { %v2083_v51 = vpop.f32.mrf.mxu2 }
 0x1a9   :  { %v5843_v53 = vpack.c.bf16 %v2130_v49, %v2130_v49  ;;  %v2096_v54 = vpop.f32.mrf.mxu3  ;;  %3102 = vmatpush.bf16.msrb.mxu2 %v4748_v29  ;;  %v4892_v29 = vor.u32 %v5474_v40, %v4889_v43  ;;  %v4876_v49 = vor.u32 %v5470_v46, %v4873_v47  ;;  %v2267_v51 = vperm.slane %v5850_v60, 2  ;;  %v5530_v40 = vld [vmem:[#allocation11 + $0xe8] sm:$0xff]  ;;  %v5529_v43 = vld [vmem:[#allocation11 + $0xe0] sm:$0xff] }
 0x1ab   :  { %2960 = vmatmul.bf16.vlgmr.msra.gmra.mxu3 %v5843_v53 }
 0x1ac   :  { %3056 = vmatpush.bf16.msra.mxu3 %v4984_v52  ;;  %3103 = vmatmul.bf16.vlgmr.msrb.gmra.mxu2 %v5827_v34 }
 0x1ad   :  { %3411 = vmatpush.bf16.msra.mxu2 %v5524_v23 }
 0x1b0   :  { %3057 = vmatpush.bf16.msra.mxu3 %v4968_v56 }
 0x1b4   :  { %3058 = vmatpush.bf16.msra.mxu3 %v4952_v59 }
 0x1b8   :  { %v2922_v21 = vpop.f32.mrf.mxu0  ;;  %3059 = vmatpush.bf16.msra.mxu3 %v4936_v0  ;;  %v5516_v0 = vld [vmem:[#allocation11 + $0x78] sm:$0xff] }
 0x1b9   :  { %v2923_v34 = vadd.f32 %v2922_v21, %v2265_v63  ;;  %v5506_v63 = vld [vmem:[#allocation11 + $0x28] sm:$0xff]  ;;  %3398 = vmatpush.bf16.msra.mxu1 %v5516_v0  ;;  %v5504_v21 = vld [vmem:[#allocation11 + $0x18] sm:$0xff] }
 0x1ba   :  { %v2935_v7 = vpop.f32.mrf.mxu1  ;;  %3387 = vmatpush.bf16.msra.mxu0 %v5506_v63 }
 0x1bb   :  { %v5853_v8 = vadd.f32 %v2935_v7, %v2923_v34  ;;  %3012 = vmatmul.bf16.vlgmr.msrb.gmra.mxu3 %v5843_v53  ;;  %v5503_v34 = vld [vmem:[#allocation11 + $0x10] sm:$0xff] }
 0x1bc   :  { %3060 = vmatpush.bf16.msra.mxu3 %v4920_v22  ;;  %v2268_v22 = vperm.slane %v5850_v60, 3  ;;  %v5511_v60 = vld [vmem:[#allocation11 + $0x50] sm:$0xff] }
 0x1bd   :  { %3399 = vmatpush.bf16.msra.mxu1 %v5515_v1 }
 0x1c0   :  { %v2924_v15 = vpop.f32.mrf.mxu0  ;;  %3061 = vmatpush.bf16.msra.mxu3 %v4904_v10 }
 0x1c1   :  { %3400 = vmatpush.bf16.msra.mxu1 %v5514_v6 }
 0x1c2   :  { %v2937_v16 = vpop.f32.mrf.mxu1 }
 0x1c3   :  { %v5501_v16 = vld [vmem:[#allocation11] sm:$0xff] }
 0x1c4   :  { %3062 = vmatpush.bf16.msra.mxu3 %v4888_v18  ;;  %v5513_v18 = vld [vmem:[#allocation11 + $0x60] sm:$0xff] }
 0x1c5   :  { %3401 = vmatpush.bf16.msra.mxu1 %v5513_v18 }
 0x1c8   :  { %3063 = vmatpush.bf16.msra.mxu3 %v4872_v25 }
 0x1c9   :  { %3402 = vmatpush.bf16.msra.mxu1 %v5512_v20 }
 0x1cb   :  { %3064 = vmatmul.bf16.vlgmr.msra.gmra.mxu3 %v5843_v53 }
 0x1cc   :  { %3108 = vmatpush.bf16.msrb.mxu3 %v4988_v17  ;;  %v5523_v17 = vld [vmem:[#allocation11 + $0xb0] sm:$0xff] }
 0x1cd   :  { %3403 = vmatpush.bf16.msra.mxu1 %v5511_v60  ;;  %3412 = vmatpush.bf16.msra.mxu2 %v5523_v17 }
 0x1d0   :  { %3109 = vmatpush.bf16.msrb.mxu3 %v4972_v3  ;;  %v5522_v3 = vld [vmem:[#allocation11 + $0xa8] sm:$0xff] }
 0x1d1   :  { %3404 = vmatpush.bf16.msra.mxu1 %v5510_v28  ;;  %3413 = vmatpush.bf16.msra.mxu2 %v5522_v3 }
 0x1d4   :  { %3110 = vmatpush.bf16.msrb.mxu3 %v4956_v35  ;;  %v5520_v35 = vld [vmem:[#allocation11 + $0x98] sm:$0xff] }
 0x1d5   :  { %3405 = vmatpush.bf16.msra.mxu1 %v5509_v32  ;;  %3414 = vmatpush.bf16.msra.mxu2 %v5521_v33 }
 0x1d8   :  { %v2974_v50 = vpop.f32.mrf.mxu0  ;;  %3111 = vmatpush.bf16.msrb.mxu3 %v4940_v31 }
 0x1d9   :  { %v2975_v9 = vadd.f32 %v2974_v50, %v2266_v30  ;;  %3415 = vmatpush.bf16.msra.mxu2 %v5520_v35  ;;  %v5518_v30 = vld [vmem:[#allocation11 + $0x88] sm:$0xff] }
 0x1da   :  { %v2987_v36 = vpop.f32.mrf.mxu1 }
 0x1db   :  { %v5858_v39 = vadd.f32 %v2987_v36, %v2975_v9  ;;  %v5517_v9 = vld [vmem:[#allocation11 + $0x80] sm:$0xff]  ;;  %v5532_v36 = vld [vmem:[#allocation11 + $0xf8] sm:$0xff] }
 0x1dc   :  { %3112 = vmatpush.bf16.msrb.mxu3 %v4924_v37 }
 0x1dd   :  { %3416 = vmatpush.bf16.msra.mxu2 %v5519_v42 }
 0x1e0   :  { %v2976_v41 = vpop.f32.mrf.mxu0  ;;  %3113 = vmatpush.bf16.msrb.mxu3 %v4908_v38 }
 0x1e1   :  { %3417 = vmatpush.bf16.msra.mxu2 %v5518_v30 }
 0x1e2   :  { %v2989_v44 = vpop.f32.mrf.mxu1 }
 0x1e4   :  { %3114 = vmatpush.bf16.msrb.mxu3 %v4892_v29  ;;  %v5528_v29 = vld [vmem:[#allocation11 + $0xd8] sm:$0xff] }
 0x1e5   :  { %3418 = vmatpush.bf16.msra.mxu2 %v5517_v9 }
 0x1e8   :  { %3115 = vmatpush.bf16.msrb.mxu3 %v4876_v49  ;;  %v5527_v49 = vld [vmem:[#allocation11 + $0xd0] sm:$0xff] }
 0x1eb   :  { %3116 = vmatmul.bf16.vlgmr.msrb.gmra.mxu3 %v5843_v53  ;;  %v5505_v53 = vld [vmem:[#allocation11 + $0x20] sm:$0xff] }
 0x1ec   :  { %3388 = vmatpush.bf16.msra.mxu0 %v5505_v53  ;;  %3424 = vmatpush.bf16.msra.mxu3 %v5532_v36 }
 0x1ef   :  { %v2948_v55 = vpop.f32.mrf.mxu2 }
 0x1f0   :  { %3389 = vmatpush.bf16.msra.mxu0 %v5504_v21  ;;  %v2949_v14 = vadd.f32 %v2948_v55, %v5853_v8  ;;  %3425 = vmatpush.bf16.msra.mxu3 %v5531_v48 }
 0x1f4   :  { %3390 = vmatpush.bf16.msra.mxu0 %v5503_v34  ;;  %3426 = vmatpush.bf16.msra.mxu3 %v5530_v40 }
 0x1f7   :  { %v2950_v62 = vpop.f32.mrf.mxu2 }
 0x1f8   :  { %v3026_v52 = vpop.f32.mrf.mxu0  ;;  %3391 = vmatpush.bf16.msra.mxu0 %v5502_v4  ;;  %3427 = vmatpush.bf16.msra.mxu3 %v5529_v43 }
 0x1f9   :  { %v3027_v54 = vadd.f32 %v3026_v52, %v2267_v51  ;;  %v5526_v52 = vld [vmem:[#allocation11 + $0xc8] sm:$0xff] }
 0x1fa   :  { %v3039_v61 = vpop.f32.mrf.mxu1 }
 0x1fb   :  { %v5862_v56 = vadd.f32 %v3039_v61, %v3027_v54  ;;  %v5525_v61 = vld [vmem:[#allocation11 + $0xc0] sm:$0xff] }
 0x1fc   :  { %3392 = vmatpush.bf16.msra.mxu0 %v5501_v16  ;;  %3428 = vmatpush.bf16.msra.mxu3 %v5528_v29  ;;  %v5542_v16 = vld [vmem:[#allocation3] ss:$0 sm:$0xff] }
 0x1ff   :  { %v5864_v2 = vpop.f32.mrf.mxu2 }
 0x200   :  { %v3028_v59 = vpop.f32.mrf.mxu0  ;;  %v3001_v8 = vadd.f32 %v5864_v2, %v5858_v39  ;;  %3429 = vmatpush.bf16.msra.mxu3 %v5527_v49 }
 0x202   :  { %v3041_v5 = vpop.f32.mrf.mxu1 }
 0x204   :  { %3430 = vmatpush.bf16.msra.mxu3 %v5526_v52 }
 0x207   :  { %v3002_v7 = vpop.f32.mrf.mxu2 }
 0x208   :  { %3431 = vmatpush.bf16.msra.mxu3 %v5525_v61 }
 0x20f   :  { %v3052_v19 = vpop.f32.mrf.mxu2 }
 0x210   :  { %v3053_v54 = vadd.f32 %v3052_v19, %v5862_v56 }
 0x217   :  { %v3054_v27 = vpop.f32.mrf.mxu2 }
 0x218   :  { %v3078_v10 = vpop.f32.mrf.mxu0 }
 0x219   :  { %v3079_v12 = vadd.f32 %v3078_v10, %v2268_v22 }
 0x21a   :  { %v3091_v13 = vpop.f32.mrf.mxu1 }
 0x21b   :  { %v5867_v15 = vadd.f32 %v3091_v13, %v3079_v12 }
 0x220   :  { %v3080_v24 = vpop.f32.mrf.mxu0 }
 0x222   :  { %v3093_v25 = vpop.f32.mrf.mxu1 }
 0x22e   :  { %v2961_v31 = vpop.f32.mrf.mxu3 }
 0x22f   :  { %v2962_v26 = vadd.f32 %v2961_v31, %v2949_v14  ;;  %v3104_v11 = vpop.f32.mrf.mxu2 }
 0x230   :  { %v3105_v5 = vadd.f32 %v3104_v11, %v5867_v15 }
 0x231   :  { %v3121_v50 = vmax.f32 %v2962_v26, 0.0 }
 0x233   :  { %v3125_v37 = vpack.c.bf16 %v3121_v50, %v3121_v50 }
 0x235   :  { %3393 = vmatmul.bf16.vlgmr.msra.gmra.mxu0 %v3125_v37 }
 0x236   :  { %v2963_v45 = vpop.f32.mrf.mxu3 }
 0x237   :  { %v3106_v38 = vpop.f32.mrf.mxu2 }
 0x23e   :  { %v3013_v41 = vpop.f32.mrf.mxu3 }
 0x23f   :  { %v3014_v44 = vadd.f32 %v3013_v41, %v3001_v8 }
 0x241   :  { %v3122_v46 = vmax.f32 %v3014_v44, 0.0 }
 0x243   :  { %v3126_v47 = vpack.c.bf16 %v3122_v46, %v3122_v46 }
 0x245   :  { %3406 = vmatmul.bf16.vlgmr.msra.gmra.mxu1 %v3126_v47 }
 0x246   :  { %v3015_v51 = vpop.f32.mrf.mxu3 }
 0x24e   :  { %v3065_v55 = vpop.f32.mrf.mxu3 }
 0x24f   :  { %v3066_v57 = vadd.f32 %v3065_v55, %v3053_v54 }
 0x251   :  { %v3123_v39 = vmax.f32 %v3066_v57, 0.0 }
 0x253   :  { %v3127_v58 = vpack.c.bf16 %v3123_v39, %v3123_v39 }
 0x255   :  { %3419 = vmatmul.bf16.vlgmr.msra.gmra.mxu2 %v3127_v58 }
 0x256   :  { %v3067_v59 = vpop.f32.mrf.mxu3 }
 0x26e   :  { %v3117_v62 = vpop.f32.mrf.mxu3 }
 0x26f   :  { %v3118_v63 = vadd.f32 %v3117_v62, %v3105_v5 }
 0x271   :  { %v3124_v0 = vmax.f32 %v3118_v63, 0.0 }
 0x273   :  { %v3128_v1 = vpack.c.bf16 %v3124_v0, %v3124_v0 }
 0x275   :  { %3432 = vmatmul.bf16.vlgmr.msra.gmra.mxu3 %v3128_v1 }
 0x276   :  { %v3119_v53 = vpop.f32.mrf.mxu3 }
 0x2b2   :  { %v3394_v2 = vpop.f32.mrf.mxu0 }
 0x2ba   :  { %v3396_v21 = vpop.f32.mrf.mxu0 }
 0x2c2   :  { %v3407_v34 = vpop.f32.mrf.mxu1 }
 0x2c3   :  { %v3408_v4 = vadd.f32 %v3407_v34, %v3394_v2 }
 0x2ca   :  { %v3409_v56 = vpop.f32.mrf.mxu1 }
 0x2d8   :  { %v3420_v7 = vpop.f32.mrf.mxu2 }
 0x2d9   :  { %v3421_v6 = vadd.f32 %v3420_v7, %v3408_v4 }
 0x2e0   :  { %v3422_v22 = vpop.f32.mrf.mxu2 }
 0x2f8   :  { %v3433_v10 = vpop.f32.mrf.mxu3 }
 0x2f9   :  { %v3434_v12 = vadd.f32 %v3433_v10, %v3421_v6 }
 0x2fb   :  { %3437 = vadd.xlane.f32.xlu0 %v3434_v12 }
 0x300   :  { %v3435_v13 = vpop.f32.mrf.mxu3 }
 0x36e   :  { %v3438_v15 = vpop.xlane.xlu0 %3437 }
 0x36f   :  { %v3443_v18 = vadd.f32 %v5542_v16, %v3438_v15 }
 0x371   :  { %3445 = vst.msk [vmem:[%s5884_s7] sm:$0xff] %vm3444_vm0, %v3443_v18 }
 0x372   :  { %3450 = vsyncpa [#allocation5], 1 }
 0x373   :  { %3451 = vsyncpa [#allocation7], 1 }
 0x374   :  { %3452 = vsyncpa [#allocation10], 1 }

</bundles_post_ra>
